<compile_context>
chip_gen: v5e
topology: v5e:2x2
jax: 0.10.0
libtpu: 0.0.40
codegen_flags: <defaults>
</compile_context>

<pallas_src>
import jax
import jax.numpy as jnp
from jax.experimental import pallas as pl
from jax.experimental.pallas import tpu as pltpu

NUM_CLASSES = 22
SIZE = 16               # scaled-down stand-in for EfficientNet-b1 input size (240)
OUT_H, OUT_W = 24, 32   # scaled-down stand-in for the hardcoded (480, 640) output
LEAKY = 0.1

IMAGENET_MEAN = jnp.array([0.485, 0.456, 0.406], jnp.float32)
IMAGENET_STD = jnp.array([0.229, 0.224, 0.225], jnp.float32)

TILE_M_MAX = 512
TILE_K_MAX = 2048        # >= largest K (1440) -> single K tile per layer
TILE_N_MAX = 256
VMEM_LIMIT_BYTES = 32 * 1024 * 1024


def _round_up(x, m):
    return ((x + m - 1) // m) * m


def _tile_kn(K, N):
    tk = min(TILE_K_MAX, _round_up(max(K, 128), 128))
    tn = min(TILE_N_MAX, _round_up(max(N, 128), 128))
    return tk, tn, _round_up(K, tk), _round_up(N, tn)


# ---------------------------------------------------------------------------
# Pallas hot path: (patches @ W + bias) with fused per-column LeakyReLU.
# Single K tile (whole reduction in one dot), grid = (M blocks, N blocks),
# weight/bias/slope tiles constant across M -> VMEM resident.
# ---------------------------------------------------------------------------
def _mm_kernel(x_ref, w_ref, b_ref, s_ref, o_ref):
    acc = jnp.dot(x_ref[...], w_ref[...], preferred_element_type=jnp.float32)
    acc = acc + b_ref[...]
    acc = jnp.where(acc >= 0.0, acc, acc * s_ref[...])   # slope==1.0 -> linear
    o_ref[...] = acc.astype(o_ref.dtype)


def matmul_bias_act(x, packed):
    """(M,K) @ (Kp,Np) + b, per-column LeakyReLU. Returns (M, Np) bf16."""
    M, K = x.shape
    assert K == packed["K"], (K, packed["K"])
    Kp, Np = packed["w"].shape
    tn = packed["tn"]
    assert Kp <= TILE_K_MAX and Kp == packed["tk"] and Np % tn == 0

    tm = min(TILE_M_MAX, _round_up(M, 16))
    if M > 16 and tm >= M:
        # split M so v7x's second TensorCore gets a block (no-op perf on v5e/v6e)
        tm = _round_up((M + 1) // 2, 16)
    Mp = _round_up(M, tm)

    xp = x.astype(jnp.bfloat16)
    if (Mp, Kp) != (M, K):
        xp = jnp.pad(xp, ((0, Mp - M), (0, Kp - K)))

    out = pl.pallas_call(
        _mm_kernel,
        out_shape=jax.ShapeDtypeStruct((Mp, Np), jnp.bfloat16),
        grid=(Mp // tm, Np // tn),
        in_specs=[
            pl.BlockSpec((tm, Kp), lambda i, j: (i, 0)),
            pl.BlockSpec((Kp, tn), lambda i, j: (0, j)),
            pl.BlockSpec((1, tn), lambda i, j: (0, j)),
            pl.BlockSpec((1, tn), lambda i, j: (0, j)),
        ],
        out_specs=pl.BlockSpec((tm, tn), lambda i, j: (i, j)),
        compiler_params=pltpu.CompilerParams(
            dimension_semantics=("parallel", "parallel"),
            vmem_limit_bytes=VMEM_LIMIT_BYTES,
        ),
    )(xp, packed["w"], packed["b"], packed["s"])
    return out[:M]   # (M, Np) bf16; callers slice the column range they need


# ---------------------------------------------------------------------------
# Weight packing (done ONCE at init): matmul form, padded to tile multiples,
# bf16 weights, f32 bias + per-column activation slope.
# ---------------------------------------------------------------------------
def _pack_matmul(wmat, b, slope):
    K, N = wmat.shape
    assert K <= TILE_K_MAX
    tk, tn, Kp, Np = _tile_kn(K, N)
    wp = jnp.zeros((Kp, Np), jnp.bfloat16).at[:K, :N].set(wmat.astype(jnp.bfloat16))
    bp = jnp.zeros((1, Np), jnp.float32)
    if b is not None:
        bp = bp.at[0, :N].set(jnp.asarray(b, jnp.float32))
    sp = jnp.ones((1, Np), jnp.float32)
    sp = sp.at[0, :N].set(jnp.broadcast_to(jnp.asarray(slope, jnp.float32), (N,)))
    return {"w": wp, "b": bp, "s": sp, "K": K, "N": N, "tk": tk, "tn": tn}


def _conv_matmul_form(w_oihw):
    cout, cin, kh, kw = w_oihw.shape
    return jnp.transpose(w_oihw, (2, 3, 1, 0)).reshape(kh * kw * cin, cout)


def _pack_conv(w_oihw, b, slope):
    cout, cin, kh, kw = w_oihw.shape
    p = _pack_matmul(_conv_matmul_form(w_oihw), b, slope)
    p["kh"], p["kw"] = kh, kw
    return p


def _expand_deconv_weight(w_iohw):
    """ConvTranspose2d(k=4,s=2,p=1) weight (Cin,Cout,4,4) -> equivalent 3x3 conv
    weight (4*Cout, Cin, 3, 3); expanded channel = (rh*2+rw)*Cout + co."""
    cin, cout, _, _ = w_iohw.shape
    wc = jnp.zeros((4 * cout, cin, 3, 3), jnp.float32)
    taps = {0: ((0, 3), (1, 1)), 1: ((1, 2), (2, 0))}
    for rh in (0, 1):
        for rw in (0, 1):
            base = (rh * 2 + rw) * cout
            for (i, kh) in taps[rh]:
                for (j, kw) in taps[rw]:
                    wc = wc.at[base:base + cout, :, i, j].set(
                        jnp.transpose(w_iohw[:, :, kh, kw], (1, 0)))
    return wc


def _pack_deconv(w_iohw, b, slope):
    cin, cout, _, _ = w_iohw.shape
    b_exp = None if b is None else jnp.tile(jnp.asarray(b, jnp.float32), 4)
    p = _pack_conv(_expand_deconv_weight(w_iohw), b_exp, slope)
    p["cout"] = cout
    return p


def _pack_decoder_level(w_deconv_iohw, w_flow_oihw, w_label_iohw=None, b_label=None):
    """Fuse {deconv(4,2,1) sub-pixel}, {pred_flow 3x3} and (segmentation level)
    {label layer 0 deconv} into ONE matmul over the shared 3x3 im2col of x."""
    cin, cout = w_deconv_iohw.shape[:2]
    mats = [_conv_matmul_form(_expand_deconv_weight(w_deconv_iohw)),
            _conv_matmul_form(w_flow_oihw)]
    biases = [jnp.zeros((4 * cout,), jnp.float32), jnp.zeros((2,), jnp.float32)]
    slopes = [jnp.full((4 * cout,), LEAKY, jnp.float32), jnp.ones((2,), jnp.float32)]
    cout_label = 0
    if w_label_iohw is not None:
        cout_label = w_label_iohw.shape[1]
        mats.append(_conv_matmul_form(_expand_deconv_weight(w_label_iohw)))
        biases.append(jnp.tile(jnp.asarray(b_label, jnp.float32), 4))
        slopes.append(jnp.full((4 * cout_label,), LEAKY, jnp.float32))
    p = _pack_matmul(jnp.concatenate(mats, axis=1),
                     jnp.concatenate(biases),
                     jnp.concatenate(slopes))
    p["kh"] = p["kw"] = 3
    p["cout_deconv"] = cout
    p["cout_label"] = cout_label
    p["n_deconv"] = 4 * cout
    p["n_flow"] = 2
    p["n_label"] = 4 * cout_label
    return p


# ---------------------------------------------------------------------------
# Conv / transposed conv built on the Pallas matmul kernel (im2col is glue).
# TODO(synk): im2col is still materialized in HBM (bf16); fusing it into the
# kernel via a halo'd spatial BlockSpec (3x3 taps as the reduction) would cut
# another ~9x of activation traffic at the real 480x640 scale.
# ---------------------------------------------------------------------------
def _im2col(x, kh, kw, stride, pad):
    x = x.astype(jnp.bfloat16)
    x = jnp.pad(x, ((0, 0), (pad, pad), (pad, pad), (0, 0)))
    B, H, W, C = x.shape
    Ho = (H - kh) // stride + 1
    Wo = (W - kw) // stride + 1
    cols = []
    for i in range(kh):
        for j in range(kw):
            cols.append(x[:, i:i + (Ho - 1) * stride + 1:stride,
                           j:j + (Wo - 1) * stride + 1:stride, :])
    cols = jnp.concatenate(cols, axis=-1)
    return cols.reshape(B * Ho * Wo, kh * kw * C), (B, Ho, Wo)


def conv2d(x, packed, stride=1, pad=1):
    cols, (B, Ho, Wo) = _im2col(x, packed["kh"], packed["kw"], stride, pad)
    out = matmul_bias_act(cols, packed)[:, :packed["N"]]
    return out.reshape(B, Ho, Wo, packed["N"])


def _pixel_shuffle2(y, cout):
    B, H, W, _ = y.shape
    y = y.reshape(B, H, W, 2, 2, cout)       # (..., rh, rw, co), bf16
    y = jnp.transpose(y, (0, 1, 3, 2, 4, 5))
    return y.reshape(B, 2 * H, 2 * W, cout)


def conv_transpose2d(x, packed):
    """ConvTranspose2d(k=4,s=2,p=1): expanded 3x3 conv + pixel shuffle."""
    return _pixel_shuffle2(conv2d(x, packed), packed["cout"])


# ---------------------------------------------------------------------------
# Resampling / normalization glue (plain JAX).
# ---------------------------------------------------------------------------
def upsample_nearest(x, oh, ow):
    B, H, W, C = x.shape
    ys = jnp.floor(jnp.arange(oh) * (H / oh)).astype(jnp.int32)
    xs = jnp.floor(jnp.arange(ow) * (W / ow)).astype(jnp.int32)
    return x[:, ys][:, :, xs]


def upsample_bilinear_ac(x, oh, ow):  # align_corners=True (UpsamplingBilinear2d)
    B, H, W, C = x.shape
    ys = jnp.arange(oh, dtype=jnp.float32) * ((H - 1) / max(oh - 1, 1))
    xs = jnp.arange(ow, dtype=jnp.float32) * ((W - 1) / max(ow - 1, 1))
    y0 = jnp.floor(ys).astype(jnp.int32)
    y1 = jnp.minimum(y0 + 1, H - 1)
    x0 = jnp.floor(xs).astype(jnp.int32)
    x1 = jnp.minimum(x0 + 1, W - 1)
    wy = (ys - y0.astype(jnp.float32))[None, :, None, None]
    wx = (xs - x0.astype(jnp.float32))[None, None, :, None]
    top = x[:, y0][:, :, x0] * (1 - wx) + x[:, y0][:, :, x1] * wx
    bot = x[:, y1][:, :, x0] * (1 - wx) + x[:, y1][:, :, x1] * wx
    return top * (1 - wy) + bot * wy


def normalize(x, mean, std):
    return (x - mean.reshape(1, 1, 1, -1)) / std.reshape(1, 1, 1, -1)


# ---------------------------------------------------------------------------
# Deterministic parameter construction (mirrors EfficientDisparity.__init__
# channel bookkeeping with a scaled-down feature pyramid).
# ---------------------------------------------------------------------------
FEATURE_SIZES_BACKBONE = [16, 24, 40]          # synthetic pyramid channels
FEATURE_SIZES = [8] + FEATURE_SIZES_BACKBONE   # == self.feature_sizes
LABEL_FEAT = [16, 8, NUM_CLASSES]


def _init_params(key):
    keys = iter(jax.random.split(key, 128))

    def nrm(shape, fan_in):
        return jax.random.normal(next(keys), shape, jnp.float32) / jnp.sqrt(fan_in)

    params = {"backbone_rgb": [], "backbone_depth": []}
    cin = 3
    for c in FEATURE_SIZES_BACKBONE:
        params["backbone_rgb"].append(
            _pack_conv(nrm((c, cin, 3, 3), cin * 9), nrm((c,), cin * 9), LEAKY))
        cin = c
    cin = 1
    for c in FEATURE_SIZES_BACKBONE:
        params["backbone_depth"].append(
            _pack_conv(nrm((c, cin, 3, 3), cin * 9), nrm((c,), cin * 9), LEAKY))
        cin = c

    n = len(FEATURE_SIZES)
    n_deconv = n - 1
    seg_level = n_deconv - len(LABEL_FEAT) + 2   # level at which segmentation = x

    decoder, upflow = [], []
    for i in range(1, n):
        inc = 4 * FEATURE_SIZES[-i] if i == 1 else FEATURE_SIZES[-i] + 2
        out = FEATURE_SIZES[-(i + 1)]
        w_dec = nrm((inc, out, 4, 4), inc * 16)      # ConvTranspose weight (in,out,4,4)
        w_flow = nrm((2, inc, 3, 3), inc * 9)        # predict_flow, bias=False
        if i == seg_level:
            w_lab = nrm((inc, LABEL_FEAT[0], 4, 4), inc * 16)
            b_lab = nrm((LABEL_FEAT[0],), inc * 16)
            decoder.append(_pack_decoder_level(w_dec, w_flow, w_lab, b_lab))
        else:
            decoder.append(_pack_decoder_level(w_dec, w_flow))
        upflow.append(_pack_deconv(nrm((2, 2, 4, 4), 2 * 16), None, 1.0))

    label_rest = []
    for li in range(len(LABEL_FEAT) - 1):            # label layers 1..end
        cin_l, cout_l = LABEL_FEAT[li], LABEL_FEAT[li + 1]
        label_rest.append(_pack_deconv(nrm((cin_l, cout_l, 4, 4), cin_l * 16),
                                       nrm((cout_l,), cin_l * 16), LEAKY))

    params["decoder"] = decoder
    params["upsample_flow"] = upflow
    params["label_rest"] = label_rest
    params["pred_flow_final"] = _pack_conv(
        nrm((2, FEATURE_SIZES[0], 3, 3), FEATURE_SIZES[0] * 9), None, 1.0)
    return params


# ---------------------------------------------------------------------------
# Forward pass (mirrors EfficientDisparity.forward).
# ---------------------------------------------------------------------------
# TODO(synk): EfficientNet.from_pretrained has no clean Pallas equivalent; it is
# replaced by a deterministic 3-level strided-conv pyramid (same role: features
# at 1/2, 1/4, 1/8 resolution) built on the same Pallas matmul kernel.
def _backbone(x, layer_params):
    feats = []
    for p in layer_params:
        x = conv2d(x, p, stride=2, pad=1)   # LeakyReLU baked into slope vector
        feats.append(x)
    return feats


def forward(data, params):
    """data: (BS, 8, H, W) float32, NCHW like the PyTorch module."""
    ced_real = ced_render = ced_real_d = ced_render_d = 1

    data_nhwc = jnp.transpose(data, (0, 2, 3, 1)).astype(jnp.float32)
    B = data_nhwc.shape[0]
    real = upsample_bilinear_ac(data_nhwc[..., 0:3], SIZE, SIZE)
    render = upsample_bilinear_ac(data_nhwc[..., 3:6], SIZE, SIZE)
    depth = data_nhwc[..., 6:8] / 10000.0
    real = normalize(real, IMAGENET_MEAN, IMAGENET_STD)
    render = normalize(render, IMAGENET_MEAN, IMAGENET_STD)
    real_d = upsample_nearest(depth[..., 0:1], SIZE, SIZE)
    render_d = upsample_nearest(depth[..., 1:2], SIZE, SIZE)

    # real/render share the rgb backbone -> batch them (same for depth).
    feat_rgb = _backbone(jnp.concatenate([real, render], axis=0), params["backbone_rgb"])
    feat_real = [f[:B] for f in feat_rgb]
    feat_render = [f[B:] for f in feat_rgb]
    feat_dep = _backbone(jnp.concatenate([real_d, render_d], axis=0), params["backbone_depth"])
    feat_real_d = [f[:B] for f in feat_dep][-ced_real_d:]
    feat_render_d = [f[B:] for f in feat_dep][-ced_render_d:]

    def cat(x, y):
        return y if x is None else jnp.concatenate([x, y], axis=-1)

    pred_flow_feats = []
    segmentation = None
    x = None
    n_deconv = len(params["decoder"])

    for j in range(1, n_deconv + 1):
        if j - 1 < ced_real:
            x = cat(x, feat_real[-j])
        if j - 1 < ced_render:
            x = cat(x, feat_render[-j])
        if j - 1 < ced_real_d:
            x = cat(x, feat_real_d[-j])
        if j - 1 < ced_render_d:
            x = cat(x, feat_render_d[-j])
        if j > 1:  # pred_flow_pyramid_add (crops both H and W to the W extent)
            dim = x.shape[2]
            f_up = conv_transpose2d(pred_flow_feats[-1],
                                    params["upsample_flow"][j - 2])[:, :dim, :dim, :]
            x = cat(x, f_up)

        # One fused matmul per level: deconv + flow head (+ label layer 0).
        p = params["decoder"][j - 1]
        Bx, Hx, Wx, _ = x.shape
        cols, _ = _im2col(x, 3, 3, 1, 1)
        fused = matmul_bias_act(cols, p)              # (Bx*Hx*Wx, Np) bf16
        nd, nf, nl = p["n_deconv"], p["n_flow"], p["n_label"]

        flow = fused[:, nd:nd + nf].reshape(Bx, Hx, Wx, nf)
        if j + 1 <= len(feat_real):                   # mirrors try/except IndexError
            dim = feat_real[-(j + 1)].shape[2]
            flow = flow[:, :dim, :dim, :]
        pred_flow_feats.append(flow)

        if nl > 0:  # segmentation level: label_layers[0] shares this im2col
            segmentation = _pixel_shuffle2(
                fused[:, nd + nf:nd + nf + nl].reshape(Bx, Hx, Wx, nl),
                p["cout_label"])

        x = _pixel_shuffle2(fused[:, :nd].reshape(Bx, Hx, Wx, nd), p["cout_deconv"])
        if j + 1 <= len(feat_real):
            dim = feat_real[-(j + 1)].shape[2]
            x = x[:, :dim, :dim, :]

    for lp in params["label_rest"]:                   # label layers 1..end
        segmentation = conv_transpose2d(segmentation, lp)
    segmentation = upsample_nearest(segmentation, OUT_H, OUT_W)

    pred_flow_feats.append(conv2d(x, params["pred_flow_final"]))
    pred_flow_feats.append(upsample_bilinear_ac(pred_flow_feats[-1], OUT_H, OUT_W))

    # back to PyTorch NCHW convention (and f32) for outputs
    flows = [jnp.transpose(f, (0, 3, 1, 2)).astype(jnp.float32) for f in pred_flow_feats]
    segmentation = jnp.transpose(segmentation, (0, 3, 1, 2)).astype(jnp.float32)
    return flows, segmentation


if __name__ == "__main__":
    key = jax.random.PRNGKey(0)
    kp, kd = jax.random.split(key)
    params = _init_params(kp)

    BS, C, H, W = 2, 8, 12, 12
    data = jax.random.uniform(kd, (BS, C, H, W), jnp.float32)
    data = data.at[:, 6:].multiply(10000.0)  # depth channels in raw units

    fwd = jax.jit(lambda d: forward(d, params))
    flows, seg = fwd(data)
    jax.block_until_ready(flows)
    jax.block_until_ready(seg)
    assert seg.shape == (BS, NUM_CLASSES, OUT_H, OUT_W)
    assert flows[-1].shape == (BS, 2, OUT_H, OUT_W)
    print("KERNEL_OK")
</pallas_src>

<mosaic_0001>
module attributes {stable_mosaic.version = 11 : i64} {
  func.func @_mm_kernel(%arg0: i32, %arg1: i32, %arg2: memref<128x128xbf16, #tpu.memory_space<vmem>>, %arg3: memref<128x128xbf16, #tpu.memory_space<vmem>>, %arg4: memref<1x128xf32, #tpu.memory_space<vmem>>, %arg5: memref<1x128xf32, #tpu.memory_space<vmem>>, %arg6: memref<128x128xbf16, #tpu.memory_space<vmem>>) attributes {dimension_semantics = [#tpu.dimension_semantics<parallel>, #tpu.dimension_semantics<parallel>], iteration_bounds = array<i64: 2, 1>, scalar_prefetch = 0 : i64, scratch_operands = 0 : i64, tpu.core_type = #tpu.core_type<tc>, window_params = [{transform_indices = @transform_0, window_bounds = array<i64: 128, 128>}, {transform_indices = @transform_1, window_bounds = array<i64: 128, 128>}, {transform_indices = @transform_2, window_bounds = array<i64: 1, 128>}, {transform_indices = @transform_3, window_bounds = array<i64: 1, 128>}, {transform_indices = @transform_4, window_bounds = array<i64: 128, 128>}]} {
    %c0 = arith.constant 0 : index
    %c0_0 = arith.constant 0 : index
    %0 = vector.load %arg2[%c0, %c0_0] : memref<128x128xbf16, #tpu.memory_space<vmem>>, vector<128x128xbf16>
    %c0_1 = arith.constant 0 : index
    %c0_2 = arith.constant 0 : index
    %1 = vector.load %arg3[%c0_1, %c0_2] : memref<128x128xbf16, #tpu.memory_space<vmem>>, vector<128x128xbf16>
    %cst = arith.constant dense<0.000000e+00> : vector<128x128xf32>
    %2 = tpu.matmul %0, %1, %cst {dimension_numbers = #tpu.dot_dimension_numbers<[1], [0], [0], [1], [0, 0, 1, 1], [], []>} : vector<128x128xbf16>, vector<128x128xbf16>, vector<128x128xf32> -> vector<128x128xf32>
    %c0_3 = arith.constant 0 : index
    %c0_4 = arith.constant 0 : index
    %3 = vector.load %arg4[%c0_3, %c0_4] : memref<1x128xf32, #tpu.memory_space<vmem>>, vector<1x128xf32>
    %4 = vector.broadcast %3 : vector<1x128xf32> to vector<128x128xf32>
    %5 = arith.addf %2, %4 : vector<128x128xf32>
    %cst_5 = arith.constant 0.000000e+00 : f32
    %6 = vector.broadcast %cst_5 : f32 to vector<128x128xf32>
    %7 = arith.cmpf oge, %5, %6 : vector<128x128xf32>
    %c0_6 = arith.constant 0 : index
    %c0_7 = arith.constant 0 : index
    %8 = vector.load %arg5[%c0_6, %c0_7] : memref<1x128xf32, #tpu.memory_space<vmem>>, vector<1x128xf32>
    %9 = vector.broadcast %8 : vector<1x128xf32> to vector<128x128xf32>
    %10 = arith.mulf %5, %9 : vector<128x128xf32>
    %11 = arith.select %7, %5, %10 : vector<128x128xi1>, vector<128x128xf32>
    %12 = arith.truncf %11 : vector<128x128xf32> to vector<128x128xbf16>
    %c0_8 = arith.constant 0 : index
    %c0_9 = arith.constant 0 : index
    %13 = vector.load %arg6[%c0_8, %c0_9] : memref<128x128xbf16, #tpu.memory_space<vmem>>, vector<128x128xbf16>
    tpu.vector_store %arg6[%c0_8, %c0_9], %12 {strides = array<i32>} : memref<128x128xbf16, #tpu.memory_space<vmem>>, vector<128x128xbf16>,
    return
  }
  func.func @transform_0(%arg0: i32, %arg1: i32) -> (i32, i32) {
    %c0_i32 = arith.constant 0 : i32
    %c0_i32_0 = arith.constant 0 : i32
    return %arg0, %c0_i32 : i32, i32
  }
  func.func @transform_1(%arg0: i32, %arg1: i32) -> (i32, i32) {
    %c0_i32 = arith.constant 0 : i32
    %c0_i32_0 = arith.constant 0 : i32
    return %c0_i32, %arg1 : i32, i32
  }
  func.func @transform_2(%arg0: i32, %arg1: i32) -> (i32, i32) {
    %c0_i32 = arith.constant 0 : i32
    %c0_i32_0 = arith.constant 0 : i32
    return %c0_i32, %arg1 : i32, i32
  }
  func.func @transform_3(%arg0: i32, %arg1: i32) -> (i32, i32) {
    %c0_i32 = arith.constant 0 : i32
    %c0_i32_0 = arith.constant 0 : i32
    return %c0_i32, %arg1 : i32, i32
  }
  func.func @transform_4(%arg0: i32, %arg1: i32) -> (i32, i32) {
    %c0_i32 = arith.constant 0 : i32
    return %arg0, %arg1 : i32, i32
  }
}

module attributes {stable_mosaic.version = 11 : i64} {
  func.func @_mm_kernel(%arg0: i32, %arg1: i32, %arg2: memref<32x256xbf16, #tpu.memory_space<vmem>>, %arg3: memref<256x128xbf16, #tpu.memory_space<vmem>>, %arg4: memref<1x128xf32, #tpu.memory_space<vmem>>, %arg5: memref<1x128xf32, #tpu.memory_space<vmem>>, %arg6: memref<32x128xbf16, #tpu.memory_space<vmem>>) attributes {dimension_semantics = [#tpu.dimension_semantics<parallel>, #tpu.dimension_semantics<parallel>], iteration_bounds = array<i64: 2, 1>, scalar_prefetch = 0 : i64, scratch_operands = 0 : i64, tpu.core_type = #tpu.core_type<tc>, window_params = [{transform_indices = @transform_0, window_bounds = array<i64: 32, 256>}, {transform_indices = @transform_1, window_bounds = array<i64: 256, 128>}, {transform_indices = @transform_2, window_bounds = array<i64: 1, 128>}, {transform_indices = @transform_3, window_bounds = array<i64: 1, 128>}, {transform_indices = @transform_4, window_bounds = array<i64: 32, 128>}]} {
    %c0 = arith.constant 0 : index
    %c0_0 = arith.constant 0 : index
    %0 = vector.load %arg2[%c0, %c0_0] : memref<32x256xbf16, #tpu.memory_space<vmem>>, vector<32x256xbf16>
    %c0_1 = arith.constant 0 : index
    %c0_2 = arith.constant 0 : index
    %1 = vector.load %arg3[%c0_1, %c0_2] : memref<256x128xbf16, #tpu.memory_space<vmem>>, vector<256x128xbf16>
    %cst = arith.constant dense<0.000000e+00> : vector<32x128xf32>
    %2 = tpu.matmul %0, %1, %cst {dimension_numbers = #tpu.dot_dimension_numbers<[1], [0], [0], [1], [0, 0, 1, 1], [], []>} : vector<32x256xbf16>, vector<256x128xbf16>, vector<32x128xf32> -> vector<32x128xf32>
    %c0_3 = arith.constant 0 : index
    %c0_4 = arith.constant 0 : index
    %3 = vector.load %arg4[%c0_3, %c0_4] : memref<1x128xf32, #tpu.memory_space<vmem>>, vector<1x128xf32>
    %4 = vector.broadcast %3 : vector<1x128xf32> to vector<32x128xf32>
    %5 = arith.addf %2, %4 : vector<32x128xf32>
    %cst_5 = arith.constant 0.000000e+00 : f32
    %6 = vector.broadcast %cst_5 : f32 to vector<32x128xf32>
    %7 = arith.cmpf oge, %5, %6 : vector<32x128xf32>
    %c0_6 = arith.constant 0 : index
    %c0_7 = arith.constant 0 : index
    %8 = vector.load %arg5[%c0_6, %c0_7] : memref<1x128xf32, #tpu.memory_space<vmem>>, vector<1x128xf32>
    %9 = vector.broadcast %8 : vector<1x128xf32> to vector<32x128xf32>
    %10 = arith.mulf %5, %9 : vector<32x128xf32>
    %11 = arith.select %7, %5, %10 : vector<32x128xi1>, vector<32x128xf32>
    %12 = arith.truncf %11 : vector<32x128xf32> to vector<32x128xbf16>
    %c0_8 = arith.constant 0 : index
    %c0_9 = arith.constant 0 : index
    %13 = vector.load %arg6[%c0_8, %c0_9] : memref<32x128xbf16, #tpu.memory_space<vmem>>, vector<32x128xbf16>
    tpu.vector_store %arg6[%c0_8, %c0_9], %12 {strides = array<i32>} : memref<32x128xbf16, #tpu.memory_space<vmem>>, vector<32x128xbf16>,
    return
  }
  func.func @transform_0(%arg0: i32, %arg1: i32) -> (i32, i32) {
    %c0_i32 = arith.constant 0 : i32
    %c0_i32_0 = arith.constant 0 : i32
    return %arg0, %c0_i32 : i32, i32
  }
  func.func @transform_1(%arg0: i32, %arg1: i32) -> (i32, i32) {
    %c0_i32 = arith.constant 0 : i32
    %c0_i32_0 = arith.constant 0 : i32
    return %c0_i32, %arg1 : i32, i32
  }
  func.func @transform_2(%arg0: i32, %arg1: i32) -> (i32, i32) {
    %c0_i32 = arith.constant 0 : i32
    %c0_i32_0 = arith.constant 0 : i32
    return %c0_i32, %arg1 : i32, i32
  }
  func.func @transform_3(%arg0: i32, %arg1: i32) -> (i32, i32) {
    %c0_i32 = arith.constant 0 : i32
    %c0_i32_0 = arith.constant 0 : i32
    return %c0_i32, %arg1 : i32, i32
  }
  func.func @transform_4(%arg0: i32, %arg1: i32) -> (i32, i32) {
    %c0_i32 = arith.constant 0 : i32
    return %arg0, %arg1 : i32, i32
  }
}

module attributes {stable_mosaic.version = 11 : i64} {
  func.func @_mm_kernel(%arg0: i32, %arg1: i32, %arg2: memref<16x256xbf16, #tpu.memory_space<vmem>>, %arg3: memref<256x128xbf16, #tpu.memory_space<vmem>>, %arg4: memref<1x128xf32, #tpu.memory_space<vmem>>, %arg5: memref<1x128xf32, #tpu.memory_space<vmem>>, %arg6: memref<16x128xbf16, #tpu.memory_space<vmem>>) attributes {dimension_semantics = [#tpu.dimension_semantics<parallel>, #tpu.dimension_semantics<parallel>], iteration_bounds = array<i64: 1, 1>, scalar_prefetch = 0 : i64, scratch_operands = 0 : i64, tpu.core_type = #tpu.core_type<tc>, window_params = [{transform_indices = @transform_0, window_bounds = array<i64: 16, 256>}, {transform_indices = @transform_1, window_bounds = array<i64: 256, 128>}, {transform_indices = @transform_2, window_bounds = array<i64: 1, 128>}, {transform_indices = @transform_3, window_bounds = array<i64: 1, 128>}, {transform_indices = @transform_4, window_bounds = array<i64: 16, 128>}]} {
    %c0 = arith.constant 0 : index
    %c0_0 = arith.constant 0 : index
    %0 = vector.load %arg2[%c0, %c0_0] : memref<16x256xbf16, #tpu.memory_space<vmem>>, vector<16x256xbf16>
    %c0_1 = arith.constant 0 : index
    %c0_2 = arith.constant 0 : index
    %1 = vector.load %arg3[%c0_1, %c0_2] : memref<256x128xbf16, #tpu.memory_space<vmem>>, vector<256x128xbf16>
    %cst = arith.constant dense<0.000000e+00> : vector<16x128xf32>
    %2 = tpu.matmul %0, %1, %cst {dimension_numbers = #tpu.dot_dimension_numbers<[1], [0], [0], [1], [0, 0, 1, 1], [], []>} : vector<16x256xbf16>, vector<256x128xbf16>, vector<16x128xf32> -> vector<16x128xf32>
    %c0_3 = arith.constant 0 : index
    %c0_4 = arith.constant 0 : index
    %3 = vector.load %arg4[%c0_3, %c0_4] : memref<1x128xf32, #tpu.memory_space<vmem>>, vector<1x128xf32>
    %4 = vector.broadcast %3 : vector<1x128xf32> to vector<16x128xf32>
    %5 = arith.addf %2, %4 : vector<16x128xf32>
    %cst_5 = arith.constant 0.000000e+00 : f32
    %6 = vector.broadcast %cst_5 : f32 to vector<16x128xf32>
    %7 = arith.cmpf oge, %5, %6 : vector<16x128xf32>
    %c0_6 = arith.constant 0 : index
    %c0_7 = arith.constant 0 : index
    %8 = vector.load %arg5[%c0_6, %c0_7] : memref<1x128xf32, #tpu.memory_space<vmem>>, vector<1x128xf32>
    %9 = vector.broadcast %8 : vector<1x128xf32> to vector<16x128xf32>
    %10 = arith.mulf %5, %9 : vector<16x128xf32>
    %11 = arith.select %7, %5, %10 : vector<16x128xi1>, vector<16x128xf32>
    %12 = arith.truncf %11 : vector<16x128xf32> to vector<16x128xbf16>
    %c0_8 = arith.constant 0 : index
    %c0_9 = arith.constant 0 : index
    %13 = vector.load %arg6[%c0_8, %c0_9] : memref<16x128xbf16, #tpu.memory_space<vmem>>, vector<16x128xbf16>
    tpu.vector_store %arg6[%c0_8, %c0_9], %12 {strides = array<i32>} : memref<16x128xbf16, #tpu.memory_space<vmem>>, vector<16x128xbf16>,
    return
  }
  func.func @transform_0(%arg0: i32, %arg1: i32) -> (i32, i32) {
    %c0_i32 = arith.constant 0 : i32
    %c0_i32_0 = arith.constant 0 : i32
    return %arg0, %c0_i32 : i32, i32
  }
  func.func @transform_1(%arg0: i32, %arg1: i32) -> (i32, i32) {
    %c0_i32 = arith.constant 0 : i32
    %c0_i32_0 = arith.constant 0 : i32
    return %c0_i32, %arg1 : i32, i32
  }
  func.func @transform_2(%arg0: i32, %arg1: i32) -> (i32, i32) {
    %c0_i32 = arith.constant 0 : i32
    %c0_i32_0 = arith.constant 0 : i32
    return %c0_i32, %arg1 : i32, i32
  }
  func.func @transform_3(%arg0: i32, %arg1: i32) -> (i32, i32) {
    %c0_i32 = arith.constant 0 : i32
    %c0_i32_0 = arith.constant 0 : i32
    return %c0_i32, %arg1 : i32, i32
  }
  func.func @transform_4(%arg0: i32, %arg1: i32) -> (i32, i32) {
    %c0_i32 = arith.constant 0 : i32
    return %arg0, %arg1 : i32, i32
  }
}

module attributes {stable_mosaic.version = 11 : i64} {
  func.func @_mm_kernel(%arg0: i32, %arg1: i32, %arg2: memref<16x1536xbf16, #tpu.memory_space<vmem>>, %arg3: memref<1536x128xbf16, #tpu.memory_space<vmem>>, %arg4: memref<1x128xf32, #tpu.memory_space<vmem>>, %arg5: memref<1x128xf32, #tpu.memory_space<vmem>>, %arg6: memref<16x128xbf16, #tpu.memory_space<vmem>>) attributes {dimension_semantics = [#tpu.dimension_semantics<parallel>, #tpu.dimension_semantics<parallel>], iteration_bounds = array<i64: 1, 1>, scalar_prefetch = 0 : i64, scratch_operands = 0 : i64, tpu.core_type = #tpu.core_type<tc>, window_params = [{transform_indices = @transform_0, window_bounds = array<i64: 16, 1536>}, {transform_indices = @transform_1, window_bounds = array<i64: 1536, 128>}, {transform_indices = @transform_2, window_bounds = array<i64: 1, 128>}, {transform_indices = @transform_3, window_bounds = array<i64: 1, 128>}, {transform_indices = @transform_4, window_bounds = array<i64: 16, 128>}]} {
    %c0 = arith.constant 0 : index
    %c0_0 = arith.constant 0 : index
    %0 = vector.load %arg2[%c0, %c0_0] : memref<16x1536xbf16, #tpu.memory_space<vmem>>, vector<16x1536xbf16>
    %c0_1 = arith.constant 0 : index
    %c0_2 = arith.constant 0 : index
    %1 = vector.load %arg3[%c0_1, %c0_2] : memref<1536x128xbf16, #tpu.memory_space<vmem>>, vector<1536x128xbf16>
    %cst = arith.constant dense<0.000000e+00> : vector<16x128xf32>
    %2 = tpu.matmul %0, %1, %cst {dimension_numbers = #tpu.dot_dimension_numbers<[1], [0], [0], [1], [0, 0, 1, 1], [], []>} : vector<16x1536xbf16>, vector<1536x128xbf16>, vector<16x128xf32> -> vector<16x128xf32>
    %c0_3 = arith.constant 0 : index
    %c0_4 = arith.constant 0 : index
    %3 = vector.load %arg4[%c0_3, %c0_4] : memref<1x128xf32, #tpu.memory_space<vmem>>, vector<1x128xf32>
    %4 = vector.broadcast %3 : vector<1x128xf32> to vector<16x128xf32>
    %5 = arith.addf %2, %4 : vector<16x128xf32>
    %cst_5 = arith.constant 0.000000e+00 : f32
    %6 = vector.broadcast %cst_5 : f32 to vector<16x128xf32>
    %7 = arith.cmpf oge, %5, %6 : vector<16x128xf32>
    %c0_6 = arith.constant 0 : index
    %c0_7 = arith.constant 0 : index
    %8 = vector.load %arg5[%c0_6, %c0_7] : memref<1x128xf32, #tpu.memory_space<vmem>>, vector<1x128xf32>
    %9 = vector.broadcast %8 : vector<1x128xf32> to vector<16x128xf32>
    %10 = arith.mulf %5, %9 : vector<16x128xf32>
    %11 = arith.select %7, %5, %10 : vector<16x128xi1>, vector<16x128xf32>
    %12 = arith.truncf %11 : vector<16x128xf32> to vector<16x128xbf16>
    %c0_8 = arith.constant 0 : index
    %c0_9 = arith.constant 0 : index
    %13 = vector.load %arg6[%c0_8, %c0_9] : memref<16x128xbf16, #tpu.memory_space<vmem>>, vector<16x128xbf16>
    tpu.vector_store %arg6[%c0_8, %c0_9], %12 {strides = array<i32>} : memref<16x128xbf16, #tpu.memory_space<vmem>>, vector<16x128xbf16>,
    return
  }
  func.func @transform_0(%arg0: i32, %arg1: i32) -> (i32, i32) {
    %c0_i32 = arith.constant 0 : i32
    %c0_i32_0 = arith.constant 0 : i32
    return %arg0, %c0_i32 : i32, i32
  }
  func.func @transform_1(%arg0: i32, %arg1: i32) -> (i32, i32) {
    %c0_i32 = arith.constant 0 : i32
    %c0_i32_0 = arith.constant 0 : i32
    return %c0_i32, %arg1 : i32, i32
  }
  func.func @transform_2(%arg0: i32, %arg1: i32) -> (i32, i32) {
    %c0_i32 = arith.constant 0 : i32
    %c0_i32_0 = arith.constant 0 : i32
    return %c0_i32, %arg1 : i32, i32
  }
  func.func @transform_3(%arg0: i32, %arg1: i32) -> (i32, i32) {
    %c0_i32 = arith.constant 0 : i32
    %c0_i32_0 = arith.constant 0 : i32
    return %c0_i32, %arg1 : i32, i32
  }
  func.func @transform_4(%arg0: i32, %arg1: i32) -> (i32, i32) {
    %c0_i32 = arith.constant 0 : i32
    return %arg0, %arg1 : i32, i32
  }
}

module attributes {stable_mosaic.version = 11 : i64} {
  func.func @_mm_kernel(%arg0: i32, %arg1: i32, %arg2: memref<16x128xbf16, #tpu.memory_space<vmem>>, %arg3: memref<128x128xbf16, #tpu.memory_space<vmem>>, %arg4: memref<1x128xf32, #tpu.memory_space<vmem>>, %arg5: memref<1x128xf32, #tpu.memory_space<vmem>>, %arg6: memref<16x128xbf16, #tpu.memory_space<vmem>>) attributes {dimension_semantics = [#tpu.dimension_semantics<parallel>, #tpu.dimension_semantics<parallel>], iteration_bounds = array<i64: 1, 1>, scalar_prefetch = 0 : i64, scratch_operands = 0 : i64, tpu.core_type = #tpu.core_type<tc>, window_params = [{transform_indices = @transform_0, window_bounds = array<i64: 16, 128>}, {transform_indices = @transform_1, window_bounds = array<i64: 128, 128>}, {transform_indices = @transform_2, window_bounds = array<i64: 1, 128>}, {transform_indices = @transform_3, window_bounds = array<i64: 1, 128>}, {transform_indices = @transform_4, window_bounds = array<i64: 16, 128>}]} {
    %c0 = arith.constant 0 : index
    %c0_0 = arith.constant 0 : index
    %0 = vector.load %arg2[%c0, %c0_0] : memref<16x128xbf16, #tpu.memory_space<vmem>>, vector<16x128xbf16>
    %c0_1 = arith.constant 0 : index
    %c0_2 = arith.constant 0 : index
    %1 = vector.load %arg3[%c0_1, %c0_2] : memref<128x128xbf16, #tpu.memory_space<vmem>>, vector<128x128xbf16>
    %cst = arith.constant dense<0.000000e+00> : vector<16x128xf32>
    %2 = tpu.matmul %0, %1, %cst {dimension_numbers = #tpu.dot_dimension_numbers<[1], [0], [0], [1], [0, 0, 1, 1], [], []>} : vector<16x128xbf16>, vector<128x128xbf16>, vector<16x128xf32> -> vector<16x128xf32>
    %c0_3 = arith.constant 0 : index
    %c0_4 = arith.constant 0 : index
    %3 = vector.load %arg4[%c0_3, %c0_4] : memref<1x128xf32, #tpu.memory_space<vmem>>, vector<1x128xf32>
    %4 = vector.broadcast %3 : vector<1x128xf32> to vector<16x128xf32>
    %5 = arith.addf %2, %4 : vector<16x128xf32>
    %cst_5 = arith.constant 0.000000e+00 : f32
    %6 = vector.broadcast %cst_5 : f32 to vector<16x128xf32>
    %7 = arith.cmpf oge, %5, %6 : vector<16x128xf32>
    %c0_6 = arith.constant 0 : index
    %c0_7 = arith.constant 0 : index
    %8 = vector.load %arg5[%c0_6, %c0_7] : memref<1x128xf32, #tpu.memory_space<vmem>>, vector<1x128xf32>
    %9 = vector.broadcast %8 : vector<1x128xf32> to vector<16x128xf32>
    %10 = arith.mulf %5, %9 : vector<16x128xf32>
    %11 = arith.select %7, %5, %10 : vector<16x128xi1>, vector<16x128xf32>
    %12 = arith.truncf %11 : vector<16x128xf32> to vector<16x128xbf16>
    %c0_8 = arith.constant 0 : index
    %c0_9 = arith.constant 0 : index
    %13 = vector.load %arg6[%c0_8, %c0_9] : memref<16x128xbf16, #tpu.memory_space<vmem>>, vector<16x128xbf16>
    tpu.vector_store %arg6[%c0_8, %c0_9], %12 {strides = array<i32>} : memref<16x128xbf16, #tpu.memory_space<vmem>>, vector<16x128xbf16>,
    return
  }
  func.func @transform_0(%arg0: i32, %arg1: i32) -> (i32, i32) {
    %c0_i32 = arith.constant 0 : i32
    %c0_i32_0 = arith.constant 0 : i32
    return %arg0, %c0_i32 : i32, i32
  }
  func.func @transform_1(%arg0: i32, %arg1: i32) -> (i32, i32) {
    %c0_i32 = arith.constant 0 : i32
    %c0_i32_0 = arith.constant 0 : i32
    return %c0_i32, %arg1 : i32, i32
  }
  func.func @transform_2(%arg0: i32, %arg1: i32) -> (i32, i32) {
    %c0_i32 = arith.constant 0 : i32
    %c0_i32_0 = arith.constant 0 : i32
    return %c0_i32, %arg1 : i32, i32
  }
  func.func @transform_3(%arg0: i32, %arg1: i32) -> (i32, i32) {
    %c0_i32 = arith.constant 0 : i32
    %c0_i32_0 = arith.constant 0 : i32
    return %c0_i32, %arg1 : i32, i32
  }
  func.func @transform_4(%arg0: i32, %arg1: i32) -> (i32, i32) {
    %c0_i32 = arith.constant 0 : i32
    return %arg0, %arg1 : i32, i32
  }
}

module attributes {stable_mosaic.version = 11 : i64} {
  func.func @_mm_kernel(%arg0: i32, %arg1: i32, %arg2: memref<16x256xbf16, #tpu.memory_space<vmem>>, %arg3: memref<256x256xbf16, #tpu.memory_space<vmem>>, %arg4: memref<1x256xf32, #tpu.memory_space<vmem>>, %arg5: memref<1x256xf32, #tpu.memory_space<vmem>>, %arg6: memref<16x256xbf16, #tpu.memory_space<vmem>>) attributes {dimension_semantics = [#tpu.dimension_semantics<parallel>, #tpu.dimension_semantics<parallel>], iteration_bounds = array<i64: 2, 1>, scalar_prefetch = 0 : i64, scratch_operands = 0 : i64, tpu.core_type = #tpu.core_type<tc>, window_params = [{transform_indices = @transform_0, window_bounds = array<i64: 16, 256>}, {transform_indices = @transform_1, window_bounds = array<i64: 256, 256>}, {transform_indices = @transform_2, window_bounds = array<i64: 1, 256>}, {transform_indices = @transform_3, window_bounds = array<i64: 1, 256>}, {transform_indices = @transform_4, window_bounds = array<i64: 16, 256>}]} {
    %c0 = arith.constant 0 : index
    %c0_0 = arith.constant 0 : index
    %0 = vector.load %arg2[%c0, %c0_0] : memref<16x256xbf16, #tpu.memory_space<vmem>>, vector<16x256xbf16>
    %c0_1 = arith.constant 0 : index
    %c0_2 = arith.constant 0 : index
    %1 = vector.load %arg3[%c0_1, %c0_2] : memref<256x256xbf16, #tpu.memory_space<vmem>>, vector<256x256xbf16>
    %cst = arith.constant dense<0.000000e+00> : vector<16x256xf32>
    %2 = tpu.matmul %0, %1, %cst {dimension_numbers = #tpu.dot_dimension_numbers<[1], [0], [0], [1], [0, 0, 1, 1], [], []>} : vector<16x256xbf16>, vector<256x256xbf16>, vector<16x256xf32> -> vector<16x256xf32>
    %c0_3 = arith.constant 0 : index
    %c0_4 = arith.constant 0 : index
    %3 = vector.load %arg4[%c0_3, %c0_4] : memref<1x256xf32, #tpu.memory_space<vmem>>, vector<1x256xf32>
    %4 = vector.broadcast %3 : vector<1x256xf32> to vector<16x256xf32>
    %5 = arith.addf %2, %4 : vector<16x256xf32>
    %cst_5 = arith.constant 0.000000e+00 : f32
    %6 = vector.broadcast %cst_5 : f32 to vector<16x256xf32>
    %7 = arith.cmpf oge, %5, %6 : vector<16x256xf32>
    %c0_6 = arith.constant 0 : index
    %c0_7 = arith.constant 0 : index
    %8 = vector.load %arg5[%c0_6, %c0_7] : memref<1x256xf32, #tpu.memory_space<vmem>>, vector<1x256xf32>
    %9 = vector.broadcast %8 : vector<1x256xf32> to vector<16x256xf32>
    %10 = arith.mulf %5, %9 : vector<16x256xf32>
    %11 = arith.select %7, %5, %10 : vector<16x256xi1>, vector<16x256xf32>
    %12 = arith.truncf %11 : vector<16x256xf32> to vector<16x256xbf16>
    %c0_8 = arith.constant 0 : index
    %c0_9 = arith.constant 0 : index
    %13 = vector.load %arg6[%c0_8, %c0_9] : memref<16x256xbf16, #tpu.memory_space<vmem>>, vector<16x256xbf16>
    tpu.vector_store %arg6[%c0_8, %c0_9], %12 {strides = array<i32>} : memref<16x256xbf16, #tpu.memory_space<vmem>>, vector<16x256xbf16>,
    return
  }
  func.func @transform_0(%arg0: i32, %arg1: i32) -> (i32, i32) {
    %c0_i32 = arith.constant 0 : i32
    %c0_i32_0 = arith.constant 0 : i32
    return %arg0, %c0_i32 : i32, i32
  }
  func.func @transform_1(%arg0: i32, %arg1: i32) -> (i32, i32) {
    %c0_i32 = arith.constant 0 : i32
    %c0_i32_0 = arith.constant 0 : i32
    return %c0_i32, %arg1 : i32, i32
  }
  func.func @transform_2(%arg0: i32, %arg1: i32) -> (i32, i32) {
    %c0_i32 = arith.constant 0 : i32
    %c0_i32_0 = arith.constant 0 : i32
    return %c0_i32, %arg1 : i32, i32
  }
  func.func @transform_3(%arg0: i32, %arg1: i32) -> (i32, i32) {
    %c0_i32 = arith.constant 0 : i32
    %c0_i32_0 = arith.constant 0 : i32
    return %c0_i32, %arg1 : i32, i32
  }
  func.func @transform_4(%arg0: i32, %arg1: i32) -> (i32, i32) {
    %c0_i32 = arith.constant 0 : i32
    return %arg0, %arg1 : i32, i32
  }
}

module attributes {stable_mosaic.version = 11 : i64} {
  func.func @_mm_kernel(%arg0: i32, %arg1: i32, %arg2: memref<16x128xbf16, #tpu.memory_space<vmem>>, %arg3: memref<128x128xbf16, #tpu.memory_space<vmem>>, %arg4: memref<1x128xf32, #tpu.memory_space<vmem>>, %arg5: memref<1x128xf32, #tpu.memory_space<vmem>>, %arg6: memref<16x128xbf16, #tpu.memory_space<vmem>>) attributes {dimension_semantics = [#tpu.dimension_semantics<parallel>, #tpu.dimension_semantics<parallel>], iteration_bounds = array<i64: 2, 1>, scalar_prefetch = 0 : i64, scratch_operands = 0 : i64, tpu.core_type = #tpu.core_type<tc>, window_params = [{transform_indices = @transform_0, window_bounds = array<i64: 16, 128>}, {transform_indices = @transform_1, window_bounds = array<i64: 128, 128>}, {transform_indices = @transform_2, window_bounds = array<i64: 1, 128>}, {transform_indices = @transform_3, window_bounds = array<i64: 1, 128>}, {transform_indices = @transform_4, window_bounds = array<i64: 16, 128>}]} {
    %c0 = arith.constant 0 : index
    %c0_0 = arith.constant 0 : index
    %0 = vector.load %arg2[%c0, %c0_0] : memref<16x128xbf16, #tpu.memory_space<vmem>>, vector<16x128xbf16>
    %c0_1 = arith.constant 0 : index
    %c0_2 = arith.constant 0 : index
    %1 = vector.load %arg3[%c0_1, %c0_2] : memref<128x128xbf16, #tpu.memory_space<vmem>>, vector<128x128xbf16>
    %cst = arith.constant dense<0.000000e+00> : vector<16x128xf32>
    %2 = tpu.matmul %0, %1, %cst {dimension_numbers = #tpu.dot_dimension_numbers<[1], [0], [0], [1], [0, 0, 1, 1], [], []>} : vector<16x128xbf16>, vector<128x128xbf16>, vector<16x128xf32> -> vector<16x128xf32>
    %c0_3 = arith.constant 0 : index
    %c0_4 = arith.constant 0 : index
    %3 = vector.load %arg4[%c0_3, %c0_4] : memref<1x128xf32, #tpu.memory_space<vmem>>, vector<1x128xf32>
    %4 = vector.broadcast %3 : vector<1x128xf32> to vector<16x128xf32>
    %5 = arith.addf %2, %4 : vector<16x128xf32>
    %cst_5 = arith.constant 0.000000e+00 : f32
    %6 = vector.broadcast %cst_5 : f32 to vector<16x128xf32>
    %7 = arith.cmpf oge, %5, %6 : vector<16x128xf32>
    %c0_6 = arith.constant 0 : index
    %c0_7 = arith.constant 0 : index
    %8 = vector.load %arg5[%c0_6, %c0_7] : memref<1x128xf32, #tpu.memory_space<vmem>>, vector<1x128xf32>
    %9 = vector.broadcast %8 : vector<1x128xf32> to vector<16x128xf32>
    %10 = arith.mulf %5, %9 : vector<16x128xf32>
    %11 = arith.select %7, %5, %10 : vector<16x128xi1>, vector<16x128xf32>
    %12 = arith.truncf %11 : vector<16x128xf32> to vector<16x128xbf16>
    %c0_8 = arith.constant 0 : index
    %c0_9 = arith.constant 0 : index
    %13 = vector.load %arg6[%c0_8, %c0_9] : memref<16x128xbf16, #tpu.memory_space<vmem>>, vector<16x128xbf16>
    tpu.vector_store %arg6[%c0_8, %c0_9], %12 {strides = array<i32>} : memref<16x128xbf16, #tpu.memory_space<vmem>>, vector<16x128xbf16>,
    return
  }
  func.func @transform_0(%arg0: i32, %arg1: i32) -> (i32, i32) {
    %c0_i32 = arith.constant 0 : i32
    %c0_i32_0 = arith.constant 0 : i32
    return %arg0, %c0_i32 : i32, i32
  }
  func.func @transform_1(%arg0: i32, %arg1: i32) -> (i32, i32) {
    %c0_i32 = arith.constant 0 : i32
    %c0_i32_0 = arith.constant 0 : i32
    return %c0_i32, %arg1 : i32, i32
  }
  func.func @transform_2(%arg0: i32, %arg1: i32) -> (i32, i32) {
    %c0_i32 = arith.constant 0 : i32
    %c0_i32_0 = arith.constant 0 : i32
    return %c0_i32, %arg1 : i32, i32
  }
  func.func @transform_3(%arg0: i32, %arg1: i32) -> (i32, i32) {
    %c0_i32 = arith.constant 0 : i32
    %c0_i32_0 = arith.constant 0 : i32
    return %c0_i32, %arg1 : i32, i32
  }
  func.func @transform_4(%arg0: i32, %arg1: i32) -> (i32, i32) {
    %c0_i32 = arith.constant 0 : i32
    return %arg0, %arg1 : i32, i32
  }
}

module attributes {stable_mosaic.version = 11 : i64} {
  func.func @_mm_kernel(%arg0: i32, %arg1: i32, %arg2: memref<64x256xbf16, #tpu.memory_space<vmem>>, %arg3: memref<256x128xbf16, #tpu.memory_space<vmem>>, %arg4: memref<1x128xf32, #tpu.memory_space<vmem>>, %arg5: memref<1x128xf32, #tpu.memory_space<vmem>>, %arg6: memref<64x128xbf16, #tpu.memory_space<vmem>>) attributes {dimension_semantics = [#tpu.dimension_semantics<parallel>, #tpu.dimension_semantics<parallel>], iteration_bounds = array<i64: 2, 1>, scalar_prefetch = 0 : i64, scratch_operands = 0 : i64, tpu.core_type = #tpu.core_type<tc>, window_params = [{transform_indices = @transform_0, window_bounds = array<i64: 64, 256>}, {transform_indices = @transform_1, window_bounds = array<i64: 256, 128>}, {transform_indices = @transform_2, window_bounds = array<i64: 1, 128>}, {transform_indices = @transform_3, window_bounds = array<i64: 1, 128>}, {transform_indices = @transform_4, window_bounds = array<i64: 64, 128>}]} {
    %c0 = arith.constant 0 : index
    %c0_0 = arith.constant 0 : index
    %0 = vector.load %arg2[%c0, %c0_0] : memref<64x256xbf16, #tpu.memory_space<vmem>>, vector<64x256xbf16>
    %c0_1 = arith.constant 0 : index
    %c0_2 = arith.constant 0 : index
    %1 = vector.load %arg3[%c0_1, %c0_2] : memref<256x128xbf16, #tpu.memory_space<vmem>>, vector<256x128xbf16>
    %cst = arith.constant dense<0.000000e+00> : vector<64x128xf32>
    %2 = tpu.matmul %0, %1, %cst {dimension_numbers = #tpu.dot_dimension_numbers<[1], [0], [0], [1], [0, 0, 1, 1], [], []>} : vector<64x256xbf16>, vector<256x128xbf16>, vector<64x128xf32> -> vector<64x128xf32>
    %c0_3 = arith.constant 0 : index
    %c0_4 = arith.constant 0 : index
    %3 = vector.load %arg4[%c0_3, %c0_4] : memref<1x128xf32, #tpu.memory_space<vmem>>, vector<1x128xf32>
    %4 = vector.broadcast %3 : vector<1x128xf32> to vector<64x128xf32>
    %5 = arith.addf %2, %4 : vector<64x128xf32>
    %cst_5 = arith.constant 0.000000e+00 : f32
    %6 = vector.broadcast %cst_5 : f32 to vector<64x128xf32>
    %7 = arith.cmpf oge, %5, %6 : vector<64x128xf32>
    %c0_6 = arith.constant 0 : index
    %c0_7 = arith.constant 0 : index
    %8 = vector.load %arg5[%c0_6, %c0_7] : memref<1x128xf32, #tpu.memory_space<vmem>>, vector<1x128xf32>
    %9 = vector.broadcast %8 : vector<1x128xf32> to vector<64x128xf32>
    %10 = arith.mulf %5, %9 : vector<64x128xf32>
    %11 = arith.select %7, %5, %10 : vector<64x128xi1>, vector<64x128xf32>
    %12 = arith.truncf %11 : vector<64x128xf32> to vector<64x128xbf16>
    %c0_8 = arith.constant 0 : index
    %c0_9 = arith.constant 0 : index
    %13 = vector.load %arg6[%c0_8, %c0_9] : memref<64x128xbf16, #tpu.memory_space<vmem>>, vector<64x128xbf16>
    tpu.vector_store %arg6[%c0_8, %c0_9], %12 {strides = array<i32>} : memref<64x128xbf16, #tpu.memory_space<vmem>>, vector<64x128xbf16>,
    return
  }
  func.func @transform_0(%arg0: i32, %arg1: i32) -> (i32, i32) {
    %c0_i32 = arith.constant 0 : i32
    %c0_i32_0 = arith.constant 0 : i32
    return %arg0, %c0_i32 : i32, i32
  }
  func.func @transform_1(%arg0: i32, %arg1: i32) -> (i32, i32) {
    %c0_i32 = arith.constant 0 : i32
    %c0_i32_0 = arith.constant 0 : i32
    return %c0_i32, %arg1 : i32, i32
  }
  func.func @transform_2(%arg0: i32, %arg1: i32) -> (i32, i32) {
    %c0_i32 = arith.constant 0 : i32
    %c0_i32_0 = arith.constant 0 : i32
    return %c0_i32, %arg1 : i32, i32
  }
  func.func @transform_3(%arg0: i32, %arg1: i32) -> (i32, i32) {
    %c0_i32 = arith.constant 0 : i32
    %c0_i32_0 = arith.constant 0 : i32
    return %c0_i32, %arg1 : i32, i32
  }
  func.func @transform_4(%arg0: i32, %arg1: i32) -> (i32, i32) {
    %c0_i32 = arith.constant 0 : i32
    return %arg0, %arg1 : i32, i32
  }
}

module attributes {stable_mosaic.version = 11 : i64} {
  func.func @_mm_kernel(%arg0: i32, %arg1: i32, %arg2: memref<256x128xbf16, #tpu.memory_space<vmem>>, %arg3: memref<128x128xbf16, #tpu.memory_space<vmem>>, %arg4: memref<1x128xf32, #tpu.memory_space<vmem>>, %arg5: memref<1x128xf32, #tpu.memory_space<vmem>>, %arg6: memref<256x128xbf16, #tpu.memory_space<vmem>>) attributes {dimension_semantics = [#tpu.dimension_semantics<parallel>, #tpu.dimension_semantics<parallel>], iteration_bounds = array<i64: 2, 1>, scalar_prefetch = 0 : i64, scratch_operands = 0 : i64, tpu.core_type = #tpu.core_type<tc>, window_params = [{transform_indices = @transform_0, window_bounds = array<i64: 256, 128>}, {transform_indices = @transform_1, window_bounds = array<i64: 128, 128>}, {transform_indices = @transform_2, window_bounds = array<i64: 1, 128>}, {transform_indices = @transform_3, window_bounds = array<i64: 1, 128>}, {transform_indices = @transform_4, window_bounds = array<i64: 256, 128>}]} {
    %c0 = arith.constant 0 : index
    %c0_0 = arith.constant 0 : index
    %0 = vector.load %arg2[%c0, %c0_0] : memref<256x128xbf16, #tpu.memory_space<vmem>>, vector<256x128xbf16>
    %c0_1 = arith.constant 0 : index
    %c0_2 = arith.constant 0 : index
    %1 = vector.load %arg3[%c0_1, %c0_2] : memref<128x128xbf16, #tpu.memory_space<vmem>>, vector<128x128xbf16>
    %cst = arith.constant dense<0.000000e+00> : vector<256x128xf32>
    %2 = tpu.matmul %0, %1, %cst {dimension_numbers = #tpu.dot_dimension_numbers<[1], [0], [0], [1], [0, 0, 1, 1], [], []>} : vector<256x128xbf16>, vector<128x128xbf16>, vector<256x128xf32> -> vector<256x128xf32>
    %c0_3 = arith.constant 0 : index
    %c0_4 = arith.constant 0 : index
    %3 = vector.load %arg4[%c0_3, %c0_4] : memref<1x128xf32, #tpu.memory_space<vmem>>, vector<1x128xf32>
    %4 = vector.broadcast %3 : vector<1x128xf32> to vector<256x128xf32>
    %5 = arith.addf %2, %4 : vector<256x128xf32>
    %cst_5 = arith.constant 0.000000e+00 : f32
    %6 = vector.broadcast %cst_5 : f32 to vector<256x128xf32>
    %7 = arith.cmpf oge, %5, %6 : vector<256x128xf32>
    %c0_6 = arith.constant 0 : index
    %c0_7 = arith.constant 0 : index
    %8 = vector.load %arg5[%c0_6, %c0_7] : memref<1x128xf32, #tpu.memory_space<vmem>>, vector<1x128xf32>
    %9 = vector.broadcast %8 : vector<1x128xf32> to vector<256x128xf32>
    %10 = arith.mulf %5, %9 : vector<256x128xf32>
    %11 = arith.select %7, %5, %10 : vector<256x128xi1>, vector<256x128xf32>
    %12 = arith.truncf %11 : vector<256x128xf32> to vector<256x128xbf16>
    %c0_8 = arith.constant 0 : index
    %c0_9 = arith.constant 0 : index
    %13 = vector.load %arg6[%c0_8, %c0_9] : memref<256x128xbf16, #tpu.memory_space<vmem>>, vector<256x128xbf16>
    tpu.vector_store %arg6[%c0_8, %c0_9], %12 {strides = array<i32>} : memref<256x128xbf16, #tpu.memory_space<vmem>>, vector<256x128xbf16>,
    return
  }
  func.func @transform_0(%arg0: i32, %arg1: i32) -> (i32, i32) {
    %c0_i32 = arith.constant 0 : i32
    %c0_i32_0 = arith.constant 0 : i32
    return %arg0, %c0_i32 : i32, i32
  }
  func.func @transform_1(%arg0: i32, %arg1: i32) -> (i32, i32) {
    %c0_i32 = arith.constant 0 : i32
    %c0_i32_0 = arith.constant 0 : i32
    return %c0_i32, %arg1 : i32, i32
  }
  func.func @transform_2(%arg0: i32, %arg1: i32) -> (i32, i32) {
    %c0_i32 = arith.constant 0 : i32
    %c0_i32_0 = arith.constant 0 : i32
    return %c0_i32, %arg1 : i32, i32
  }
  func.func @transform_3(%arg0: i32, %arg1: i32) -> (i32, i32) {
    %c0_i32 = arith.constant 0 : i32
    %c0_i32_0 = arith.constant 0 : i32
    return %c0_i32, %arg1 : i32, i32
  }
  func.func @transform_4(%arg0: i32, %arg1: i32) -> (i32, i32) {
    %c0_i32 = arith.constant 0 : i32
    return %arg0, %arg1 : i32, i32
  }
}

</mosaic_0001>

<bundles_post_ra>
// kernel: _lambda_.17
= control target key start
LH: loop header
LB: loop body
LE: loop exit
PB: predicated region body
PF: predicated region fallthrough
CT: control target
= control target key end

     0   :  { %s885_s15 = smov 0   ;;  %s887_s16 = smov 0   ;;  %s1004_s0 = inlined_call_operand.vmem [shape: bf16[256,128], index: 0, kind: input, shape index: {}]   ;;  %s1005_s1 = inlined_call_operand.vmem [shape: bf16[128,128], index: 1, kind: input, shape index: {}]   ;;  %s1006_s2 = inlined_call_operand.vmem [shape: f32[1,128], index: 2, kind: input, shape index: {}]   ;;  %s1007_s3 = inlined_call_operand.vmem [shape: f32[1,128], index: 3, kind: input, shape index: {}]   ;;  %s1008_s4 = inlined_call_operand.vmem [shape: bf16[256,128], index: 4, kind: output, shape index: {}]  }
   0x1   :  { %s889_s17 = smov 0  }
   0x2 LB: > { %s26_s18 = sadd.s32 1, %s854_s16  ;;  %p652_p0 = scmp.ge.s32.totalorder %s858_s17, 1  ;;  %s858_s17 = sphi %s889_s17, %s14_s17   ;;  %s854_s16 = sphi %s887_s16, %s1010_s16   ;;  %s850_s15 = sphi %s885_s15, %s1009_s15  }
   0x3   : > { %p28_p1 = scmp.ge.s32.totalorder %s26_s18, 2  ;;  %p202_p2 = scmp.lt.s32.totalorder %s858_s17, 3 }
   0x5   : > { %s1012_s18 = smov (%p28_p1, %s26_s18), 0  ;;  %p203_p3 = pnand %p652_p0, %p202_p2 }
   0x6   : > { %s653_s27 = sshll.u32 (!%p203_p3), %s850_s15, 4 }
   0x7   : > { %206 = sbr.rel (%p203_p3) target bundleno = 210 (0xd2), region = 36  ;;  %p242_p4 = scmp.lt.s32.totalorder (!%p203_p3), %s653_s27, 31 }
   0xc   : > { %v738_v0 = vld [vmem:[%s1005_s1 + $0x38] sm:$0xff]  ;;  %v737_v1 = vld [vmem:[%s1005_s1 + $0x30] sm:$0xff]  ;;  %v736_v2 = vld [vmem:[%s1005_s1 + $0x28] sm:$0xff]  ;;  %s1014_s27 = smov (!%p242_p4, %s653_s27), 31 }
   0xd   : > { %398 = vmatpush.bf16.msra.mxu0 %v738_v0  ;;  %786 = vmatpush.bf16.msra.mxu1 %v738_v0  ;;  %v735_v3 = vld [vmem:[%s1005_s1 + $0x20] sm:$0xff]  ;;  %v734_v4 = vld [vmem:[%s1005_s1 + $0x18] sm:$0xff]  ;;  %v733_v5 = vld [vmem:[%s1005_s1 + $0x10] sm:$0xff]  ;;  %s654_s8 = sshll.u32 %s1014_s27, 2 }
   0xe   : > { %787 = vmatpush.bf16.msra.mxu2 %v738_v0  ;;  %788 = vmatpush.bf16.msra.mxu3 %v738_v0  ;;  %v732_v6 = vld [vmem:[%s1005_s1 + $0x8] sm:$0xff]  ;;  %v731_v7 = vld [vmem:[%s1005_s1] sm:$0xff]  ;;  %s245_s13 = scalar_lea.vmem %s1004_s0, %s654_s8  ;;  %s963_s23 = scalar_lea.vmem %s1008_s4, %s654_s8 }
   0xf   : > { %v723_v8 = vld [vmem:[%s245_s13] sm:$0xff]  ;;  %v725_v9 = vld [vmem:[%s245_s13 + $0x10] sm:$0xff]  ;;  %v724_v12 = vld [vmem:[%s245_s13 + $0x8] sm:$0xff] }
  0x10   : > { %v727_v10 = vld [vmem:[%s245_s13 + $0x20] sm:$0xff]  ;;  %v729_v11 = vld [vmem:[%s245_s13 + $0x30] sm:$0xff]  ;;  %v726_v13 = vld [vmem:[%s245_s13 + $0x18] sm:$0xff] }
  0x11   : > { %399 = vmatpush.bf16.msra.mxu0 %v737_v1  ;;  %789 = vmatpush.bf16.msra.mxu1 %v737_v1  ;;  %v728_v14 = vld [vmem:[%s245_s13 + $0x28] sm:$0xff]  ;;  %v730_v15 = vld [vmem:[%s245_s13 + $0x38] sm:$0xff]  ;;  %v941_v18 = vld [vmem:[%s1006_s2] ss:$0 sm:$0xff] }
  0x12   : > { %790 = vmatpush.bf16.msra.mxu2 %v737_v1  ;;  %791 = vmatpush.bf16.msra.mxu3 %v737_v1  ;;  %v947_v20 = vld [vmem:[%s1007_s3] ss:$0 sm:$0xff] }
  0x15   : > { %400 = vmatpush.bf16.msra.mxu0 %v736_v2  ;;  %792 = vmatpush.bf16.msra.mxu1 %v736_v2 }
  0x16   : > { %793 = vmatpush.bf16.msra.mxu2 %v736_v2  ;;  %794 = vmatpush.bf16.msra.mxu3 %v736_v2 }
  0x19   : > { %401 = vmatpush.bf16.msra.mxu0 %v735_v3  ;;  %795 = vmatpush.bf16.msra.mxu1 %v735_v3 }
  0x1a   : > { %796 = vmatpush.bf16.msra.mxu2 %v735_v3  ;;  %797 = vmatpush.bf16.msra.mxu3 %v735_v3 }
  0x1d   : > { %402 = vmatpush.bf16.msra.mxu0 %v734_v4  ;;  %798 = vmatpush.bf16.msra.mxu1 %v734_v4 }
  0x1e   : > { %799 = vmatpush.bf16.msra.mxu2 %v734_v4  ;;  %800 = vmatpush.bf16.msra.mxu3 %v734_v4 }
  0x21   : > { %403 = vmatpush.bf16.msra.mxu0 %v733_v5  ;;  %801 = vmatpush.bf16.msra.mxu1 %v733_v5 }
  0x22   : > { %802 = vmatpush.bf16.msra.mxu2 %v733_v5  ;;  %803 = vmatpush.bf16.msra.mxu3 %v733_v5 }
  0x25   : > { %404 = vmatpush.bf16.msra.mxu0 %v732_v6  ;;  %804 = vmatpush.bf16.msra.mxu1 %v732_v6 }
  0x26   : > { %805 = vmatpush.bf16.msra.mxu2 %v732_v6  ;;  %806 = vmatpush.bf16.msra.mxu3 %v732_v6 }
  0x29   : > { %405 = vmatpush.bf16.msra.mxu0 %v731_v7  ;;  %807 = vmatpush.bf16.msra.mxu1 %v731_v7 }
  0x2a   : > { %808 = vmatpush.bf16.msra.mxu2 %v731_v7  ;;  %809 = vmatpush.bf16.msra.mxu3 %v731_v7 }
  0x2c   : > { %406 = vmatmul.bf16.vlgmr.msra.gmra.mxu0 %v723_v8  ;;  %416 = vmatmul.bf16.vlgmr.msra.gmra.mxu1 %v725_v9 }
  0x2d   : > { %426 = vmatmul.bf16.vlgmr.msra.gmra.mxu2 %v727_v10  ;;  %436 = vmatmul.bf16.vlgmr.msra.gmra.mxu3 %v729_v11 }
  0x3c   : > { %411 = vmatmul.bf16.gmra.mxu0 %v724_v12  ;;  %421 = vmatmul.bf16.gmra.mxu1 %v726_v13 }
  0x3d   : > { %431 = vmatmul.bf16.gmra.mxu2 %v728_v14  ;;  %441 = vmatmul.bf16.gmra.mxu3 %v730_v15 }
  0xa9   : > { %v407_v16 = vpop.f32.mrf.mxu0  ;;  %v417_v17 = vpop.f32.mrf.mxu1 }
  0xaa   : > { %v408_v19 = vadd.f32 %v941_v18, %v407_v16  ;;  %v418_v21 = vadd.f32 %v941_v18, %v417_v17 }
  0xac   : > { %v467_v26 = vmul.f32 %v947_v20, %v408_v19  ;;  %v471_v27 = vmul.f32 %v947_v20, %v418_v21  ;;  %vm447_vm0 = vcmp.ge.f32.partialorder %v408_v19, 0.0  ;;  %vm451_vm1 = vcmp.ge.f32.partialorder %v418_v21, 0.0 }
  0xae   : > { %v483_v34 = vsel %vm447_vm0, %v408_v19, %v467_v26  ;;  %v487_v35 = vsel %vm451_vm1, %v418_v21, %v471_v27 }
  0xb0   : > { %v427_v22 = vpop.f32.mrf.mxu2  ;;  %v437_v23 = vpop.f32.mrf.mxu3 }
  0xb1   : > { %v409_v24 = vpop.f32.mrf.mxu0  ;;  %v419_v25 = vpop.f32.mrf.mxu1  ;;  %v428_v32 = vadd.f32 %v941_v18, %v427_v22  ;;  %v438_v33 = vadd.f32 %v941_v18, %v437_v23 }
  0xb2   : > { %v410_v28 = vadd.f32 %v941_v18, %v409_v24  ;;  %v420_v29 = vadd.f32 %v941_v18, %v419_v25 }
  0xb3   : > { %v475_v42 = vmul.f32 %v947_v20, %v428_v32  ;;  %v479_v43 = vmul.f32 %v947_v20, %v438_v33  ;;  %vm455_vm4 = vcmp.ge.f32.partialorder %v428_v32, 0.0  ;;  %vm459_vm5 = vcmp.ge.f32.partialorder %v438_v33, 0.0 }
  0xb4   : > { %vm448_vm2 = vcmp.ge.f32.partialorder %v410_v28, 0.0  ;;  %v468_v30 = vmul.f32 %v947_v20, %v410_v28  ;;  %vm452_vm3 = vcmp.ge.f32.partialorder %v420_v29, 0.0  ;;  %v472_v31 = vmul.f32 %v947_v20, %v420_v29 }
  0xb5   : > { %v491_v50 = vsel %vm455_vm4, %v428_v32, %v475_v42  ;;  %v495_v51 = vsel %vm459_vm5, %v438_v33, %v479_v43 }
  0xb6   : > { %v484_v36 = vsel %vm448_vm2, %v410_v28, %v468_v30  ;;  %v488_v37 = vsel %vm452_vm3, %v420_v29, %v472_v31 }
  0xb7   : > { %v742_v38 = vpack.c.bf16 %v484_v36, %v483_v34  ;;  %v752_v39 = vpack.c.bf16 %v488_v37, %v487_v35 }
  0xb8   : > { %v429_v40 = vpop.f32.mrf.mxu2  ;;  %v439_v41 = vpop.f32.mrf.mxu3 }
  0xb9   : > { %743 = vst [vmem:[%s963_s23] sm:$0xff] %v742_v38   ;;  %v430_v44 = vadd.f32 %v941_v18, %v429_v40  ;;  %v440_v45 = vadd.f32 %v941_v18, %v439_v41  ;;  %v412_v46 = vpop.f32.mrf.mxu0  ;;  %v422_v47 = vpop.f32.mrf.mxu1 }
  0xba   : > { %780 = vst [vmem:[%s963_s23 + $0x10] sm:$0xff] %v752_v39   ;;  %v413_v56 = vadd.f32 %v941_v18, %v412_v46  ;;  %v423_v57 = vadd.f32 %v941_v18, %v422_v47 }
  0xbb   : > { %vm456_vm6 = vcmp.ge.f32.partialorder %v430_v44, 0.0  ;;  %v476_v48 = vmul.f32 %v947_v20, %v430_v44  ;;  %vm460_vm7 = vcmp.ge.f32.partialorder %v440_v45, 0.0  ;;  %v480_v49 = vmul.f32 %v947_v20, %v440_v45 }
  0xbc   : > { %v469_v62 = vmul.f32 %v947_v20, %v413_v56  ;;  %v473_v63 = vmul.f32 %v947_v20, %v423_v57  ;;  %vm449_vm8 = vcmp.ge.f32.partialorder %v413_v56, 0.0  ;;  %vm453_vm9 = vcmp.ge.f32.partialorder %v423_v57, 0.0 }
  0xbd   : > { %v492_v52 = vsel %vm456_vm6, %v430_v44, %v476_v48  ;;  %v496_v53 = vsel %vm460_vm7, %v440_v45, %v480_v49 }
  0xbe   : > { %v762_v54 = vpack.c.bf16 %v492_v52, %v491_v50  ;;  %v772_v55 = vpack.c.bf16 %v496_v53, %v495_v51  ;;  %v485_v6 = vsel %vm449_vm8, %v413_v56, %v469_v62  ;;  %v489_v7 = vsel %vm453_vm9, %v423_v57, %v473_v63 }
  0xc0   : > { %782 = vst [vmem:[%s963_s23 + $0x20] sm:$0xff] %v762_v54   ;;  %v432_v58 = vpop.f32.mrf.mxu2  ;;  %v442_v59 = vpop.f32.mrf.mxu3 }
  0xc1   : > { %784 = vst [vmem:[%s963_s23 + $0x30] sm:$0xff] %v772_v55   ;;  %v414_v60 = vpop.f32.mrf.mxu0  ;;  %v424_v61 = vpop.f32.mrf.mxu1  ;;  %v433_v4 = vadd.f32 %v941_v18, %v432_v58  ;;  %v443_v5 = vadd.f32 %v941_v18, %v442_v59 }
  0xc2   : > { %v415_v0 = vadd.f32 %v941_v18, %v414_v60  ;;  %v425_v1 = vadd.f32 %v941_v18, %v424_v61 }
  0xc3   : > { %v477_v14 = vmul.f32 %v947_v20, %v433_v4  ;;  %v481_v15 = vmul.f32 %v947_v20, %v443_v5  ;;  %vm457_vm12 = vcmp.ge.f32.partialorder %v433_v4, 0.0  ;;  %vm461_vm13 = vcmp.ge.f32.partialorder %v443_v5, 0.0 }
  0xc4   : > { %vm450_vm10 = vcmp.ge.f32.partialorder %v415_v0, 0.0  ;;  %v470_v2 = vmul.f32 %v947_v20, %v415_v0  ;;  %vm454_vm11 = vcmp.ge.f32.partialorder %v425_v1, 0.0  ;;  %v474_v3 = vmul.f32 %v947_v20, %v425_v1 }
  0xc5   : > { %v493_v22 = vsel %vm457_vm12, %v433_v4, %v477_v14  ;;  %v497_v23 = vsel %vm461_vm13, %v443_v5, %v481_v15 }
  0xc6   : > { %v486_v8 = vsel %vm450_vm10, %v415_v0, %v470_v2  ;;  %v490_v9 = vsel %vm454_vm11, %v425_v1, %v474_v3 }
  0xc7   : > { %v747_v10 = vpack.c.bf16 %v486_v8, %v485_v6  ;;  %v757_v11 = vpack.c.bf16 %v490_v9, %v489_v7 }
  0xc8   : > { %v434_v12 = vpop.f32.mrf.mxu2  ;;  %v444_v13 = vpop.f32.mrf.mxu3 }
  0xc9   : > { %779 = vst [vmem:[%s963_s23 + $0x8] sm:$0xff] %v747_v10   ;;  %v435_v16 = vadd.f32 %v941_v18, %v434_v12  ;;  %v445_v17 = vadd.f32 %v941_v18, %v444_v13 }
  0xca   : > { %781 = vst [vmem:[%s963_s23 + $0x18] sm:$0xff] %v757_v11  }
  0xcb   : > { %vm458_vm14 = vcmp.ge.f32.partialorder %v435_v16, 0.0  ;;  %v478_v19 = vmul.f32 %v947_v20, %v435_v16  ;;  %vm462_vm15 = vcmp.ge.f32.partialorder %v445_v17, 0.0  ;;  %v482_v21 = vmul.f32 %v947_v20, %v445_v17 }
  0xcd   : > { %v494_v24 = vsel %vm458_vm14, %v435_v16, %v478_v19  ;;  %v498_v25 = vsel %vm462_vm15, %v445_v17, %v482_v21 }
  0xce   : > { %v767_v26 = vpack.c.bf16 %v494_v24, %v493_v22  ;;  %v777_v27 = vpack.c.bf16 %v498_v25, %v497_v23 }
  0xd0   : > { %783 = vst [vmem:[%s963_s23 + $0x28] sm:$0xff] %v767_v26  }
  0xd1   : > { %785 = vst [vmem:[%s963_s23 + $0x38] sm:$0xff] %v777_v27  }
  0xd2 PF: > { %s14_s17 = sadd.s32 1, %s858_s17   ;;  %s1009_s15 = smov %s854_s16 }
  0xd3   : > { %p11_p5 = scmp.ge.s32.totalorder %s14_s17, 4   ;;  %s1010_s16 = smov %s1012_s18 }
  0xd5   :  { %13 = sbr.rel (!%p11_p5) target bundleno = 2 (0x2), region = 75 }

// kernel: _lambda_.18
= control target key start
LH: loop header
LB: loop body
LE: loop exit
PB: predicated region body
PF: predicated region fallthrough
CT: control target
= control target key end

     0   :  { %s819_s15 = smov 0   ;;  %s821_s16 = smov 0   ;;  %s913_s0 = inlined_call_operand.vmem [shape: bf16[64,256], index: 0, kind: input, shape index: {}]   ;;  %s914_s1 = inlined_call_operand.vmem [shape: bf16[256,128], index: 1, kind: input, shape index: {}]   ;;  %s915_s2 = inlined_call_operand.vmem [shape: f32[1,128], index: 2, kind: input, shape index: {}]   ;;  %s916_s3 = inlined_call_operand.vmem [shape: f32[1,128], index: 3, kind: input, shape index: {}]   ;;  %s917_s4 = inlined_call_operand.vmem [shape: bf16[64,128], index: 4, kind: output, shape index: {}]  }
   0x1   :  { %s823_s17 = smov 0  }
   0x2 LB: > { %s26_s18 = sadd.s32 1, %s788_s16  ;;  %p608_p0 = scmp.ge.s32.totalorder %s792_s17, 1  ;;  %s792_s17 = sphi %s823_s17, %s14_s17   ;;  %s788_s16 = sphi %s821_s16, %s919_s16   ;;  %s784_s15 = sphi %s819_s15, %s918_s15  }
   0x3   : > { %p28_p1 = scmp.ge.s32.totalorder %s26_s18, 2  ;;  %p203_p2 = scmp.lt.s32.totalorder %s792_s17, 3 }
   0x5   : > { %s921_s18 = smov (%p28_p1, %s26_s18), 0  ;;  %p204_p3 = pnand %p608_p0, %p203_p2 }
   0x6   : > { %s609_s5 = sshll.u32 (!%p204_p3), %s784_s15, 2 }
   0x7   : > { %207 = sbr.rel (%p204_p3) target bundleno = 194 (0xc2), region = 36  ;;  %p244_p4 = scmp.lt.s32.totalorder (!%p204_p3), %s609_s5, 7 }
   0xc   : > { %v708_v0 = vld [vmem:[%s914_s1 + $0x38] sm:$0xff]  ;;  %v707_v2 = vld [vmem:[%s914_s1 + $0x30] sm:$0xff]  ;;  %v706_v4 = vld [vmem:[%s914_s1 + $0x28] sm:$0xff]  ;;  %s923_s5 = smov (!%p244_p4, %s609_s5), 7 }
   0xd   : > { %v716_v1 = vld [vmem:[%s914_s1 + $0x78] sm:$0xff]  ;;  %425 = vmatpush.bf16.msra.mxu0 %v708_v0  ;;  %728 = vmatpush.bf16.msra.mxu2 %v708_v0  ;;  %v715_v3 = vld [vmem:[%s914_s1 + $0x70] sm:$0xff]  ;;  %v714_v5 = vld [vmem:[%s914_s1 + $0x68] sm:$0xff]  ;;  %s696_s21 = sshll.u32 %s923_s5, 3  ;;  %s613_s12 = sshll.u32 %s923_s5, 2 }
   0xe   : > { %444 = vmatpush.bf16.msra.mxu1 %v716_v1  ;;  %736 = vmatpush.bf16.msra.mxu3 %v716_v1  ;;  %v705_v6 = vld [vmem:[%s914_s1 + $0x20] sm:$0xff]  ;;  %v704_v8 = vld [vmem:[%s914_s1 + $0x18] sm:$0xff]  ;;  %v703_v10 = vld [vmem:[%s914_s1 + $0x10] sm:$0xff]  ;;  %s248_s26 = scalar_lea.vmem %s913_s0, %s696_s21  ;;  %s267_s15 = scalar_lea.vmem %s917_s4, %s613_s12 }
   0xf   : > { %v713_v7 = vld [vmem:[%s914_s1 + $0x60] sm:$0xff]  ;;  %v712_v9 = vld [vmem:[%s914_s1 + $0x58] sm:$0xff]  ;;  %v711_v11 = vld [vmem:[%s914_s1 + $0x50] sm:$0xff] }
  0x10   : > { %v702_v12 = vld [vmem:[%s914_s1 + $0x8] sm:$0xff]  ;;  %v701_v14 = vld [vmem:[%s914_s1] sm:$0xff]  ;;  %v624_v18 = vld [vmem:[%s248_s26 + $0x10] sm:$0xf] }
  0x11   : > { %426 = vmatpush.bf16.msra.mxu0 %v707_v2  ;;  %729 = vmatpush.bf16.msra.mxu2 %v707_v2  ;;  %v710_v13 = vld [vmem:[%s914_s1 + $0x48] sm:$0xff]  ;;  %v709_v15 = vld [vmem:[%s914_s1 + $0x40] sm:$0xff]  ;;  %v700_v19 = vld [vmem:[%s248_s26 + $0x14] sm:$0xf0] }
  0x12   : > { %445 = vmatpush.bf16.msra.mxu1 %v715_v3  ;;  %737 = vmatpush.bf16.msra.mxu3 %v715_v3  ;;  %v616_v16 = vld [vmem:[%s248_s26] sm:$0xf]  ;;  %v698_v17 = vld [vmem:[%s248_s26 + $0x4] sm:$0xf0]  ;;  %v697_v20 = vld [vmem:[%s248_s26 + $0x4] sm:$0xf]  ;;  %v625_v25 = vor.u32 %v700_v19, %v624_v18 }
  0x13   : > { %v618_v21 = vld [vmem:[%s248_s26 + $0x8] sm:$0xf0]  ;;  %v699_v22 = vld [vmem:[%s248_s26 + $0x14] sm:$0xf]  ;;  %v626_v23 = vld [vmem:[%s248_s26 + $0x18] sm:$0xf0]  ;;  %v617_v24 = vor.u32 %v698_v17, %v616_v16 }
  0x14   : > { %v621_v26 = vor.u32 %v697_v20, %v618_v21  ;;  %v629_v27 = vor.u32 %v699_v22, %v626_v23  ;;  %v768_v28 = vld [vmem:[%s915_s2] ss:$0 sm:$0xff] }
  0x15   : > { %427 = vmatpush.bf16.msra.mxu0 %v706_v4  ;;  %730 = vmatpush.bf16.msra.mxu2 %v706_v4  ;;  %v769_v34 = vld [vmem:[%s916_s3] ss:$0 sm:$0xff] }
  0x16   : > { %446 = vmatpush.bf16.msra.mxu1 %v714_v5  ;;  %738 = vmatpush.bf16.msra.mxu3 %v714_v5 }
  0x19   : > { %428 = vmatpush.bf16.msra.mxu0 %v705_v6  ;;  %731 = vmatpush.bf16.msra.mxu2 %v705_v6 }
  0x1a   : > { %447 = vmatpush.bf16.msra.mxu1 %v713_v7  ;;  %739 = vmatpush.bf16.msra.mxu3 %v713_v7 }
  0x1d   : > { %429 = vmatpush.bf16.msra.mxu0 %v704_v8  ;;  %732 = vmatpush.bf16.msra.mxu2 %v704_v8 }
  0x1e   : > { %448 = vmatpush.bf16.msra.mxu1 %v712_v9  ;;  %740 = vmatpush.bf16.msra.mxu3 %v712_v9 }
  0x21   : > { %430 = vmatpush.bf16.msra.mxu0 %v703_v10  ;;  %733 = vmatpush.bf16.msra.mxu2 %v703_v10 }
  0x22   : > { %449 = vmatpush.bf16.msra.mxu1 %v711_v11  ;;  %741 = vmatpush.bf16.msra.mxu3 %v711_v11 }
  0x25   : > { %431 = vmatpush.bf16.msra.mxu0 %v702_v12  ;;  %734 = vmatpush.bf16.msra.mxu2 %v702_v12 }
  0x26   : > { %450 = vmatpush.bf16.msra.mxu1 %v710_v13  ;;  %742 = vmatpush.bf16.msra.mxu3 %v710_v13 }
  0x29   : > { %432 = vmatpush.bf16.msra.mxu0 %v701_v14  ;;  %735 = vmatpush.bf16.msra.mxu2 %v701_v14 }
  0x2a   : > { %451 = vmatpush.bf16.msra.mxu1 %v709_v15  ;;  %743 = vmatpush.bf16.msra.mxu3 %v709_v15 }
  0x2c   : > { %433 = vmatmul.bf16.vlgmr.msra.gmra.mxu0 %v617_v24  ;;  %438 = vmatmul.bf16.vlgmr.msra.gmra.mxu2 %v625_v25 }
  0x2d   : > { %452 = vmatmul.bf16.vlgmr.msra.gmra.mxu1 %v621_v26  ;;  %457 = vmatmul.bf16.vlgmr.msra.gmra.mxu3 %v629_v27 }
  0xa9   : > { %v434_v29 = vpop.f32.mrf.mxu0 }
  0xaa   : > { %v453_v30 = vpop.f32.mrf.mxu1  ;;  %v435_v31 = vadd.f32 %v768_v28, %v434_v29 }
  0xac   : > { %v454_v33 = vadd.f32 %v453_v30, %v435_v31 }
  0xae   : > { %v471_v40 = vmul.f32 %v769_v34, %v454_v33  ;;  %vm463_vm0 = vcmp.ge.f32.partialorder %v454_v33, 0.0 }
  0xaf   : > { %v439_v32 = vpop.f32.mrf.mxu2 }
  0xb0   : > { %v458_v35 = vpop.f32.mrf.mxu3  ;;  %v440_v37 = vadd.f32 %v768_v28, %v439_v32  ;;  %v475_v45 = vsel %vm463_vm0, %v454_v33, %v471_v40 }
  0xb1   : > { %v436_v36 = vpop.f32.mrf.mxu0 }
  0xb2   : > { %v437_v38 = vadd.f32 %v768_v28, %v436_v36  ;;  %v455_v39 = vpop.f32.mrf.mxu1  ;;  %v459_v42 = vadd.f32 %v458_v35, %v440_v37 }
  0xb4   : > { %v456_v41 = vadd.f32 %v455_v39, %v437_v38  ;;  %v473_v50 = vmul.f32 %v769_v34, %v459_v42  ;;  %vm465_vm2 = vcmp.ge.f32.partialorder %v459_v42, 0.0 }
  0xb6   : > { %vm464_vm1 = vcmp.ge.f32.partialorder %v456_v41, 0.0  ;;  %v472_v43 = vmul.f32 %v769_v34, %v456_v41  ;;  %v477_v53 = vsel %vm465_vm2, %v459_v42, %v473_v50 }
  0xb7   : > { %v441_v44 = vpop.f32.mrf.mxu2 }
  0xb8   : > { %v476_v46 = vsel %vm464_vm1, %v456_v41, %v472_v43  ;;  %v442_v47 = vadd.f32 %v768_v28, %v441_v44  ;;  %v460_v49 = vpop.f32.mrf.mxu3 }
  0xb9   : > { %v720_v48 = vpack.c.bf16 %v476_v46, %v475_v45 }
  0xba   : > { %v461_v51 = vadd.f32 %v460_v49, %v442_v47 }
  0xbb   : > { %721 = vst [vmem:[%s267_s15] sm:$0xff] %v720_v48  }
  0xbc   : > { %vm466_vm3 = vcmp.ge.f32.partialorder %v461_v51, 0.0  ;;  %v474_v52 = vmul.f32 %v769_v34, %v461_v51 }
  0xbe   : > { %v478_v54 = vsel %vm466_vm3, %v461_v51, %v474_v52 }
  0xbf   : > { %v725_v55 = vpack.c.bf16 %v478_v54, %v477_v53 }
  0xc1   : > { %727 = vst [vmem:[%s267_s15 + $0x8] sm:$0xff] %v725_v55  }
  0xc2 PF: > { %s14_s17 = sadd.s32 1, %s792_s17   ;;  %s918_s15 = smov %s788_s16 }
  0xc3   : > { %p11_p5 = scmp.ge.s32.totalorder %s14_s17, 4   ;;  %s919_s16 = smov %s921_s18 }
  0xc5   :  { %13 = sbr.rel (!%p11_p5) target bundleno = 2 (0x2), region = 75 }

// kernel: _lambda_.19
= control target key start
LH: loop header
LB: loop body
LE: loop exit
PB: predicated region body
PF: predicated region fallthrough
CT: control target
= control target key end

     0   :  { %s398_s1 = inlined_call_operand.vmem [shape: bf16[256,128], index: 1, kind: input, shape index: {}]   ;;  %s399_s2 = inlined_call_operand.vmem [shape: f32[1,128], index: 2, kind: input, shape index: {}]   ;;  %s400_s0 = inlined_call_operand.vmem [shape: bf16[16,256], index: 0, kind: input, shape index: {}]   ;;  %s401_s3 = inlined_call_operand.vmem [shape: f32[1,128], index: 3, kind: input, shape index: {}]   ;;  %s402_s4 = inlined_call_operand.vmem [shape: bf16[16,128], index: 4, kind: output, shape index: {}]  }
   0x1   :  { %v288_v0 = vld [vmem:[%s398_s1 + $0x38] sm:$0xff]  ;;  %v287_v2 = vld [vmem:[%s398_s1 + $0x30] sm:$0xff]  ;;  %v286_v4 = vld [vmem:[%s398_s1 + $0x28] sm:$0xff] }
   0x2   :  { %v296_v1 = vld [vmem:[%s398_s1 + $0x78] sm:$0xff]  ;;  %161 = vmatpush.bf16.msra.mxu0 %v288_v0  ;;  %v295_v3 = vld [vmem:[%s398_s1 + $0x70] sm:$0xff]  ;;  %v294_v5 = vld [vmem:[%s398_s1 + $0x68] sm:$0xff] }
   0x3   :  { %175 = vmatpush.bf16.msra.mxu1 %v296_v1  ;;  %v285_v6 = vld [vmem:[%s398_s1 + $0x20] sm:$0xff]  ;;  %v284_v8 = vld [vmem:[%s398_s1 + $0x18] sm:$0xff]  ;;  %v283_v10 = vld [vmem:[%s398_s1 + $0x10] sm:$0xff] }
   0x4   :  { %v293_v7 = vld [vmem:[%s398_s1 + $0x60] sm:$0xff]  ;;  %v292_v9 = vld [vmem:[%s398_s1 + $0x58] sm:$0xff]  ;;  %v291_v11 = vld [vmem:[%s398_s1 + $0x50] sm:$0xff] }
   0x5   :  { %v282_v12 = vld [vmem:[%s398_s1 + $0x8] sm:$0xff]  ;;  %v281_v14 = vld [vmem:[%s398_s1] sm:$0xff] }
   0x6   :  { %162 = vmatpush.bf16.msra.mxu0 %v287_v2  ;;  %v290_v13 = vld [vmem:[%s398_s1 + $0x48] sm:$0xff]  ;;  %v289_v15 = vld [vmem:[%s398_s1 + $0x40] sm:$0xff] }
   0x7   :  { %176 = vmatpush.bf16.msra.mxu1 %v295_v3  ;;  %v209_v16 = vld [vmem:[%s400_s0] sm:$0xf]  ;;  %v280_v17 = vld [vmem:[%s400_s0 + $0x4] sm:$0xf0]  ;;  %v279_v18 = vld [vmem:[%s400_s0 + $0x4] sm:$0xf] }
   0x8   :  { %v211_v19 = vld [vmem:[%s400_s0 + $0x8] sm:$0xf0]  ;;  %v210_v20 = vor.u32 %v280_v17, %v209_v16  ;;  %v302_v22 = vld [vmem:[%s399_s2] ss:$0 sm:$0xff] }
   0x9   :  { %v214_v21 = vor.u32 %v279_v18, %v211_v19  ;;  %v303_v27 = vld [vmem:[%s401_s3] ss:$0 sm:$0xff] }
   0xa   :  { %163 = vmatpush.bf16.msra.mxu0 %v286_v4 }
   0xb   :  { %177 = vmatpush.bf16.msra.mxu1 %v294_v5 }
   0xe   :  { %164 = vmatpush.bf16.msra.mxu0 %v285_v6 }
   0xf   :  { %178 = vmatpush.bf16.msra.mxu1 %v293_v7 }
  0x12   :  { %165 = vmatpush.bf16.msra.mxu0 %v284_v8 }
  0x13   :  { %179 = vmatpush.bf16.msra.mxu1 %v292_v9 }
  0x16   :  { %166 = vmatpush.bf16.msra.mxu0 %v283_v10 }
  0x17   :  { %180 = vmatpush.bf16.msra.mxu1 %v291_v11 }
  0x1a   :  { %167 = vmatpush.bf16.msra.mxu0 %v282_v12 }
  0x1b   :  { %181 = vmatpush.bf16.msra.mxu1 %v290_v13 }
  0x1e   :  { %168 = vmatpush.bf16.msra.mxu0 %v281_v14 }
  0x1f   :  { %182 = vmatpush.bf16.msra.mxu1 %v289_v15 }
  0x21   :  { %169 = vmatmul.bf16.vlgmr.msra.gmra.mxu0 %v210_v20 }
  0x22   :  { %183 = vmatmul.bf16.vlgmr.msra.gmra.mxu1 %v214_v21 }
  0x9e   :  { %v170_v23 = vpop.f32.mrf.mxu0 }
  0x9f   :  { %v184_v24 = vpop.f32.mrf.mxu1  ;;  %v171_v25 = vadd.f32 %v302_v22, %v170_v23 }
  0xa1   :  { %v185_v26 = vadd.f32 %v184_v24, %v171_v25 }
  0xa3   :  { %v195_v31 = vmul.f32 %v303_v27, %v185_v26  ;;  %vm189_vm0 = vcmp.ge.f32.partialorder %v185_v26, 0.0 }
  0xa5   :  { %v197_v34 = vsel %vm189_vm0, %v185_v26, %v195_v31 }
  0xa6   :  { %v172_v28 = vpop.f32.mrf.mxu0 }
  0xa7   :  { %v173_v29 = vadd.f32 %v302_v22, %v172_v28  ;;  %v186_v30 = vpop.f32.mrf.mxu1 }
  0xa9   :  { %v187_v32 = vadd.f32 %v186_v30, %v173_v29 }
  0xab   :  { %vm190_vm1 = vcmp.ge.f32.partialorder %v187_v32, 0.0  ;;  %v196_v33 = vmul.f32 %v303_v27, %v187_v32 }
  0xad   :  { %v198_v35 = vsel %vm190_vm1, %v187_v32, %v196_v33 }
  0xae   :  { %v300_v36 = vpack.c.bf16 %v198_v35, %v197_v34 }
  0xb0   :  { %301 = vst [vmem:[%s402_s4] sm:$0xff] %v300_v36  }

// kernel: _lambda_.20
= control target key start
LH: loop header
LB: loop body
LE: loop exit
PB: predicated region body
PF: predicated region fallthrough
CT: control target
= control target key end

     0   :  { %s1988_s1 = inlined_call_operand.vmem [shape: bf16[1536,128], index: 1, kind: input, shape index: {}]   ;;  %s1989_s2 = inlined_call_operand.vmem [shape: f32[1,128], index: 2, kind: input, shape index: {}]   ;;  %s1990_s0 = inlined_call_operand.vmem [shape: bf16[16,1536], index: 0, kind: input, shape index: {}]   ;;  %s1991_s3 = inlined_call_operand.vmem [shape: f32[1,128], index: 3, kind: input, shape index: {}]   ;;  %s1992_s4 = inlined_call_operand.vmem [shape: bf16[16,128], index: 4, kind: output, shape index: {}]  }
   0x1   :  { %v1498_v0 = vld [vmem:[%s1988_s1 + $0x38] sm:$0xff]  ;;  %v1497_v4 = vld [vmem:[%s1988_s1 + $0x30] sm:$0xff]  ;;  %v1496_v8 = vld [vmem:[%s1988_s1 + $0x28] sm:$0xff] }
   0x2   :  { %v1506_v1 = vld [vmem:[%s1988_s1 + $0x78] sm:$0xff]  ;;  %861 = vmatpush.bf16.msra.mxu0 %v1498_v0  ;;  %v1505_v5 = vld [vmem:[%s1988_s1 + $0x70] sm:$0xff]  ;;  %v1504_v9 = vld [vmem:[%s1988_s1 + $0x68] sm:$0xff] }
   0x3   :  { %v1514_v2 = vld [vmem:[%s1988_s1 + $0xb8] sm:$0xff]  ;;  %875 = vmatpush.bf16.msra.mxu1 %v1506_v1  ;;  %v1513_v6 = vld [vmem:[%s1988_s1 + $0xb0] sm:$0xff]  ;;  %v1512_v10 = vld [vmem:[%s1988_s1 + $0xa8] sm:$0xff] }
   0x4   :  { %v1522_v3 = vld [vmem:[%s1988_s1 + $0xf8] sm:$0xff]  ;;  %889 = vmatpush.bf16.msra.mxu2 %v1514_v2  ;;  %v1521_v7 = vld [vmem:[%s1988_s1 + $0xf0] sm:$0xff]  ;;  %v1520_v11 = vld [vmem:[%s1988_s1 + $0xe8] sm:$0xff] }
   0x5   :  { %903 = vmatpush.bf16.msra.mxu3 %v1522_v3  ;;  %v1495_v12 = vld [vmem:[%s1988_s1 + $0x20] sm:$0xff]  ;;  %v1494_v16 = vld [vmem:[%s1988_s1 + $0x18] sm:$0xff]  ;;  %v1493_v20 = vld [vmem:[%s1988_s1 + $0x10] sm:$0xff] }
   0x6   :  { %862 = vmatpush.bf16.msra.mxu0 %v1497_v4  ;;  %v1503_v13 = vld [vmem:[%s1988_s1 + $0x60] sm:$0xff]  ;;  %v1502_v17 = vld [vmem:[%s1988_s1 + $0x58] sm:$0xff]  ;;  %v1501_v21 = vld [vmem:[%s1988_s1 + $0x50] sm:$0xff] }
   0x7   :  { %876 = vmatpush.bf16.msra.mxu1 %v1505_v5  ;;  %v1511_v14 = vld [vmem:[%s1988_s1 + $0xa0] sm:$0xff]  ;;  %v1510_v18 = vld [vmem:[%s1988_s1 + $0x98] sm:$0xff]  ;;  %v1509_v22 = vld [vmem:[%s1988_s1 + $0x90] sm:$0xff] }
   0x8   :  { %890 = vmatpush.bf16.msra.mxu2 %v1513_v6  ;;  %v1519_v15 = vld [vmem:[%s1988_s1 + $0xe0] sm:$0xff]  ;;  %v1518_v19 = vld [vmem:[%s1988_s1 + $0xd8] sm:$0xff]  ;;  %v1517_v23 = vld [vmem:[%s1988_s1 + $0xd0] sm:$0xff] }
   0x9   :  { %904 = vmatpush.bf16.msra.mxu3 %v1521_v7  ;;  %v1492_v24 = vld [vmem:[%s1988_s1 + $0x8] sm:$0xff]  ;;  %v1491_v28 = vld [vmem:[%s1988_s1] sm:$0xff]  ;;  %v1530_v32 = vld [vmem:[%s1988_s1 + $0x138] sm:$0xff] }
   0xa   :  { %863 = vmatpush.bf16.msra.mxu0 %v1496_v8  ;;  %v1500_v25 = vld [vmem:[%s1988_s1 + $0x48] sm:$0xff]  ;;  %v1499_v29 = vld [vmem:[%s1988_s1 + $0x40] sm:$0xff]  ;;  %v1538_v33 = vld [vmem:[%s1988_s1 + $0x178] sm:$0xff] }
   0xb   :  { %877 = vmatpush.bf16.msra.mxu1 %v1504_v9  ;;  %v1508_v26 = vld [vmem:[%s1988_s1 + $0x88] sm:$0xff]  ;;  %v1507_v30 = vld [vmem:[%s1988_s1 + $0x80] sm:$0xff]  ;;  %v1485_v35 = vld [vmem:[%s1990_s0 + $0x2c] sm:$0xf0] }
   0xc   :  { %891 = vmatpush.bf16.msra.mxu2 %v1512_v10  ;;  %v1516_v27 = vld [vmem:[%s1988_s1 + $0xc8] sm:$0xff]  ;;  %v1515_v31 = vld [vmem:[%s1988_s1 + $0xc0] sm:$0xff]  ;;  %v1486_v37 = vld [vmem:[%s1990_s0 + $0x34] sm:$0xf0] }
   0xd   :  { %905 = vmatpush.bf16.msra.mxu3 %v1520_v11  ;;  %v1049_v34 = vld [vmem:[%s1990_s0] sm:$0xf]  ;;  %v1057_v36 = vld [vmem:[%s1990_s0 + $0x8] sm:$0xf]  ;;  %v1479_v38 = vld [vmem:[%s1990_s0 + $0x4] sm:$0xf] }
   0xe   :  { %864 = vmatpush.bf16.msra.mxu0 %v1495_v12  ;;  %v1051_v39 = vld [vmem:[%s1990_s0 + $0x30] sm:$0xf0]  ;;  %v1480_v40 = vld [vmem:[%s1990_s0 + $0xc] sm:$0xf]  ;;  %v1059_v41 = vld [vmem:[%s1990_s0 + $0x38] sm:$0xf0]  ;;  %v1050_v44 = vor.u32 %v1485_v35, %v1049_v34  ;;  %v1058_v45 = vor.u32 %v1486_v37, %v1057_v36 }
   0xf   :  { %878 = vmatpush.bf16.msra.mxu1 %v1503_v13  ;;  %v1546_v42 = vld [vmem:[%s1988_s1 + $0x1b8] sm:$0xff]  ;;  %v1054_v46 = vor.u32 %v1479_v38, %v1051_v39  ;;  %v1062_v47 = vor.u32 %v1480_v40, %v1059_v41  ;;  %v1529_v48 = vld [vmem:[%s1988_s1 + $0x130] sm:$0xff]  ;;  %v1528_v52 = vld [vmem:[%s1988_s1 + $0x128] sm:$0xff] }
  0x10   :  { %892 = vmatpush.bf16.msra.mxu2 %v1511_v14  ;;  %v1554_v43 = vld [vmem:[%s1988_s1 + $0x1f8] sm:$0xff]  ;;  %v1537_v49 = vld [vmem:[%s1988_s1 + $0x170] sm:$0xff]  ;;  %v1536_v53 = vld [vmem:[%s1988_s1 + $0x168] sm:$0xff] }
  0x11   :  { %906 = vmatpush.bf16.msra.mxu3 %v1519_v15  ;;  %v1545_v50 = vld [vmem:[%s1988_s1 + $0x1b0] sm:$0xff]  ;;  %v1544_v54 = vld [vmem:[%s1988_s1 + $0x1a8] sm:$0xff]  ;;  %v1527_v56 = vld [vmem:[%s1988_s1 + $0x120] sm:$0xff] }
  0x12   :  { %865 = vmatpush.bf16.msra.mxu0 %v1494_v16  ;;  %v1553_v51 = vld [vmem:[%s1988_s1 + $0x1f0] sm:$0xff]  ;;  %v1552_v55 = vld [vmem:[%s1988_s1 + $0x1e8] sm:$0xff]  ;;  %v1535_v57 = vld [vmem:[%s1988_s1 + $0x160] sm:$0xff] }
  0x13   :  { %879 = vmatpush.bf16.msra.mxu1 %v1502_v17  ;;  %v1543_v58 = vld [vmem:[%s1988_s1 + $0x1a0] sm:$0xff]  ;;  %v1526_v60 = vld [vmem:[%s1988_s1 + $0x118] sm:$0xff]  ;;  %v1525_v0 = vld [vmem:[%s1988_s1 + $0x110] sm:$0xff] }
  0x14   :  { %893 = vmatpush.bf16.msra.mxu2 %v1510_v18  ;;  %v1551_v59 = vld [vmem:[%s1988_s1 + $0x1e0] sm:$0xff]  ;;  %v1534_v61 = vld [vmem:[%s1988_s1 + $0x158] sm:$0xff]  ;;  %v1533_v1 = vld [vmem:[%s1988_s1 + $0x150] sm:$0xff] }
  0x15   :  { %907 = vmatpush.bf16.msra.mxu3 %v1518_v19  ;;  %v1542_v62 = vld [vmem:[%s1988_s1 + $0x198] sm:$0xff]  ;;  %v1541_v2 = vld [vmem:[%s1988_s1 + $0x190] sm:$0xff]  ;;  %v1524_v4 = vld [vmem:[%s1988_s1 + $0x108] sm:$0xff] }
  0x16   :  { %866 = vmatpush.bf16.msra.mxu0 %v1493_v20  ;;  %v1550_v63 = vld [vmem:[%s1988_s1 + $0x1d8] sm:$0xff]  ;;  %v1549_v3 = vld [vmem:[%s1988_s1 + $0x1d0] sm:$0xff]  ;;  %v1532_v5 = vld [vmem:[%s1988_s1 + $0x148] sm:$0xff] }
  0x17   :  { %880 = vmatpush.bf16.msra.mxu1 %v1501_v21  ;;  %v1540_v6 = vld [vmem:[%s1988_s1 + $0x188] sm:$0xff]  ;;  %v1523_v8 = vld [vmem:[%s1988_s1 + $0x100] sm:$0xff]  ;;  %v1562_v12 = vld [vmem:[%s1988_s1 + $0x238] sm:$0xff] }
  0x18   :  { %894 = vmatpush.bf16.msra.mxu2 %v1509_v22  ;;  %v1548_v7 = vld [vmem:[%s1988_s1 + $0x1c8] sm:$0xff]  ;;  %v1531_v9 = vld [vmem:[%s1988_s1 + $0x140] sm:$0xff]  ;;  %v1570_v13 = vld [vmem:[%s1988_s1 + $0x278] sm:$0xff] }
  0x19   :  { %908 = vmatpush.bf16.msra.mxu3 %v1517_v23  ;;  %v1539_v10 = vld [vmem:[%s1988_s1 + $0x180] sm:$0xff]  ;;  %v1065_v14 = vld [vmem:[%s1990_s0 + $0x10] sm:$0xf]  ;;  %v1073_v16 = vld [vmem:[%s1990_s0 + $0x18] sm:$0xf] }
  0x1a   :  { %867 = vmatpush.bf16.msra.mxu0 %v1492_v24  ;;  %v1547_v11 = vld [vmem:[%s1988_s1 + $0x1c0] sm:$0xff]  ;;  %v1488_v17 = vld [vmem:[%s1990_s0 + $0x44] sm:$0xf0]  ;;  %v1481_v18 = vld [vmem:[%s1990_s0 + $0x14] sm:$0xf] }
  0x1b   :  { %881 = vmatpush.bf16.msra.mxu1 %v1500_v25  ;;  %v1487_v15 = vld [vmem:[%s1990_s0 + $0x3c] sm:$0xf0]  ;;  %v1067_v19 = vld [vmem:[%s1990_s0 + $0x40] sm:$0xf0]  ;;  %v1482_v20 = vld [vmem:[%s1990_s0 + $0x1c] sm:$0xf]  ;;  %v1074_v25 = vor.u32 %v1488_v17, %v1073_v16 }
  0x1c   :  { %895 = vmatpush.bf16.msra.mxu2 %v1508_v26  ;;  %v1075_v21 = vld [vmem:[%s1990_s0 + $0x48] sm:$0xf0]  ;;  %v1578_v22 = vld [vmem:[%s1988_s1 + $0x2b8] sm:$0xff]  ;;  %v1066_v24 = vor.u32 %v1487_v15, %v1065_v14  ;;  %v1070_v26 = vor.u32 %v1481_v18, %v1067_v19  ;;  %v1559_v36 = vld [vmem:[%s1988_s1 + $0x220] sm:$0xff] }
  0x1d   :  { %909 = vmatpush.bf16.msra.mxu3 %v1516_v27  ;;  %v1586_v23 = vld [vmem:[%s1988_s1 + $0x2f8] sm:$0xff]  ;;  %v1078_v27 = vor.u32 %v1482_v20, %v1075_v21  ;;  %v1576_v34 = vld [vmem:[%s1988_s1 + $0x2a8] sm:$0xff]  ;;  %v1567_v37 = vld [vmem:[%s1988_s1 + $0x260] sm:$0xff] }
  0x1e   :  { %868 = vmatpush.bf16.msra.mxu0 %v1491_v28  ;;  %v1561_v28 = vld [vmem:[%s1988_s1 + $0x230] sm:$0xff]  ;;  %v1584_v35 = vld [vmem:[%s1988_s1 + $0x2e8] sm:$0xff]  ;;  %v1575_v38 = vld [vmem:[%s1988_s1 + $0x2a0] sm:$0xff] }
  0x1f   :  { %882 = vmatpush.bf16.msra.mxu1 %v1499_v29  ;;  %v1569_v29 = vld [vmem:[%s1988_s1 + $0x270] sm:$0xff]  ;;  %v1583_v39 = vld [vmem:[%s1988_s1 + $0x2e0] sm:$0xff]  ;;  %v1558_v40 = vld [vmem:[%s1988_s1 + $0x218] sm:$0xff] }
  0x20   :  { %896 = vmatpush.bf16.msra.mxu2 %v1507_v30  ;;  %v1577_v30 = vld [vmem:[%s1988_s1 + $0x2b0] sm:$0xff]  ;;  %v1566_v41 = vld [vmem:[%s1988_s1 + $0x258] sm:$0xff] }
  0x21   :  { %910 = vmatpush.bf16.msra.mxu3 %v1515_v31  ;;  %869 = vmatmul.bf16.vlgmr.msra.gmra.mxu0 %v1050_v44  ;;  %v1585_v31 = vld [vmem:[%s1988_s1 + $0x2f0] sm:$0xff] }
  0x22   :  { %917 = vmatpush.bf16.msrb.mxu0 %v1530_v32  ;;  %883 = vmatmul.bf16.vlgmr.msra.gmra.mxu1 %v1054_v46  ;;  %v1560_v32 = vld [vmem:[%s1988_s1 + $0x228] sm:$0xff]  ;;  %v1557_v44 = vld [vmem:[%s1988_s1 + $0x210] sm:$0xff] }
  0x23   :  { %931 = vmatpush.bf16.msrb.mxu1 %v1538_v33  ;;  %897 = vmatmul.bf16.vlgmr.msra.gmra.mxu2 %v1058_v45  ;;  %v1568_v33 = vld [vmem:[%s1988_s1 + $0x268] sm:$0xff]  ;;  %v1565_v45 = vld [vmem:[%s1988_s1 + $0x250] sm:$0xff] }
  0x24   :  { %945 = vmatpush.bf16.msrb.mxu2 %v1546_v42  ;;  %911 = vmatmul.bf16.vlgmr.msra.gmra.mxu3 %v1062_v47  ;;  %v1574_v42 = vld [vmem:[%s1988_s1 + $0x298] sm:$0xff]  ;;  %v1573_v46 = vld [vmem:[%s1988_s1 + $0x290] sm:$0xff] }
  0x25   :  { %959 = vmatpush.bf16.msrb.mxu3 %v1554_v43  ;;  %v1582_v43 = vld [vmem:[%s1988_s1 + $0x2d8] sm:$0xff]  ;;  %v1581_v47 = vld [vmem:[%s1988_s1 + $0x2d0] sm:$0xff] }
  0x26   :  { %918 = vmatpush.bf16.msrb.mxu0 %v1529_v48  ;;  %v1556_v48 = vld [vmem:[%s1988_s1 + $0x208] sm:$0xff] }
  0x27   :  { %932 = vmatpush.bf16.msrb.mxu1 %v1537_v49  ;;  %v1564_v49 = vld [vmem:[%s1988_s1 + $0x248] sm:$0xff] }
  0x28   :  { %946 = vmatpush.bf16.msrb.mxu2 %v1545_v50  ;;  %v1572_v50 = vld [vmem:[%s1988_s1 + $0x288] sm:$0xff] }
  0x29   :  { %960 = vmatpush.bf16.msrb.mxu3 %v1553_v51  ;;  %v1580_v51 = vld [vmem:[%s1988_s1 + $0x2c8] sm:$0xff] }
  0x2a   :  { %919 = vmatpush.bf16.msrb.mxu0 %v1528_v52  ;;  %v1555_v52 = vld [vmem:[%s1988_s1 + $0x200] sm:$0xff] }
  0x2b   :  { %933 = vmatpush.bf16.msrb.mxu1 %v1536_v53  ;;  %v1563_v53 = vld [vmem:[%s1988_s1 + $0x240] sm:$0xff] }
  0x2c   :  { %947 = vmatpush.bf16.msrb.mxu2 %v1544_v54  ;;  %v1571_v54 = vld [vmem:[%s1988_s1 + $0x280] sm:$0xff] }
  0x2d   :  { %961 = vmatpush.bf16.msrb.mxu3 %v1552_v55  ;;  %v1579_v55 = vld [vmem:[%s1988_s1 + $0x2c0] sm:$0xff] }
  0x2e   :  { %920 = vmatpush.bf16.msrb.mxu0 %v1527_v56  ;;  %v1081_v56 = vld [vmem:[%s1990_s0 + $0x20] sm:$0xf] }
  0x2f   :  { %934 = vmatpush.bf16.msrb.mxu1 %v1535_v57  ;;  %v1489_v57 = vld [vmem:[%s1990_s0 + $0x4c] sm:$0xf0] }
  0x30   :  { %948 = vmatpush.bf16.msrb.mxu2 %v1543_v58  ;;  %v1483_v58 = vld [vmem:[%s1990_s0 + $0x24] sm:$0xf] }
  0x31   :  { %962 = vmatpush.bf16.msrb.mxu3 %v1551_v59  ;;  %v1083_v59 = vld [vmem:[%s1990_s0 + $0x50] sm:$0xf0] }
  0x32   :  { %921 = vmatpush.bf16.msrb.mxu0 %v1526_v60  ;;  %v1089_v60 = vld [vmem:[%s1990_s0 + $0x28] sm:$0xf] }
  0x33   :  { %935 = vmatpush.bf16.msrb.mxu1 %v1534_v61  ;;  %v1490_v61 = vld [vmem:[%s1990_s0 + $0x54] sm:$0xf0] }
  0x34   :  { %949 = vmatpush.bf16.msrb.mxu2 %v1542_v62  ;;  %v1484_v62 = vld [vmem:[%s1990_s0 + $0x2c] sm:$0xf] }
  0x35   :  { %963 = vmatpush.bf16.msrb.mxu3 %v1550_v63  ;;  %v1091_v63 = vld [vmem:[%s1990_s0 + $0x58] sm:$0xf0] }
  0x36   :  { %922 = vmatpush.bf16.msrb.mxu0 %v1525_v0  ;;  %v1082_v0 = vor.u32 %v1489_v57, %v1081_v56 }
  0x37   :  { %936 = vmatpush.bf16.msrb.mxu1 %v1533_v1  ;;  %v1086_v1 = vor.u32 %v1483_v58, %v1083_v59 }
  0x38   :  { %950 = vmatpush.bf16.msrb.mxu2 %v1541_v2  ;;  %v1090_v2 = vor.u32 %v1490_v61, %v1089_v60 }
  0x39   :  { %964 = vmatpush.bf16.msrb.mxu3 %v1549_v3  ;;  %v1094_v3 = vor.u32 %v1484_v62, %v1091_v63 }
  0x3a   :  { %923 = vmatpush.bf16.msrb.mxu0 %v1524_v4 }
  0x3b   :  { %937 = vmatpush.bf16.msrb.mxu1 %v1532_v5 }
  0x3c   :  { %951 = vmatpush.bf16.msrb.mxu2 %v1540_v6 }
  0x3d   :  { %965 = vmatpush.bf16.msrb.mxu3 %v1548_v7 }
  0x3e   :  { %924 = vmatpush.bf16.msrb.mxu0 %v1523_v8  ;;  %v1592_v8 = vld [vmem:[%s1989_s2] ss:$0 sm:$0xff] }
  0x3f   :  { %938 = vmatpush.bf16.msrb.mxu1 %v1531_v9 }
  0x40   :  { %952 = vmatpush.bf16.msrb.mxu2 %v1539_v10 }
  0x41   :  { %966 = vmatpush.bf16.msrb.mxu3 %v1547_v11  ;;  %925 = vmatmul.bf16.vlgmr.msrb.gmra.mxu0 %v1066_v24 }
  0x42   :  { %973 = vmatpush.bf16.msra.mxu0 %v1562_v12  ;;  %939 = vmatmul.bf16.vlgmr.msrb.gmra.mxu1 %v1070_v26 }
  0x43   :  { %987 = vmatpush.bf16.msra.mxu1 %v1570_v13  ;;  %953 = vmatmul.bf16.vlgmr.msrb.gmra.mxu2 %v1074_v25 }
  0x44   :  { %1001 = vmatpush.bf16.msra.mxu2 %v1578_v22  ;;  %967 = vmatmul.bf16.vlgmr.msrb.gmra.mxu3 %v1078_v27 }
  0x45   :  { %1015 = vmatpush.bf16.msra.mxu3 %v1586_v23 }
  0x46   :  { %974 = vmatpush.bf16.msra.mxu0 %v1561_v28 }
  0x47   :  { %988 = vmatpush.bf16.msra.mxu1 %v1569_v29 }
  0x48   :  { %1002 = vmatpush.bf16.msra.mxu2 %v1577_v30 }
  0x49   :  { %1016 = vmatpush.bf16.msra.mxu3 %v1585_v31 }
  0x4a   :  { %975 = vmatpush.bf16.msra.mxu0 %v1560_v32 }
  0x4b   :  { %989 = vmatpush.bf16.msra.mxu1 %v1568_v33 }
  0x4c   :  { %1003 = vmatpush.bf16.msra.mxu2 %v1576_v34 }
  0x4d   :  { %1017 = vmatpush.bf16.msra.mxu3 %v1584_v35 }
  0x4e   :  { %976 = vmatpush.bf16.msra.mxu0 %v1559_v36 }
  0x4f   :  { %990 = vmatpush.bf16.msra.mxu1 %v1567_v37 }
  0x50   :  { %1004 = vmatpush.bf16.msra.mxu2 %v1575_v38 }
  0x51   :  { %1018 = vmatpush.bf16.msra.mxu3 %v1583_v39 }
  0x52   :  { %977 = vmatpush.bf16.msra.mxu0 %v1558_v40 }
  0x53   :  { %991 = vmatpush.bf16.msra.mxu1 %v1566_v41 }
  0x54   :  { %1005 = vmatpush.bf16.msra.mxu2 %v1574_v42 }
  0x55   :  { %1019 = vmatpush.bf16.msra.mxu3 %v1582_v43 }
  0x56   :  { %978 = vmatpush.bf16.msra.mxu0 %v1557_v44 }
  0x57   :  { %992 = vmatpush.bf16.msra.mxu1 %v1565_v45 }
  0x58   :  { %1006 = vmatpush.bf16.msra.mxu2 %v1573_v46 }
  0x59   :  { %1020 = vmatpush.bf16.msra.mxu3 %v1581_v47 }
  0x5a   :  { %979 = vmatpush.bf16.msra.mxu0 %v1556_v48  ;;  %v1593_v48 = vld [vmem:[%s1991_s3] ss:$0 sm:$0xff] }
  0x5b   :  { %993 = vmatpush.bf16.msra.mxu1 %v1564_v49 }
  0x5c   :  { %1007 = vmatpush.bf16.msra.mxu2 %v1572_v50 }
  0x5d   :  { %1021 = vmatpush.bf16.msra.mxu3 %v1580_v51 }
  0x5e   :  { %980 = vmatpush.bf16.msra.mxu0 %v1555_v52 }
  0x5f   :  { %994 = vmatpush.bf16.msra.mxu1 %v1563_v53 }
  0x60   :  { %1008 = vmatpush.bf16.msra.mxu2 %v1571_v54 }
  0x61   :  { %1022 = vmatpush.bf16.msra.mxu3 %v1579_v55  ;;  %981 = vmatmul.bf16.vlgmr.msra.gmra.mxu0 %v1082_v0 }
  0x62   :  { %995 = vmatmul.bf16.vlgmr.msra.gmra.mxu1 %v1086_v1 }
  0x63   :  { %1009 = vmatmul.bf16.vlgmr.msra.gmra.mxu2 %v1090_v2 }
  0x64   :  { %1023 = vmatmul.bf16.vlgmr.msra.gmra.mxu3 %v1094_v3 }
  0x9e   :  { %v870_v4 = vpop.f32.mrf.mxu0 }
  0x9f   :  { %v884_v5 = vpop.f32.mrf.mxu1  ;;  %v871_v10 = vadd.f32 %v1592_v8, %v870_v4 }
  0xa1   :  { %v885_v12 = vadd.f32 %v884_v5, %v871_v10 }
  0xa6   :  { %v898_v6 = vpop.f32.mrf.mxu2  ;;  %v872_v9 = vpop.f32.mrf.mxu0 }
  0xa7   :  { %v912_v7 = vpop.f32.mrf.mxu3  ;;  %v886_v11 = vpop.f32.mrf.mxu1  ;;  %v899_v15 = vadd.f32 %v898_v6, %v885_v12  ;;  %v873_v16 = vadd.f32 %v1592_v8, %v872_v9 }
  0xa9   :  { %v913_v19 = vadd.f32 %v912_v7, %v899_v15  ;;  %v887_v20 = vadd.f32 %v886_v11, %v873_v16 }
  0xae   :  { %v900_v13 = vpop.f32.mrf.mxu2 }
  0xaf   :  { %v914_v14 = vpop.f32.mrf.mxu3  ;;  %v901_v23 = vadd.f32 %v900_v13, %v887_v20 }
  0xb1   :  { %v915_v26 = vadd.f32 %v914_v14, %v901_v23 }
  0xbe   :  { %v926_v17 = vpop.f32.mrf.mxu0 }
  0xbf   :  { %v940_v18 = vpop.f32.mrf.mxu1  ;;  %v927_v24 = vadd.f32 %v926_v17, %v913_v19 }
  0xc1   :  { %v941_v27 = vadd.f32 %v940_v18, %v927_v24 }
  0xc6   :  { %v954_v21 = vpop.f32.mrf.mxu2  ;;  %v928_v25 = vpop.f32.mrf.mxu0 }
  0xc7   :  { %v968_v22 = vpop.f32.mrf.mxu3  ;;  %v942_v28 = vpop.f32.mrf.mxu1  ;;  %v955_v29 = vadd.f32 %v954_v21, %v941_v27  ;;  %v929_v30 = vadd.f32 %v928_v25, %v915_v26 }
  0xc9   :  { %v969_v34 = vadd.f32 %v968_v22, %v955_v29  ;;  %v943_v35 = vadd.f32 %v942_v28, %v929_v30 }
  0xce   :  { %v956_v31 = vpop.f32.mrf.mxu2 }
  0xcf   :  { %v970_v32 = vpop.f32.mrf.mxu3  ;;  %v957_v37 = vadd.f32 %v956_v31, %v943_v35 }
  0xd1   :  { %v971_v41 = vadd.f32 %v970_v32, %v957_v37 }
  0xde   :  { %v982_v33 = vpop.f32.mrf.mxu0 }
  0xdf   :  { %v996_v36 = vpop.f32.mrf.mxu1  ;;  %v983_v38 = vadd.f32 %v982_v33, %v969_v34 }
  0xe1   :  { %v997_v42 = vadd.f32 %v996_v36, %v983_v38 }
  0xe6   :  { %v1010_v39 = vpop.f32.mrf.mxu2  ;;  %v984_v43 = vpop.f32.mrf.mxu0 }
  0xe7   :  { %v1024_v40 = vpop.f32.mrf.mxu3  ;;  %v1011_v44 = vadd.f32 %v1010_v39, %v997_v42  ;;  %v985_v45 = vadd.f32 %v984_v43, %v971_v41  ;;  %v998_v46 = vpop.f32.mrf.mxu1 }
  0xe9   :  { %v1025_v47 = vadd.f32 %v1024_v40, %v1011_v44  ;;  %v999_v49 = vadd.f32 %v998_v46, %v985_v45 }
  0xeb   :  { %v1035_v53 = vmul.f32 %v1593_v48, %v1025_v47  ;;  %vm1029_vm0 = vcmp.ge.f32.partialorder %v1025_v47, 0.0 }
  0xed   :  { %v1037_v56 = vsel %vm1029_vm0, %v1025_v47, %v1035_v53 }
  0xee   :  { %v1012_v50 = vpop.f32.mrf.mxu2 }
  0xef   :  { %v1013_v51 = vadd.f32 %v1012_v50, %v999_v49  ;;  %v1026_v52 = vpop.f32.mrf.mxu3 }
  0xf1   :  { %v1027_v54 = vadd.f32 %v1026_v52, %v1013_v51 }
  0xf3   :  { %vm1030_vm1 = vcmp.ge.f32.partialorder %v1027_v54, 0.0  ;;  %v1036_v55 = vmul.f32 %v1593_v48, %v1027_v54 }
  0xf5   :  { %v1038_v57 = vsel %vm1030_vm1, %v1027_v54, %v1036_v55 }
  0xf6   :  { %v1590_v58 = vpack.c.bf16 %v1038_v57, %v1037_v56 }
  0xf8   :  { %1591 = vst [vmem:[%s1992_s4] sm:$0xff] %v1590_v58  }

// kernel: _lambda_.21
= control target key start
LH: loop header
LB: loop body
LE: loop exit
PB: predicated region body
PF: predicated region fallthrough
CT: control target
= control target key end

     0   :  { %s238_s1 = inlined_call_operand.vmem [shape: bf16[128,128], index: 1, kind: input, shape index: {}]   ;;  %s239_s2 = inlined_call_operand.vmem [shape: f32[1,128], index: 2, kind: input, shape index: {}]   ;;  %s240_s3 = inlined_call_operand.vmem [shape: f32[1,128], index: 3, kind: input, shape index: {}]   ;;  %s241_s0 = inlined_call_operand.vmem [shape: bf16[16,128], index: 0, kind: input, shape index: {}]   ;;  %s242_s4 = inlined_call_operand.vmem [shape: bf16[16,128], index: 4, kind: output, shape index: {}]  }
   0x1   :  { %v169_v0 = vld [vmem:[%s238_s1 + $0x38] sm:$0xff]  ;;  %v168_v1 = vld [vmem:[%s238_s1 + $0x30] sm:$0xff]  ;;  %v167_v2 = vld [vmem:[%s238_s1 + $0x28] sm:$0xff] }
   0x2   :  { %93 = vmatpush.bf16.msra.mxu0 %v169_v0  ;;  %v166_v3 = vld [vmem:[%s238_s1 + $0x20] sm:$0xff]  ;;  %v165_v4 = vld [vmem:[%s238_s1 + $0x18] sm:$0xff]  ;;  %v164_v5 = vld [vmem:[%s238_s1 + $0x10] sm:$0xff] }
   0x3   :  { %v163_v6 = vld [vmem:[%s238_s1 + $0x8] sm:$0xff]  ;;  %v162_v7 = vld [vmem:[%s238_s1] sm:$0xff] }
   0x4   :  { %v161_v8 = vld [vmem:[%s241_s0] sm:$0xff] }
   0x5   :  { %v175_v10 = vld [vmem:[%s239_s2] ss:$0 sm:$0xff] }
   0x6   :  { %94 = vmatpush.bf16.msra.mxu0 %v168_v1  ;;  %v176_v12 = vld [vmem:[%s240_s3] ss:$0 sm:$0xff] }
   0xa   :  { %95 = vmatpush.bf16.msra.mxu0 %v167_v2 }
   0xe   :  { %96 = vmatpush.bf16.msra.mxu0 %v166_v3 }
  0x12   :  { %97 = vmatpush.bf16.msra.mxu0 %v165_v4 }
  0x16   :  { %98 = vmatpush.bf16.msra.mxu0 %v164_v5 }
  0x1a   :  { %99 = vmatpush.bf16.msra.mxu0 %v163_v6 }
  0x1e   :  { %100 = vmatpush.bf16.msra.mxu0 %v162_v7 }
  0x21   :  { %101 = vmatmul.bf16.vlgmr.msra.gmra.mxu0 %v161_v8 }
  0x9e   :  { %v102_v9 = vpop.f32.mrf.mxu0 }
  0x9f   :  { %v103_v11 = vadd.f32 %v175_v10, %v102_v9 }
  0xa1   :  { %v113_v14 = vmul.f32 %v176_v12, %v103_v11  ;;  %vm107_vm0 = vcmp.ge.f32.partialorder %v103_v11, 0.0 }
  0xa3   :  { %v115_v17 = vsel %vm107_vm0, %v103_v11, %v113_v14 }
  0xa6   :  { %v104_v13 = vpop.f32.mrf.mxu0 }
  0xa7   :  { %v105_v15 = vadd.f32 %v175_v10, %v104_v13 }
  0xa9   :  { %vm108_vm1 = vcmp.ge.f32.partialorder %v105_v15, 0.0  ;;  %v114_v16 = vmul.f32 %v176_v12, %v105_v15 }
  0xab   :  { %v116_v18 = vsel %vm108_vm1, %v105_v15, %v114_v16 }
  0xac   :  { %v173_v19 = vpack.c.bf16 %v116_v18, %v115_v17 }
  0xae   :  { %174 = vst [vmem:[%s242_s4] sm:$0xff] %v173_v19  }

// kernel: _lambda_.22
= control target key start
LH: loop header
LB: loop body
LE: loop exit
PB: predicated region body
PF: predicated region fallthrough
CT: control target
= control target key end

     0   :  { %s961_s15 = smov 0   ;;  %s963_s16 = smov 0   ;;  %s1202_s0 = inlined_call_operand.vmem [shape: bf16[32,256], index: 0, kind: input, shape index: {}]   ;;  %s1203_s1 = inlined_call_operand.vmem [shape: bf16[256,256], index: 1, kind: input, shape index: {}]   ;;  %s1204_s2 = inlined_call_operand.vmem [shape: f32[1,256], index: 2, kind: input, shape index: {}]   ;;  %s1205_s3 = inlined_call_operand.vmem [shape: f32[1,256], index: 3, kind: input, shape index: {}]   ;;  %s1206_s4 = inlined_call_operand.vmem [shape: bf16[32,256], index: 4, kind: output, shape index: {}]  }
   0x1   :  { %s965_s17 = smov 0  }
   0x2 LB: > { %s26_s18 = sadd.s32 1, %s930_s16  ;;  %p707_p0 = scmp.ge.s32.totalorder %s934_s17, 1  ;;  %s934_s17 = sphi %s965_s17, %s14_s17   ;;  %s930_s16 = sphi %s963_s16, %s1208_s16   ;;  %s926_s15 = sphi %s961_s15, %s1207_s15  }
   0x3   : > { %p28_p1 = scmp.ge.s32.totalorder %s26_s18, 2  ;;  %p209_p2 = scmp.lt.s32.totalorder %s934_s17, 3 }
   0x5   : > { %s1210_s18 = smov (%p28_p1, %s26_s18), 0  ;;  %p210_p3 = pnand %p707_p0, %p209_p2 }
   0x6   : > { %s708_s13 = sshll.u32 (!%p210_p3), %s926_s15, 1 }
   0x7   : > { %213 = sbr.rel (%p210_p3) target bundleno = 197 (0xc5), region = 36  ;;  %p255_p4 = scmp.lt.s32.totalorder (!%p210_p3), %s708_s13, 3 }
   0xc   : > { %v780_v0 = vld [vmem:[%s1203_s1 + $0x70] sm:$0xf]  ;;  %v871_v1 = vld [vmem:[%s1203_s1 + $0x74] sm:$0xf0]  ;;  %v870_v5 = vld [vmem:[%s1203_s1 + $0x74] sm:$0xf] }
   0xd   : > { %v844_v2 = vld [vmem:[%s1203_s1 + $0xf0] sm:$0xf]  ;;  %v781_v3 = vor.u32 %v871_v1, %v780_v0  ;;  %v887_v4 = vld [vmem:[%s1203_s1 + $0xf4] sm:$0xf0]  ;;  %v782_v6 = vld [vmem:[%s1203_s1 + $0x78] sm:$0xf0] }
   0xe   : > { %v845_v7 = vor.u32 %v887_v4, %v844_v2  ;;  %v785_v8 = vor.u32 %v870_v5, %v782_v6  ;;  %v886_v9 = vld [vmem:[%s1203_s1 + $0xf4] sm:$0xf]  ;;  %v846_v10 = vld [vmem:[%s1203_s1 + $0xf8] sm:$0xf0]  ;;  %v772_v11 = vld [vmem:[%s1203_s1 + $0x60] sm:$0xf] }
   0xf   : > { %499 = vmatpush.bf16.msra.mxu0 %v781_v3  ;;  %v849_v12 = vor.u32 %v886_v9, %v846_v10  ;;  %v869_v13 = vld [vmem:[%s1203_s1 + $0x64] sm:$0xf0]  ;;  %v836_v14 = vld [vmem:[%s1203_s1 + $0xe0] sm:$0xf]  ;;  %v868_v18 = vld [vmem:[%s1203_s1 + $0x64] sm:$0xf] }
  0x10   : > { %v885_v15 = vld [vmem:[%s1203_s1 + $0xe4] sm:$0xf0]  ;;  %513 = vmatpush.bf16.msra.mxu1 %v845_v7  ;;  %527 = vmatpush.bf16.msra.mxu2 %v785_v8  ;;  %v773_v16 = vor.u32 %v869_v13, %v772_v11  ;;  %v774_v19 = vld [vmem:[%s1203_s1 + $0x68] sm:$0xf0]  ;;  %v884_v20 = vld [vmem:[%s1203_s1 + $0xe4] sm:$0xf] }
  0x11   : > { %v837_v17 = vor.u32 %v885_v15, %v836_v14  ;;  %541 = vmatpush.bf16.msra.mxu3 %v849_v12  ;;  %v777_v21 = vor.u32 %v868_v18, %v774_v19  ;;  %v838_v22 = vld [vmem:[%s1203_s1 + $0xe8] sm:$0xf0]  ;;  %v764_v23 = vld [vmem:[%s1203_s1 + $0x50] sm:$0xf]  ;;  %v867_v24 = vld [vmem:[%s1203_s1 + $0x54] sm:$0xf0] }
  0x12   : > { %v841_v25 = vor.u32 %v884_v20, %v838_v22  ;;  %v828_v26 = vld [vmem:[%s1203_s1 + $0xd0] sm:$0xf]  ;;  %v883_v27 = vld [vmem:[%s1203_s1 + $0xd4] sm:$0xf0]  ;;  %v866_v28 = vld [vmem:[%s1203_s1 + $0x54] sm:$0xf]  ;;  %v765_v29 = vor.u32 %v867_v24, %v764_v23 }
  0x13   : > { %500 = vmatpush.bf16.msra.mxu0 %v773_v16  ;;  %v766_v30 = vld [vmem:[%s1203_s1 + $0x58] sm:$0xf0]  ;;  %v882_v31 = vld [vmem:[%s1203_s1 + $0xd4] sm:$0xf]  ;;  %v829_v33 = vor.u32 %v883_v27, %v828_v26  ;;  %v756_v35 = vld [vmem:[%s1203_s1 + $0x40] sm:$0xf] }
  0x14   : > { %v830_v32 = vld [vmem:[%s1203_s1 + $0xd8] sm:$0xf0]  ;;  %514 = vmatpush.bf16.msra.mxu1 %v837_v17  ;;  %528 = vmatpush.bf16.msra.mxu2 %v777_v21  ;;  %v769_v34 = vor.u32 %v866_v28, %v766_v30  ;;  %v865_v36 = vld [vmem:[%s1203_s1 + $0x44] sm:$0xf0]  ;;  %v820_v37 = vld [vmem:[%s1203_s1 + $0xc0] sm:$0xf] }
  0x15   : > { %542 = vmatpush.bf16.msra.mxu3 %v841_v25  ;;  %v833_v38 = vor.u32 %v882_v31, %v830_v32  ;;  %v881_v39 = vld [vmem:[%s1203_s1 + $0xc4] sm:$0xf0]  ;;  %v864_v40 = vld [vmem:[%s1203_s1 + $0x44] sm:$0xf]  ;;  %v758_v41 = vld [vmem:[%s1203_s1 + $0x48] sm:$0xf0]  ;;  %v757_v44 = vor.u32 %v865_v36, %v756_v35 }
  0x16   : > { %v880_v42 = vld [vmem:[%s1203_s1 + $0xc4] sm:$0xf]  ;;  %v822_v43 = vld [vmem:[%s1203_s1 + $0xc8] sm:$0xf0]  ;;  %v821_v45 = vor.u32 %v881_v39, %v820_v37  ;;  %v761_v46 = vor.u32 %v864_v40, %v758_v41  ;;  %v748_v47 = vld [vmem:[%s1203_s1 + $0x30] sm:$0xf] }
  0x17   : > { %501 = vmatpush.bf16.msra.mxu0 %v765_v29  ;;  %v863_v48 = vld [vmem:[%s1203_s1 + $0x34] sm:$0xf0]  ;;  %v812_v49 = vld [vmem:[%s1203_s1 + $0xb0] sm:$0xf]  ;;  %v825_v50 = vor.u32 %v880_v42, %v822_v43  ;;  %v862_v52 = vld [vmem:[%s1203_s1 + $0x34] sm:$0xf] }
  0x18   : > { %515 = vmatpush.bf16.msra.mxu1 %v829_v33  ;;  %529 = vmatpush.bf16.msra.mxu2 %v769_v34  ;;  %v879_v51 = vld [vmem:[%s1203_s1 + $0xb4] sm:$0xf0]  ;;  %v750_v53 = vld [vmem:[%s1203_s1 + $0x38] sm:$0xf0]  ;;  %v878_v54 = vld [vmem:[%s1203_s1 + $0xb4] sm:$0xf]  ;;  %v749_v56 = vor.u32 %v863_v48, %v748_v47 }
  0x19   : > { %543 = vmatpush.bf16.msra.mxu3 %v833_v38  ;;  %v814_v55 = vld [vmem:[%s1203_s1 + $0xb8] sm:$0xf0]  ;;  %v813_v57 = vor.u32 %v879_v51, %v812_v49  ;;  %v753_v58 = vor.u32 %v862_v52, %v750_v53  ;;  %v740_v59 = vld [vmem:[%s1203_s1 + $0x20] sm:$0xf]  ;;  %v861_v60 = vld [vmem:[%s1203_s1 + $0x24] sm:$0xf0] }
  0x1a   : > { %v804_v61 = vld [vmem:[%s1203_s1 + $0xa0] sm:$0xf]  ;;  %v817_v62 = vor.u32 %v878_v54, %v814_v55  ;;  %v877_v63 = vld [vmem:[%s1203_s1 + $0xa4] sm:$0xf0]  ;;  %v860_v0 = vld [vmem:[%s1203_s1 + $0x24] sm:$0xf]  ;;  %v741_v4 = vor.u32 %v861_v60, %v740_v59 }
  0x1b   : > { %502 = vmatpush.bf16.msra.mxu0 %v757_v44  ;;  %v742_v1 = vld [vmem:[%s1203_s1 + $0x28] sm:$0xf0]  ;;  %v876_v2 = vld [vmem:[%s1203_s1 + $0xa4] sm:$0xf]  ;;  %v732_v5 = vld [vmem:[%s1203_s1 + $0x10] sm:$0xf]  ;;  %v805_v6 = vor.u32 %v877_v63, %v804_v61 }
  0x1c   : > { %516 = vmatpush.bf16.msra.mxu1 %v821_v45  ;;  %530 = vmatpush.bf16.msra.mxu2 %v761_v46  ;;  %v806_v3 = vld [vmem:[%s1203_s1 + $0xa8] sm:$0xf0]  ;;  %v745_v7 = vor.u32 %v860_v0, %v742_v1  ;;  %v859_v8 = vld [vmem:[%s1203_s1 + $0x14] sm:$0xf0]  ;;  %v796_v9 = vld [vmem:[%s1203_s1 + $0x90] sm:$0xf] }
  0x1d   : > { %544 = vmatpush.bf16.msra.mxu3 %v825_v50  ;;  %v875_v10 = vld [vmem:[%s1203_s1 + $0x94] sm:$0xf0]  ;;  %v809_v11 = vor.u32 %v876_v2, %v806_v3  ;;  %v858_v12 = vld [vmem:[%s1203_s1 + $0x14] sm:$0xf]  ;;  %v734_v13 = vld [vmem:[%s1203_s1 + $0x18] sm:$0xf0]  ;;  %v733_v16 = vor.u32 %v859_v8, %v732_v5 }
  0x1e   : > { %v874_v14 = vld [vmem:[%s1203_s1 + $0x94] sm:$0xf]  ;;  %v798_v15 = vld [vmem:[%s1203_s1 + $0x98] sm:$0xf0]  ;;  %v724_v17 = vld [vmem:[%s1203_s1] sm:$0xf]  ;;  %v797_v18 = vor.u32 %v875_v10, %v796_v9  ;;  %v737_v19 = vor.u32 %v858_v12, %v734_v13 }
  0x1f   : > { %503 = vmatpush.bf16.msra.mxu0 %v749_v56  ;;  %v857_v20 = vld [vmem:[%s1203_s1 + $0x4] sm:$0xf0]  ;;  %v788_v21 = vld [vmem:[%s1203_s1 + $0x80] sm:$0xf]  ;;  %s1212_s13 = smov (!%p255_p4, %s708_s13), 3  ;;  %v801_v22 = vor.u32 %v874_v14, %v798_v15 }
  0x20   : > { %517 = vmatpush.bf16.msra.mxu1 %v813_v57  ;;  %531 = vmatpush.bf16.msra.mxu2 %v753_v58  ;;  %v873_v23 = vld [vmem:[%s1203_s1 + $0x84] sm:$0xf0]  ;;  %v856_v24 = vld [vmem:[%s1203_s1 + $0x4] sm:$0xf]  ;;  %v726_v25 = vld [vmem:[%s1203_s1 + $0x8] sm:$0xf0]  ;;  %v725_v28 = vor.u32 %v857_v20, %v724_v17 }
  0x21   : > { %545 = vmatpush.bf16.msra.mxu3 %v817_v62  ;;  %v872_v26 = vld [vmem:[%s1203_s1 + $0x84] sm:$0xf]  ;;  %v790_v27 = vld [vmem:[%s1203_s1 + $0x88] sm:$0xf0]  ;;  %s852_s11 = sshll.u32 %s1212_s13, 3  ;;  %v789_v29 = vor.u32 %v873_v23, %v788_v21  ;;  %v729_v30 = vor.u32 %v856_v24, %v726_v25 }
  0x22   : > { %s259_s19 = scalar_lea.vmem %s1202_s0, %s852_s11  ;;  %v793_v34 = vor.u32 %v872_v26, %v790_v27  ;;  %v323_v38 = vld [vmem:[%s1204_s2] sm:$0x3]  ;;  %s286_s25 = scalar_lea.vmem %s1206_s4, %s852_s11 }
  0x23   : > { %504 = vmatpush.bf16.msra.mxu0 %v741_v4  ;;  %v716_v31 = vld [vmem:[%s259_s19] sm:$0xf]  ;;  %v855_v32 = vld [vmem:[%s259_s19 + $0x4] sm:$0xf0]  ;;  %v854_v33 = vld [vmem:[%s259_s19 + $0x4] sm:$0xf] }
  0x24   : > { %518 = vmatpush.bf16.msra.mxu1 %v805_v6  ;;  %532 = vmatpush.bf16.msra.mxu2 %v745_v7  ;;  %v718_v35 = vld [vmem:[%s259_s19 + $0x8] sm:$0xf0]  ;;  %v717_v36 = vor.u32 %v855_v32, %v716_v31  ;;  %v325_v39 = vperm.slane %v323_v38, 0  ;;  %v559_v43 = vld [vmem:[%s1205_s3] sm:$0x3]  ;;  %v326_v44 = vperm.slane %v323_v38, 1 }
  0x25   : > { %546 = vmatpush.bf16.msra.mxu3 %v809_v11  ;;  %v721_v37 = vor.u32 %v854_v33, %v718_v35  ;;  %v561_v46 = vperm.slane %v559_v43, 0  ;;  %v562_v50 = vperm.slane %v559_v43, 1 }
  0x27   : > { %505 = vmatpush.bf16.msra.mxu0 %v733_v16 }
  0x28   : > { %519 = vmatpush.bf16.msra.mxu1 %v797_v18  ;;  %533 = vmatpush.bf16.msra.mxu2 %v737_v19 }
  0x29   : > { %547 = vmatpush.bf16.msra.mxu3 %v801_v22 }
  0x2b   : > { %506 = vmatpush.bf16.msra.mxu0 %v725_v28 }
  0x2c   : > { %520 = vmatpush.bf16.msra.mxu1 %v789_v29  ;;  %534 = vmatpush.bf16.msra.mxu2 %v729_v30 }
  0x2d   : > { %548 = vmatpush.bf16.msra.mxu3 %v793_v34 }
  0x2e   : > { %507 = vmatmul.bf16.vlgmr.msra.gmra.mxu0 %v717_v36 }
  0x2f   : > { %521 = vmatmul.bf16.vlgmr.msra.gmra.mxu1 %v721_v37  ;;  %535 = vmatmul.bf16.vlgmr.msra.gmra.mxu2 %v717_v36 }
  0x30   : > { %549 = vmatmul.bf16.vlgmr.msra.gmra.mxu3 %v721_v37 }
  0xab   : > { %v508_v40 = vpop.f32.mrf.mxu0 }
  0xac   : > { %v509_v41 = vadd.f32 %v508_v40, %v325_v39  ;;  %v522_v42 = vpop.f32.mrf.mxu1 }
  0xae   : > { %v523_v45 = vadd.f32 %v522_v42, %v509_v41 }
  0xb0   : > { %v565_v52 = vmul.f32 %v561_v46, %v523_v45  ;;  %vm555_vm0 = vcmp.ge.f32.partialorder %v523_v45, 0.0 }
  0xb2   : > { %v536_v47 = vpop.f32.mrf.mxu2  ;;  %v569_v57 = vsel %vm555_vm0, %v523_v45, %v565_v52 }
  0xb3   : > { %v537_v48 = vadd.f32 %v536_v47, %v326_v44  ;;  %v550_v49 = vpop.f32.mrf.mxu3  ;;  %v510_v51 = vpop.f32.mrf.mxu0 }
  0xb4   : > { %v511_v54 = vadd.f32 %v510_v51, %v325_v39  ;;  %v524_v56 = vpop.f32.mrf.mxu1 }
  0xb5   : > { %v551_v53 = vadd.f32 %v550_v49, %v537_v48 }
  0xb6   : > { %v525_v59 = vadd.f32 %v524_v56, %v511_v54 }
  0xb7   : > { %vm556_vm1 = vcmp.ge.f32.partialorder %v551_v53, 0.0  ;;  %v566_v55 = vmul.f32 %v562_v50, %v551_v53 }
  0xb8   : > { %v567_v0 = vmul.f32 %v561_v46, %v525_v59  ;;  %vm557_vm2 = vcmp.ge.f32.partialorder %v525_v59, 0.0 }
  0xb9   : > { %v570_v58 = vsel %vm556_vm1, %v551_v53, %v566_v55 }
  0xba   : > { %v573_v60 = vpack.c.bf16 %v570_v58, %v569_v57  ;;  %v538_v61 = vpop.f32.mrf.mxu2  ;;  %v571_v3 = vsel %vm557_vm2, %v525_v59, %v567_v0 }
  0xbb   : > { %v539_v62 = vadd.f32 %v538_v61, %v326_v44  ;;  %v552_v63 = vpop.f32.mrf.mxu3 }
  0xbc   : > { %575 = vst [vmem:[%s286_s25] sm:$0xff] %v573_v60 }
  0xbd   : > { %v553_v1 = vadd.f32 %v552_v63, %v539_v62 }
  0xbf   : > { %vm558_vm3 = vcmp.ge.f32.partialorder %v553_v1, 0.0  ;;  %v568_v2 = vmul.f32 %v562_v50, %v553_v1 }
  0xc1   : > { %v572_v4 = vsel %vm558_vm3, %v553_v1, %v568_v2 }
  0xc2   : > { %v574_v5 = vpack.c.bf16 %v572_v4, %v571_v3 }
  0xc4   : > { %576 = vst [vmem:[%s286_s25 + $0x8] sm:$0xff] %v574_v5 }
  0xc5 PF: > { %s14_s17 = sadd.s32 1, %s934_s17   ;;  %s1207_s15 = smov %s930_s16 }
  0xc6   : > { %p11_p5 = scmp.ge.s32.totalorder %s14_s17, 4   ;;  %s1208_s16 = smov %s1210_s18 }
  0xc8   :  { %13 = sbr.rel (!%p11_p5) target bundleno = 2 (0x2), region = 75 }

// kernel: _lambda_.23
= control target key start
LH: loop header
LB: loop body
LE: loop exit
PB: predicated region body
PF: predicated region fallthrough
CT: control target
= control target key end

     0   :  { %s623_s15 = smov 0   ;;  %s625_s16 = smov 0   ;;  %s686_s0 = inlined_call_operand.vmem [shape: bf16[32,128], index: 0, kind: input, shape index: {}]   ;;  %s687_s1 = inlined_call_operand.vmem [shape: bf16[128,128], index: 1, kind: input, shape index: {}]   ;;  %s688_s2 = inlined_call_operand.vmem [shape: f32[1,128], index: 2, kind: input, shape index: {}]   ;;  %s689_s3 = inlined_call_operand.vmem [shape: f32[1,128], index: 3, kind: input, shape index: {}]   ;;  %s690_s4 = inlined_call_operand.vmem [shape: bf16[32,128], index: 4, kind: output, shape index: {}]  }
   0x1   :  { %s627_s17 = smov 0  }
   0x2 LB: > { %s26_s18 = sadd.s32 1, %s592_s16  ;;  %p491_p0 = scmp.ge.s32.totalorder %s596_s17, 1  ;;  %s596_s17 = sphi %s627_s17, %s14_s17   ;;  %s592_s16 = sphi %s625_s16, %s692_s16   ;;  %s588_s15 = sphi %s623_s15, %s691_s15  }
   0x3   : > { %p28_p1 = scmp.ge.s32.totalorder %s26_s18, 2  ;;  %p202_p2 = scmp.lt.s32.totalorder %s596_s17, 3 }
   0x5   : > { %s694_s18 = smov (%p28_p1, %s26_s18), 0  ;;  %p203_p3 = pnand %p491_p0, %p202_p2 }
   0x6   : > { %s492_s27 = sshll.u32 (!%p203_p3), %s588_s15, 1 }
   0x7   : > { %206 = sbr.rel (%p203_p3) target bundleno = 186 (0xba), region = 36  ;;  %p242_p4 = scmp.lt.s32.totalorder (!%p203_p3), %s492_s27, 3 }
   0xc   : > { %v542_v0 = vld [vmem:[%s687_s1 + $0x38] sm:$0xff]  ;;  %v541_v1 = vld [vmem:[%s687_s1 + $0x30] sm:$0xff]  ;;  %v540_v2 = vld [vmem:[%s687_s1 + $0x28] sm:$0xff]  ;;  %s696_s27 = smov (!%p242_p4, %s492_s27), 3 }
   0xd   : > { %342 = vmatpush.bf16.msra.mxu0 %v542_v0  ;;  %v539_v3 = vld [vmem:[%s687_s1 + $0x20] sm:$0xff]  ;;  %v538_v4 = vld [vmem:[%s687_s1 + $0x18] sm:$0xff]  ;;  %v537_v5 = vld [vmem:[%s687_s1 + $0x10] sm:$0xff]  ;;  %s493_s8 = sshll.u32 %s696_s27, 2 }
   0xe   : > { %v536_v6 = vld [vmem:[%s687_s1 + $0x8] sm:$0xff]  ;;  %v535_v7 = vld [vmem:[%s687_s1] sm:$0xff]  ;;  %s245_s13 = scalar_lea.vmem %s686_s0, %s493_s8  ;;  %s264_s23 = scalar_lea.vmem %s690_s4, %s493_s8 }
   0xf   : > { %v534_v8 = vld [vmem:[%s245_s13] sm:$0xff] }
  0x10   : > { %v572_v10 = vld [vmem:[%s688_s2] ss:$0 sm:$0xff] }
  0x11   : > { %343 = vmatpush.bf16.msra.mxu0 %v541_v1  ;;  %v573_v12 = vld [vmem:[%s689_s3] ss:$0 sm:$0xff] }
  0x15   : > { %344 = vmatpush.bf16.msra.mxu0 %v540_v2 }
  0x19   : > { %345 = vmatpush.bf16.msra.mxu0 %v539_v3 }
  0x1d   : > { %346 = vmatpush.bf16.msra.mxu0 %v538_v4 }
  0x21   : > { %347 = vmatpush.bf16.msra.mxu0 %v537_v5 }
  0x25   : > { %348 = vmatpush.bf16.msra.mxu0 %v536_v6 }
  0x29   : > { %349 = vmatpush.bf16.msra.mxu0 %v535_v7 }
  0x2c   : > { %350 = vmatmul.bf16.vlgmr.msra.gmra.mxu0 %v534_v8 }
  0xa9   : > { %v351_v9 = vpop.f32.mrf.mxu0 }
  0xaa   : > { %v352_v11 = vadd.f32 %v572_v10, %v351_v9 }
  0xac   : > { %v362_v14 = vmul.f32 %v573_v12, %v352_v11  ;;  %vm356_vm0 = vcmp.ge.f32.partialorder %v352_v11, 0.0 }
  0xae   : > { %v364_v17 = vsel %vm356_vm0, %v352_v11, %v362_v14 }
  0xb1   : > { %v353_v13 = vpop.f32.mrf.mxu0 }
  0xb2   : > { %v354_v15 = vadd.f32 %v572_v10, %v353_v13 }
  0xb4   : > { %vm357_vm1 = vcmp.ge.f32.partialorder %v354_v15, 0.0  ;;  %v363_v16 = vmul.f32 %v573_v12, %v354_v15 }
  0xb6   : > { %v365_v18 = vsel %vm357_vm1, %v354_v15, %v363_v16 }
  0xb7   : > { %v546_v19 = vpack.c.bf16 %v365_v18, %v364_v17 }
  0xb9   : > { %547 = vst [vmem:[%s264_s23] sm:$0xff] %v546_v19  }
  0xba PF: > { %s14_s17 = sadd.s32 1, %s596_s17   ;;  %s691_s15 = smov %s592_s16 }
  0xbb   : > { %p11_p5 = scmp.ge.s32.totalorder %s14_s17, 4   ;;  %s692_s16 = smov %s694_s18 }
  0xbd   :  { %13 = sbr.rel (!%p11_p5) target bundleno = 2 (0x2), region = 75 }

// kernel: _lambda_.24
= control target key start
LH: loop header
LB: loop body
LE: loop exit
PB: predicated region body
PF: predicated region fallthrough
CT: control target
= control target key end

     0   :  { %s915_s15 = smov 0   ;;  %s917_s16 = smov 0   ;;  %s1033_s0 = inlined_call_operand.vmem [shape: bf16[128,256], index: 0, kind: input, shape index: {}]   ;;  %s1034_s1 = inlined_call_operand.vmem [shape: bf16[256,128], index: 1, kind: input, shape index: {}]   ;;  %s1035_s2 = inlined_call_operand.vmem [shape: f32[1,128], index: 2, kind: input, shape index: {}]   ;;  %s1036_s3 = inlined_call_operand.vmem [shape: f32[1,128], index: 3, kind: input, shape index: {}]   ;;  %s1037_s4 = inlined_call_operand.vmem [shape: bf16[128,128], index: 4, kind: output, shape index: {}]  }
   0x1   :  { %s919_s17 = smov 0  }
   0x2 LB: > { %s26_s18 = sadd.s32 1, %s884_s16  ;;  %p672_p0 = scmp.ge.s32.totalorder %s888_s17, 1  ;;  %s888_s17 = sphi %s919_s17, %s14_s17   ;;  %s884_s16 = sphi %s917_s16, %s1039_s16   ;;  %s880_s15 = sphi %s915_s15, %s1038_s15  }
   0x3   : > { %p28_p1 = scmp.ge.s32.totalorder %s26_s18, 2  ;;  %p203_p2 = scmp.lt.s32.totalorder %s888_s17, 3 }
   0x5   : > { %s1041_s18 = smov (%p28_p1, %s26_s18), 0  ;;  %p204_p3 = pnand %p672_p0, %p203_p2 }
   0x6   : > { %s673_s5 = sshll.u32 (!%p204_p3), %s880_s15, 3 }
   0x7   : > { %207 = sbr.rel (%p204_p3) target bundleno = 210 (0xd2), region = 36  ;;  %p244_p4 = scmp.lt.s32.totalorder (!%p204_p3), %s673_s5, 15 }
   0xc   : > { %v792_v0 = vld [vmem:[%s1034_s1 + $0x38] sm:$0xff]  ;;  %v791_v2 = vld [vmem:[%s1034_s1 + $0x30] sm:$0xff]  ;;  %v790_v4 = vld [vmem:[%s1034_s1 + $0x28] sm:$0xff]  ;;  %s1043_s5 = smov (!%p244_p4, %s673_s5), 15 }
   0xd   : > { %v800_v1 = vld [vmem:[%s1034_s1 + $0x78] sm:$0xff]  ;;  %449 = vmatpush.bf16.msra.mxu0 %v792_v0  ;;  %824 = vmatpush.bf16.msra.mxu2 %v792_v0  ;;  %v799_v3 = vld [vmem:[%s1034_s1 + $0x70] sm:$0xff]  ;;  %v798_v5 = vld [vmem:[%s1034_s1 + $0x68] sm:$0xff]  ;;  %s776_s21 = sshll.u32 %s1043_s5, 3  ;;  %s677_s12 = sshll.u32 %s1043_s5, 2 }
   0xe   : > { %478 = vmatpush.bf16.msra.mxu1 %v800_v1  ;;  %832 = vmatpush.bf16.msra.mxu3 %v800_v1  ;;  %v789_v6 = vld [vmem:[%s1034_s1 + $0x20] sm:$0xff]  ;;  %v788_v8 = vld [vmem:[%s1034_s1 + $0x18] sm:$0xff]  ;;  %v787_v10 = vld [vmem:[%s1034_s1 + $0x10] sm:$0xff]  ;;  %s981_s26 = scalar_lea.vmem %s1033_s0, %s776_s21  ;;  %s1018_s15 = scalar_lea.vmem %s1037_s4, %s677_s12 }
   0xf   : > { %v797_v7 = vld [vmem:[%s1034_s1 + $0x60] sm:$0xff]  ;;  %v796_v9 = vld [vmem:[%s1034_s1 + $0x58] sm:$0xff]  ;;  %v795_v11 = vld [vmem:[%s1034_s1 + $0x50] sm:$0xff] }
  0x10   : > { %v786_v12 = vld [vmem:[%s1034_s1 + $0x8] sm:$0xff]  ;;  %v785_v14 = vld [vmem:[%s1034_s1] sm:$0xff]  ;;  %v688_v28 = vld [vmem:[%s981_s26 + $0x10] sm:$0xf] }
  0x11   : > { %450 = vmatpush.bf16.msra.mxu0 %v791_v2  ;;  %825 = vmatpush.bf16.msra.mxu2 %v791_v2  ;;  %v794_v13 = vld [vmem:[%s1034_s1 + $0x48] sm:$0xff]  ;;  %v793_v15 = vld [vmem:[%s1034_s1 + $0x40] sm:$0xff]  ;;  %v780_v29 = vld [vmem:[%s981_s26 + $0x14] sm:$0xf0] }
  0x12   : > { %479 = vmatpush.bf16.msra.mxu1 %v799_v3  ;;  %833 = vmatpush.bf16.msra.mxu3 %v799_v3  ;;  %v680_v16 = vld [vmem:[%s981_s26] sm:$0xf]  ;;  %v778_v17 = vld [vmem:[%s981_s26 + $0x4] sm:$0xf0]  ;;  %v777_v20 = vld [vmem:[%s981_s26 + $0x4] sm:$0xf]  ;;  %v689_v36 = vor.u32 %v780_v29, %v688_v28 }
  0x13   : > { %v696_v18 = vld [vmem:[%s981_s26 + $0x20] sm:$0xf]  ;;  %v782_v19 = vld [vmem:[%s981_s26 + $0x24] sm:$0xf0]  ;;  %v682_v21 = vld [vmem:[%s981_s26 + $0x8] sm:$0xf0]  ;;  %v681_v24 = vor.u32 %v778_v17, %v680_v16 }
  0x14   : > { %v781_v22 = vld [vmem:[%s981_s26 + $0x24] sm:$0xf]  ;;  %v698_v23 = vld [vmem:[%s981_s26 + $0x28] sm:$0xf0]  ;;  %v697_v25 = vor.u32 %v782_v19, %v696_v18  ;;  %v685_v26 = vor.u32 %v777_v20, %v682_v21  ;;  %v704_v30 = vld [vmem:[%s981_s26 + $0x30] sm:$0xf] }
  0x15   : > { %451 = vmatpush.bf16.msra.mxu0 %v790_v4  ;;  %826 = vmatpush.bf16.msra.mxu2 %v790_v4  ;;  %v701_v27 = vor.u32 %v781_v22, %v698_v23  ;;  %v784_v31 = vld [vmem:[%s981_s26 + $0x34] sm:$0xf0]  ;;  %v779_v32 = vld [vmem:[%s981_s26 + $0x14] sm:$0xf]  ;;  %v690_v33 = vld [vmem:[%s981_s26 + $0x18] sm:$0xf0] }
  0x16   : > { %480 = vmatpush.bf16.msra.mxu1 %v798_v5  ;;  %834 = vmatpush.bf16.msra.mxu3 %v798_v5  ;;  %v783_v34 = vld [vmem:[%s981_s26 + $0x34] sm:$0xf]  ;;  %v706_v35 = vld [vmem:[%s981_s26 + $0x38] sm:$0xf0]  ;;  %v705_v37 = vor.u32 %v784_v31, %v704_v30  ;;  %v693_v38 = vor.u32 %v779_v32, %v690_v33  ;;  %v864_v40 = vld [vmem:[%s1035_s2] ss:$0 sm:$0xff] }
  0x17   : > { %v709_v39 = vor.u32 %v783_v34, %v706_v35  ;;  %v865_v46 = vld [vmem:[%s1036_s3] ss:$0 sm:$0xff] }
  0x19   : > { %452 = vmatpush.bf16.msra.mxu0 %v789_v6  ;;  %827 = vmatpush.bf16.msra.mxu2 %v789_v6 }
  0x1a   : > { %481 = vmatpush.bf16.msra.mxu1 %v797_v7  ;;  %835 = vmatpush.bf16.msra.mxu3 %v797_v7 }
  0x1d   : > { %453 = vmatpush.bf16.msra.mxu0 %v788_v8  ;;  %828 = vmatpush.bf16.msra.mxu2 %v788_v8 }
  0x1e   : > { %482 = vmatpush.bf16.msra.mxu1 %v796_v9  ;;  %836 = vmatpush.bf16.msra.mxu3 %v796_v9 }
  0x21   : > { %454 = vmatpush.bf16.msra.mxu0 %v787_v10  ;;  %829 = vmatpush.bf16.msra.mxu2 %v787_v10 }
  0x22   : > { %483 = vmatpush.bf16.msra.mxu1 %v795_v11  ;;  %837 = vmatpush.bf16.msra.mxu3 %v795_v11 }
  0x25   : > { %455 = vmatpush.bf16.msra.mxu0 %v786_v12  ;;  %830 = vmatpush.bf16.msra.mxu2 %v786_v12 }
  0x26   : > { %484 = vmatpush.bf16.msra.mxu1 %v794_v13  ;;  %838 = vmatpush.bf16.msra.mxu3 %v794_v13 }
  0x29   : > { %456 = vmatpush.bf16.msra.mxu0 %v785_v14  ;;  %831 = vmatpush.bf16.msra.mxu2 %v785_v14 }
  0x2a   : > { %485 = vmatpush.bf16.msra.mxu1 %v793_v15  ;;  %839 = vmatpush.bf16.msra.mxu3 %v793_v15 }
  0x2c   : > { %457 = vmatmul.bf16.vlgmr.msra.gmra.mxu0 %v681_v24  ;;  %467 = vmatmul.bf16.vlgmr.msra.gmra.mxu2 %v697_v25 }
  0x2d   : > { %486 = vmatmul.bf16.vlgmr.msra.gmra.mxu1 %v685_v26  ;;  %496 = vmatmul.bf16.vlgmr.msra.gmra.mxu3 %v701_v27 }
  0x3c   : > { %462 = vmatmul.bf16.gmra.mxu0 %v689_v36  ;;  %472 = vmatmul.bf16.gmra.mxu2 %v705_v37 }
  0x3d   : > { %491 = vmatmul.bf16.gmra.mxu1 %v693_v38  ;;  %501 = vmatmul.bf16.gmra.mxu3 %v709_v39 }
  0xa9   : > { %v458_v41 = vpop.f32.mrf.mxu0 }
  0xaa   : > { %v487_v42 = vpop.f32.mrf.mxu1  ;;  %v459_v43 = vadd.f32 %v864_v40, %v458_v41 }
  0xac   : > { %v488_v45 = vadd.f32 %v487_v42, %v459_v43 }
  0xae   : > { %v519_v52 = vmul.f32 %v865_v46, %v488_v45  ;;  %vm507_vm0 = vcmp.ge.f32.partialorder %v488_v45, 0.0 }
  0xaf   : > { %v468_v44 = vpop.f32.mrf.mxu2 }
  0xb0   : > { %v497_v47 = vpop.f32.mrf.mxu3  ;;  %v469_v49 = vadd.f32 %v864_v40, %v468_v44  ;;  %v527_v57 = vsel %vm507_vm0, %v488_v45, %v519_v52 }
  0xb1   : > { %v460_v48 = vpop.f32.mrf.mxu0 }
  0xb2   : > { %v461_v50 = vadd.f32 %v864_v40, %v460_v48  ;;  %v489_v51 = vpop.f32.mrf.mxu1  ;;  %v498_v54 = vadd.f32 %v497_v47, %v469_v49 }
  0xb4   : > { %v490_v53 = vadd.f32 %v489_v51, %v461_v50  ;;  %v523_v63 = vmul.f32 %v865_v46, %v498_v54  ;;  %vm511_vm2 = vcmp.ge.f32.partialorder %v498_v54, 0.0 }
  0xb6   : > { %vm508_vm1 = vcmp.ge.f32.partialorder %v490_v53, 0.0  ;;  %v520_v55 = vmul.f32 %v865_v46, %v490_v53  ;;  %v531_v4 = vsel %vm511_vm2, %v498_v54, %v523_v63 }
  0xb7   : > { %v470_v56 = vpop.f32.mrf.mxu2 }
  0xb8   : > { %v528_v58 = vsel %vm508_vm1, %v490_v53, %v520_v55  ;;  %v471_v59 = vadd.f32 %v864_v40, %v470_v56  ;;  %v499_v60 = vpop.f32.mrf.mxu3 }
  0xb9   : > { %v804_v61 = vpack.c.bf16 %v528_v58, %v527_v57  ;;  %v463_v62 = vpop.f32.mrf.mxu0 }
  0xba   : > { %v500_v0 = vadd.f32 %v499_v60, %v471_v59  ;;  %v492_v1 = vpop.f32.mrf.mxu1  ;;  %v464_v3 = vadd.f32 %v864_v40, %v463_v62 }
  0xbb   : > { %805 = vst [vmem:[%s1018_s15] sm:$0xff] %v804_v61  }
  0xbc   : > { %vm512_vm3 = vcmp.ge.f32.partialorder %v500_v0, 0.0  ;;  %v524_v2 = vmul.f32 %v865_v46, %v500_v0  ;;  %v493_v8 = vadd.f32 %v492_v1, %v464_v3 }
  0xbe   : > { %v532_v5 = vsel %vm512_vm3, %v500_v0, %v524_v2  ;;  %v521_v14 = vmul.f32 %v865_v46, %v493_v8  ;;  %vm509_vm4 = vcmp.ge.f32.partialorder %v493_v8, 0.0 }
  0xbf   : > { %v814_v6 = vpack.c.bf16 %v532_v5, %v531_v4  ;;  %v473_v7 = vpop.f32.mrf.mxu2 }
  0xc0   : > { %v502_v9 = vpop.f32.mrf.mxu3  ;;  %v474_v11 = vadd.f32 %v864_v40, %v473_v7  ;;  %v529_v19 = vsel %vm509_vm4, %v493_v8, %v521_v14 }
  0xc1   : > { %822 = vst [vmem:[%s1018_s15 + $0x10] sm:$0xff] %v814_v6   ;;  %v465_v10 = vpop.f32.mrf.mxu0 }
  0xc2   : > { %v466_v12 = vadd.f32 %v864_v40, %v465_v10  ;;  %v494_v13 = vpop.f32.mrf.mxu1  ;;  %v503_v16 = vadd.f32 %v502_v9, %v474_v11 }
  0xc4   : > { %v495_v15 = vadd.f32 %v494_v13, %v466_v12  ;;  %v525_v24 = vmul.f32 %v865_v46, %v503_v16  ;;  %vm513_vm6 = vcmp.ge.f32.partialorder %v503_v16, 0.0 }
  0xc6   : > { %vm510_vm5 = vcmp.ge.f32.partialorder %v495_v15, 0.0  ;;  %v522_v17 = vmul.f32 %v865_v46, %v495_v15  ;;  %v533_v27 = vsel %vm513_vm6, %v503_v16, %v525_v24 }
  0xc7   : > { %v475_v18 = vpop.f32.mrf.mxu2 }
  0xc8   : > { %v530_v20 = vsel %vm510_vm5, %v495_v15, %v522_v17  ;;  %v476_v21 = vadd.f32 %v864_v40, %v475_v18  ;;  %v504_v23 = vpop.f32.mrf.mxu3 }
  0xc9   : > { %v809_v22 = vpack.c.bf16 %v530_v20, %v529_v19 }
  0xca   : > { %v505_v25 = vadd.f32 %v504_v23, %v476_v21 }
  0xcb   : > { %821 = vst [vmem:[%s1018_s15 + $0x8] sm:$0xff] %v809_v22  }
  0xcc   : > { %vm514_vm7 = vcmp.ge.f32.partialorder %v505_v25, 0.0  ;;  %v526_v26 = vmul.f32 %v865_v46, %v505_v25 }
  0xce   : > { %v534_v28 = vsel %vm514_vm7, %v505_v25, %v526_v26 }
  0xcf   : > { %v819_v29 = vpack.c.bf16 %v534_v28, %v533_v27 }
  0xd1   : > { %823 = vst [vmem:[%s1018_s15 + $0x18] sm:$0xff] %v819_v29  }
  0xd2 PF: > { %s14_s17 = sadd.s32 1, %s888_s17   ;;  %s1038_s15 = smov %s884_s16 }
  0xd3   : > { %p11_p5 = scmp.ge.s32.totalorder %s14_s17, 4   ;;  %s1039_s16 = smov %s1041_s18 }
  0xd5   :  { %13 = sbr.rel (!%p11_p5) target bundleno = 2 (0x2), region = 75 }

// kernel: _lambda_.27
= control target key start
LH: loop header
LB: loop body
LE: loop exit
PB: predicated region body
PF: predicated region fallthrough
CT: control target
= control target key end

     0   :  { %s1157_s15 = smov 0   ;;  %s1159_s16 = smov 0   ;;  %s1334_s0 = inlined_call_operand.vmem [shape: bf16[512,128], index: 0, kind: input, shape index: {}]   ;;  %s1335_s1 = inlined_call_operand.vmem [shape: bf16[128,128], index: 1, kind: input, shape index: {}]   ;;  %s1336_s2 = inlined_call_operand.vmem [shape: f32[1,128], index: 2, kind: input, shape index: {}]   ;;  %s1337_s3 = inlined_call_operand.vmem [shape: f32[1,128], index: 3, kind: input, shape index: {}]   ;;  %s1338_s4 = inlined_call_operand.vmem [shape: bf16[512,128], index: 4, kind: output, shape index: {}]  }
   0x1   :  { %s1161_s17 = smov 0  }
   0x2 LB: > { %s26_s18 = sadd.s32 1, %s1126_s16  ;;  %p836_p0 = scmp.ge.s32.totalorder %s1130_s17, 1  ;;  %s1130_s17 = sphi %s1161_s17, %s14_s17   ;;  %s1126_s16 = sphi %s1159_s16, %s1340_s16   ;;  %s1122_s15 = sphi %s1157_s15, %s1339_s15  }
   0x3   : > { %p28_p1 = scmp.ge.s32.totalorder %s26_s18, 2  ;;  %p202_p2 = scmp.lt.s32.totalorder %s1130_s17, 3 }
   0x5   : > { %s1342_s18 = smov (%p28_p1, %s26_s18), 0  ;;  %p203_p3 = pnand %p836_p0, %p202_p2 }
   0x6   : > { %s837_s27 = sshll.u32 (!%p203_p3), %s1122_s15, 5 }
   0x7   : > { %206 = sbr.rel (%p203_p3) target bundleno = 242 (0xf2), region = 36  ;;  %p242_p4 = scmp.lt.s32.totalorder (!%p203_p3), %s837_s27, 63 }
   0xc   : > { %v962_v0 = vld [vmem:[%s1335_s1 + $0x38] sm:$0xff]  ;;  %v961_v1 = vld [vmem:[%s1335_s1 + $0x30] sm:$0xff]  ;;  %v960_v2 = vld [vmem:[%s1335_s1 + $0x28] sm:$0xff]  ;;  %s1344_s27 = smov (!%p242_p4, %s837_s27), 63 }
   0xd   : > { %462 = vmatpush.bf16.msra.mxu0 %v962_v0  ;;  %1058 = vmatpush.bf16.msra.mxu1 %v962_v0  ;;  %v959_v3 = vld [vmem:[%s1335_s1 + $0x20] sm:$0xff]  ;;  %v958_v4 = vld [vmem:[%s1335_s1 + $0x18] sm:$0xff]  ;;  %v957_v5 = vld [vmem:[%s1335_s1 + $0x10] sm:$0xff]  ;;  %s838_s8 = sshll.u32 %s1344_s27, 2 }
   0xe   : > { %1059 = vmatpush.bf16.msra.mxu2 %v962_v0  ;;  %1060 = vmatpush.bf16.msra.mxu3 %v962_v0  ;;  %v956_v6 = vld [vmem:[%s1335_s1 + $0x8] sm:$0xff]  ;;  %v955_v7 = vld [vmem:[%s1335_s1] sm:$0xff]  ;;  %s1210_s13 = scalar_lea.vmem %s1334_s0, %s838_s8  ;;  %s1253_s23 = scalar_lea.vmem %s1338_s4, %s838_s8 }
   0xf   : > { %v939_v8 = vld [vmem:[%s1210_s13] sm:$0xff]  ;;  %v940_v12 = vld [vmem:[%s1210_s13 + $0x8] sm:$0xff]  ;;  %v941_v16 = vld [vmem:[%s1210_s13 + $0x10] sm:$0xff] }
  0x10   : > { %v943_v9 = vld [vmem:[%s1210_s13 + $0x20] sm:$0xff]  ;;  %v944_v13 = vld [vmem:[%s1210_s13 + $0x28] sm:$0xff]  ;;  %v945_v17 = vld [vmem:[%s1210_s13 + $0x30] sm:$0xff] }
  0x11   : > { %463 = vmatpush.bf16.msra.mxu0 %v961_v1  ;;  %1061 = vmatpush.bf16.msra.mxu1 %v961_v1  ;;  %v947_v10 = vld [vmem:[%s1210_s13 + $0x40] sm:$0xff]  ;;  %v948_v14 = vld [vmem:[%s1210_s13 + $0x48] sm:$0xff]  ;;  %v949_v18 = vld [vmem:[%s1210_s13 + $0x50] sm:$0xff] }
  0x12   : > { %1062 = vmatpush.bf16.msra.mxu2 %v961_v1  ;;  %1063 = vmatpush.bf16.msra.mxu3 %v961_v1  ;;  %v951_v11 = vld [vmem:[%s1210_s13 + $0x60] sm:$0xff]  ;;  %v952_v15 = vld [vmem:[%s1210_s13 + $0x68] sm:$0xff]  ;;  %v953_v19 = vld [vmem:[%s1210_s13 + $0x70] sm:$0xff] }
  0x13   : > { %v942_v20 = vld [vmem:[%s1210_s13 + $0x18] sm:$0xff]  ;;  %v1231_v26 = vld [vmem:[%s1336_s2] ss:$0 sm:$0xff] }
  0x14   : > { %v946_v21 = vld [vmem:[%s1210_s13 + $0x38] sm:$0xff]  ;;  %v1237_v28 = vld [vmem:[%s1337_s3] ss:$0 sm:$0xff] }
  0x15   : > { %464 = vmatpush.bf16.msra.mxu0 %v960_v2  ;;  %1064 = vmatpush.bf16.msra.mxu1 %v960_v2  ;;  %v950_v22 = vld [vmem:[%s1210_s13 + $0x58] sm:$0xff] }
  0x16   : > { %1065 = vmatpush.bf16.msra.mxu2 %v960_v2  ;;  %1066 = vmatpush.bf16.msra.mxu3 %v960_v2  ;;  %v954_v23 = vld [vmem:[%s1210_s13 + $0x78] sm:$0xff] }
  0x19   : > { %465 = vmatpush.bf16.msra.mxu0 %v959_v3  ;;  %1067 = vmatpush.bf16.msra.mxu1 %v959_v3 }
  0x1a   : > { %1068 = vmatpush.bf16.msra.mxu2 %v959_v3  ;;  %1069 = vmatpush.bf16.msra.mxu3 %v959_v3 }
  0x1d   : > { %466 = vmatpush.bf16.msra.mxu0 %v958_v4  ;;  %1070 = vmatpush.bf16.msra.mxu1 %v958_v4 }
  0x1e   : > { %1071 = vmatpush.bf16.msra.mxu2 %v958_v4  ;;  %1072 = vmatpush.bf16.msra.mxu3 %v958_v4 }
  0x21   : > { %467 = vmatpush.bf16.msra.mxu0 %v957_v5  ;;  %1073 = vmatpush.bf16.msra.mxu1 %v957_v5 }
  0x22   : > { %1074 = vmatpush.bf16.msra.mxu2 %v957_v5  ;;  %1075 = vmatpush.bf16.msra.mxu3 %v957_v5 }
  0x25   : > { %468 = vmatpush.bf16.msra.mxu0 %v956_v6  ;;  %1076 = vmatpush.bf16.msra.mxu1 %v956_v6 }
  0x26   : > { %1077 = vmatpush.bf16.msra.mxu2 %v956_v6  ;;  %1078 = vmatpush.bf16.msra.mxu3 %v956_v6 }
  0x29   : > { %469 = vmatpush.bf16.msra.mxu0 %v955_v7  ;;  %1079 = vmatpush.bf16.msra.mxu1 %v955_v7 }
  0x2a   : > { %1080 = vmatpush.bf16.msra.mxu2 %v955_v7  ;;  %1081 = vmatpush.bf16.msra.mxu3 %v955_v7 }
  0x2c   : > { %470 = vmatmul.bf16.vlgmr.msra.gmra.mxu0 %v939_v8  ;;  %490 = vmatmul.bf16.vlgmr.msra.gmra.mxu1 %v943_v9 }
  0x2d   : > { %510 = vmatmul.bf16.vlgmr.msra.gmra.mxu2 %v947_v10  ;;  %530 = vmatmul.bf16.vlgmr.msra.gmra.mxu3 %v951_v11 }
  0x3c   : > { %475 = vmatmul.bf16.gmra.mxu0 %v940_v12  ;;  %495 = vmatmul.bf16.gmra.mxu1 %v944_v13 }
  0x3d   : > { %515 = vmatmul.bf16.gmra.mxu2 %v948_v14  ;;  %535 = vmatmul.bf16.gmra.mxu3 %v952_v15 }
  0x4c   : > { %480 = vmatmul.bf16.gmra.mxu0 %v941_v16  ;;  %500 = vmatmul.bf16.gmra.mxu1 %v945_v17 }
  0x4d   : > { %520 = vmatmul.bf16.gmra.mxu2 %v949_v18  ;;  %540 = vmatmul.bf16.gmra.mxu3 %v953_v19 }
  0x5c   : > { %485 = vmatmul.bf16.gmra.mxu0 %v942_v20  ;;  %505 = vmatmul.bf16.gmra.mxu1 %v946_v21 }
  0x5d   : > { %525 = vmatmul.bf16.gmra.mxu2 %v950_v22  ;;  %545 = vmatmul.bf16.gmra.mxu3 %v954_v23 }
  0xa9   : > { %v471_v24 = vpop.f32.mrf.mxu0  ;;  %v491_v25 = vpop.f32.mrf.mxu1 }
  0xaa   : > { %v472_v27 = vadd.f32 %v1231_v26, %v471_v24  ;;  %v492_v29 = vadd.f32 %v1231_v26, %v491_v25 }
  0xac   : > { %v587_v34 = vmul.f32 %v1237_v28, %v472_v27  ;;  %v595_v35 = vmul.f32 %v1237_v28, %v492_v29  ;;  %vm551_vm0 = vcmp.ge.f32.partialorder %v472_v27, 0.0  ;;  %vm559_vm1 = vcmp.ge.f32.partialorder %v492_v29, 0.0 }
  0xae   : > { %v619_v42 = vsel %vm551_vm0, %v472_v27, %v587_v34  ;;  %v627_v43 = vsel %vm559_vm1, %v492_v29, %v595_v35 }
  0xb0   : > { %v511_v30 = vpop.f32.mrf.mxu2  ;;  %v531_v31 = vpop.f32.mrf.mxu3 }
  0xb1   : > { %v473_v32 = vpop.f32.mrf.mxu0  ;;  %v493_v33 = vpop.f32.mrf.mxu1  ;;  %v512_v40 = vadd.f32 %v1231_v26, %v511_v30  ;;  %v532_v41 = vadd.f32 %v1231_v26, %v531_v31 }
  0xb2   : > { %v474_v36 = vadd.f32 %v1231_v26, %v473_v32  ;;  %v494_v37 = vadd.f32 %v1231_v26, %v493_v33 }
  0xb3   : > { %v603_v50 = vmul.f32 %v1237_v28, %v512_v40  ;;  %v611_v51 = vmul.f32 %v1237_v28, %v532_v41  ;;  %vm567_vm4 = vcmp.ge.f32.partialorder %v512_v40, 0.0  ;;  %vm575_vm5 = vcmp.ge.f32.partialorder %v532_v41, 0.0 }
  0xb4   : > { %vm552_vm2 = vcmp.ge.f32.partialorder %v474_v36, 0.0  ;;  %v588_v38 = vmul.f32 %v1237_v28, %v474_v36  ;;  %vm560_vm3 = vcmp.ge.f32.partialorder %v494_v37, 0.0  ;;  %v596_v39 = vmul.f32 %v1237_v28, %v494_v37 }
  0xb5   : > { %v635_v58 = vsel %vm567_vm4, %v512_v40, %v603_v50  ;;  %v643_v59 = vsel %vm575_vm5, %v532_v41, %v611_v51 }
  0xb6   : > { %v620_v44 = vsel %vm552_vm2, %v474_v36, %v588_v38  ;;  %v628_v45 = vsel %vm560_vm3, %v494_v37, %v596_v39 }
  0xb7   : > { %v966_v46 = vpack.c.bf16 %v620_v44, %v619_v42  ;;  %v986_v47 = vpack.c.bf16 %v628_v45, %v627_v43 }
  0xb8   : > { %v513_v48 = vpop.f32.mrf.mxu2  ;;  %v533_v49 = vpop.f32.mrf.mxu3 }
  0xb9   : > { %967 = vst [vmem:[%s1253_s23] sm:$0xff] %v966_v46   ;;  %v514_v52 = vadd.f32 %v1231_v26, %v513_v48  ;;  %v534_v53 = vadd.f32 %v1231_v26, %v533_v49  ;;  %v476_v54 = vpop.f32.mrf.mxu0  ;;  %v496_v55 = vpop.f32.mrf.mxu1 }
  0xba   : > { %1046 = vst [vmem:[%s1253_s23 + $0x20] sm:$0xff] %v986_v47   ;;  %v477_v0 = vadd.f32 %v1231_v26, %v476_v54  ;;  %v497_v1 = vadd.f32 %v1231_v26, %v496_v55 }
  0xbb   : > { %vm568_vm6 = vcmp.ge.f32.partialorder %v514_v52, 0.0  ;;  %v604_v56 = vmul.f32 %v1237_v28, %v514_v52  ;;  %vm576_vm7 = vcmp.ge.f32.partialorder %v534_v53, 0.0  ;;  %v612_v57 = vmul.f32 %v1237_v28, %v534_v53 }
  0xbc   : > { %v589_v6 = vmul.f32 %v1237_v28, %v477_v0  ;;  %v597_v7 = vmul.f32 %v1237_v28, %v497_v1  ;;  %vm553_vm8 = vcmp.ge.f32.partialorder %v477_v0, 0.0  ;;  %vm561_vm9 = vcmp.ge.f32.partialorder %v497_v1, 0.0 }
  0xbd   : > { %v636_v60 = vsel %vm568_vm6, %v514_v52, %v604_v56  ;;  %v644_v61 = vsel %vm576_vm7, %v534_v53, %v612_v57 }
  0xbe   : > { %v1006_v62 = vpack.c.bf16 %v636_v60, %v635_v58  ;;  %v1026_v63 = vpack.c.bf16 %v644_v61, %v643_v59  ;;  %v621_v14 = vsel %vm553_vm8, %v477_v0, %v589_v6  ;;  %v629_v15 = vsel %vm561_vm9, %v497_v1, %v597_v7 }
  0xc0   : > { %1050 = vst [vmem:[%s1253_s23 + $0x40] sm:$0xff] %v1006_v62   ;;  %v516_v2 = vpop.f32.mrf.mxu2  ;;  %v536_v3 = vpop.f32.mrf.mxu3 }
  0xc1   : > { %1054 = vst [vmem:[%s1253_s23 + $0x60] sm:$0xff] %v1026_v63   ;;  %v478_v4 = vpop.f32.mrf.mxu0  ;;  %v498_v5 = vpop.f32.mrf.mxu1  ;;  %v517_v12 = vadd.f32 %v1231_v26, %v516_v2  ;;  %v537_v13 = vadd.f32 %v1231_v26, %v536_v3 }
  0xc2   : > { %v479_v8 = vadd.f32 %v1231_v26, %v478_v4  ;;  %v499_v9 = vadd.f32 %v1231_v26, %v498_v5 }
  0xc3   : > { %v605_v22 = vmul.f32 %v1237_v28, %v517_v12  ;;  %v613_v23 = vmul.f32 %v1237_v28, %v537_v13  ;;  %vm569_vm12 = vcmp.ge.f32.partialorder %v517_v12, 0.0  ;;  %vm577_vm13 = vcmp.ge.f32.partialorder %v537_v13, 0.0 }
  0xc4   : > { %vm554_vm10 = vcmp.ge.f32.partialorder %v479_v8, 0.0  ;;  %v590_v10 = vmul.f32 %v1237_v28, %v479_v8  ;;  %vm562_vm11 = vcmp.ge.f32.partialorder %v499_v9, 0.0  ;;  %v598_v11 = vmul.f32 %v1237_v28, %v499_v9 }
  0xc5   : > { %v637_v32 = vsel %vm569_vm12, %v517_v12, %v605_v22  ;;  %v645_v33 = vsel %vm577_vm13, %v537_v13, %v613_v23 }
  0xc6   : > { %v622_v16 = vsel %vm554_vm10, %v479_v8, %v590_v10  ;;  %v630_v17 = vsel %vm562_vm11, %v499_v9, %v598_v11 }
  0xc7   : > { %v971_v18 = vpack.c.bf16 %v622_v16, %v621_v14  ;;  %v991_v19 = vpack.c.bf16 %v630_v17, %v629_v15 }
  0xc8   : > { %v518_v20 = vpop.f32.mrf.mxu2  ;;  %v538_v21 = vpop.f32.mrf.mxu3 }
  0xc9   : > { %1043 = vst [vmem:[%s1253_s23 + $0x8] sm:$0xff] %v971_v18   ;;  %v519_v24 = vadd.f32 %v1231_v26, %v518_v20  ;;  %v539_v25 = vadd.f32 %v1231_v26, %v538_v21  ;;  %v481_v27 = vpop.f32.mrf.mxu0  ;;  %v501_v29 = vpop.f32.mrf.mxu1 }
  0xca   : > { %1047 = vst [vmem:[%s1253_s23 + $0x28] sm:$0xff] %v991_v19   ;;  %v482_v38 = vadd.f32 %v1231_v26, %v481_v27  ;;  %v502_v39 = vadd.f32 %v1231_v26, %v501_v29 }
  0xcb   : > { %vm570_vm14 = vcmp.ge.f32.partialorder %v519_v24, 0.0  ;;  %v606_v30 = vmul.f32 %v1237_v28, %v519_v24  ;;  %vm578_vm15 = vcmp.ge.f32.partialorder %v539_v25, 0.0  ;;  %v614_v31 = vmul.f32 %v1237_v28, %v539_v25 }
  0xcc   : > { %v591_v44 = vmul.f32 %v1237_v28, %v482_v38  ;;  %v599_v45 = vmul.f32 %v1237_v28, %v502_v39  ;;  %vm555_vm0 = vcmp.ge.f32.partialorder %v482_v38, 0.0  ;;  %vm563_vm1 = vcmp.ge.f32.partialorder %v502_v39, 0.0 }
  0xcd   : > { %v638_v34 = vsel %vm570_vm14, %v519_v24, %v606_v30  ;;  %v646_v35 = vsel %vm578_vm15, %v539_v25, %v614_v31 }
  0xce   : > { %v1011_v36 = vpack.c.bf16 %v638_v34, %v637_v32  ;;  %v1031_v37 = vpack.c.bf16 %v646_v35, %v645_v33  ;;  %v623_v52 = vsel %vm555_vm0, %v482_v38, %v591_v44  ;;  %v631_v53 = vsel %vm563_vm1, %v502_v39, %v599_v45 }
  0xd0   : > { %1051 = vst [vmem:[%s1253_s23 + $0x48] sm:$0xff] %v1011_v36   ;;  %v521_v40 = vpop.f32.mrf.mxu2  ;;  %v541_v41 = vpop.f32.mrf.mxu3 }
  0xd1   : > { %1055 = vst [vmem:[%s1253_s23 + $0x68] sm:$0xff] %v1031_v37   ;;  %v483_v42 = vpop.f32.mrf.mxu0  ;;  %v503_v43 = vpop.f32.mrf.mxu1  ;;  %v522_v50 = vadd.f32 %v1231_v26, %v521_v40  ;;  %v542_v51 = vadd.f32 %v1231_v26, %v541_v41 }
  0xd2   : > { %v484_v46 = vadd.f32 %v1231_v26, %v483_v42  ;;  %v504_v47 = vadd.f32 %v1231_v26, %v503_v43 }
  0xd3   : > { %v607_v60 = vmul.f32 %v1237_v28, %v522_v50  ;;  %v615_v61 = vmul.f32 %v1237_v28, %v542_v51  ;;  %vm571_vm4 = vcmp.ge.f32.partialorder %v522_v50, 0.0  ;;  %vm579_vm5 = vcmp.ge.f32.partialorder %v542_v51, 0.0 }
  0xd4   : > { %vm556_vm2 = vcmp.ge.f32.partialorder %v484_v46, 0.0  ;;  %v592_v48 = vmul.f32 %v1237_v28, %v484_v46  ;;  %vm564_vm3 = vcmp.ge.f32.partialorder %v504_v47, 0.0  ;;  %v600_v49 = vmul.f32 %v1237_v28, %v504_v47 }
  0xd5   : > { %v639_v4 = vsel %vm571_vm4, %v522_v50, %v607_v60  ;;  %v647_v5 = vsel %vm579_vm5, %v542_v51, %v615_v61 }
  0xd6   : > { %v624_v54 = vsel %vm556_vm2, %v484_v46, %v592_v48  ;;  %v632_v55 = vsel %vm564_vm3, %v504_v47, %v600_v49 }
  0xd7   : > { %v976_v56 = vpack.c.bf16 %v624_v54, %v623_v52  ;;  %v996_v57 = vpack.c.bf16 %v632_v55, %v631_v53 }
  0xd8   : > { %v523_v58 = vpop.f32.mrf.mxu2  ;;  %v543_v59 = vpop.f32.mrf.mxu3 }
  0xd9   : > { %1044 = vst [vmem:[%s1253_s23 + $0x10] sm:$0xff] %v976_v56   ;;  %v524_v62 = vadd.f32 %v1231_v26, %v523_v58  ;;  %v544_v63 = vadd.f32 %v1231_v26, %v543_v59  ;;  %v486_v0 = vpop.f32.mrf.mxu0  ;;  %v506_v1 = vpop.f32.mrf.mxu1 }
  0xda   : > { %1048 = vst [vmem:[%s1253_s23 + $0x30] sm:$0xff] %v996_v57   ;;  %v487_v10 = vadd.f32 %v1231_v26, %v486_v0  ;;  %v507_v11 = vadd.f32 %v1231_v26, %v506_v1 }
  0xdb   : > { %vm572_vm6 = vcmp.ge.f32.partialorder %v524_v62, 0.0  ;;  %v608_v2 = vmul.f32 %v1237_v28, %v524_v62  ;;  %vm580_vm7 = vcmp.ge.f32.partialorder %v544_v63, 0.0  ;;  %v616_v3 = vmul.f32 %v1237_v28, %v544_v63 }
  0xdc   : > { %v593_v16 = vmul.f32 %v1237_v28, %v487_v10  ;;  %v601_v17 = vmul.f32 %v1237_v28, %v507_v11  ;;  %vm557_vm8 = vcmp.ge.f32.partialorder %v487_v10, 0.0  ;;  %vm565_vm9 = vcmp.ge.f32.partialorder %v507_v11, 0.0 }
  0xdd   : > { %v640_v6 = vsel %vm572_vm6, %v524_v62, %v608_v2  ;;  %v648_v7 = vsel %vm580_vm7, %v544_v63, %v616_v3 }
  0xde   : > { %v1016_v8 = vpack.c.bf16 %v640_v6, %v639_v4  ;;  %v1036_v9 = vpack.c.bf16 %v648_v7, %v647_v5  ;;  %v625_v24 = vsel %vm557_vm8, %v487_v10, %v593_v16  ;;  %v633_v25 = vsel %vm565_vm9, %v507_v11, %v601_v17 }
  0xe0   : > { %1052 = vst [vmem:[%s1253_s23 + $0x50] sm:$0xff] %v1016_v8   ;;  %v526_v12 = vpop.f32.mrf.mxu2  ;;  %v546_v13 = vpop.f32.mrf.mxu3 }
  0xe1   : > { %1056 = vst [vmem:[%s1253_s23 + $0x70] sm:$0xff] %v1036_v9   ;;  %v488_v14 = vpop.f32.mrf.mxu0  ;;  %v508_v15 = vpop.f32.mrf.mxu1  ;;  %v527_v22 = vadd.f32 %v1231_v26, %v526_v12  ;;  %v547_v23 = vadd.f32 %v1231_v26, %v546_v13 }
  0xe2   : > { %v489_v18 = vadd.f32 %v1231_v26, %v488_v14  ;;  %v509_v19 = vadd.f32 %v1231_v26, %v508_v15 }
  0xe3   : > { %v609_v34 = vmul.f32 %v1237_v28, %v527_v22  ;;  %v617_v35 = vmul.f32 %v1237_v28, %v547_v23  ;;  %vm573_vm12 = vcmp.ge.f32.partialorder %v527_v22, 0.0  ;;  %vm581_vm13 = vcmp.ge.f32.partialorder %v547_v23, 0.0 }
  0xe4   : > { %vm558_vm10 = vcmp.ge.f32.partialorder %v489_v18, 0.0  ;;  %v594_v20 = vmul.f32 %v1237_v28, %v489_v18  ;;  %vm566_vm11 = vcmp.ge.f32.partialorder %v509_v19, 0.0  ;;  %v602_v21 = vmul.f32 %v1237_v28, %v509_v19 }
  0xe5   : > { %v641_v40 = vsel %vm573_vm12, %v527_v22, %v609_v34  ;;  %v649_v41 = vsel %vm581_vm13, %v547_v23, %v617_v35 }
  0xe6   : > { %v626_v27 = vsel %vm558_vm10, %v489_v18, %v594_v20  ;;  %v634_v29 = vsel %vm566_vm11, %v509_v19, %v602_v21 }
  0xe7   : > { %v981_v30 = vpack.c.bf16 %v626_v27, %v625_v24  ;;  %v1001_v31 = vpack.c.bf16 %v634_v29, %v633_v25 }
  0xe8   : > { %v528_v32 = vpop.f32.mrf.mxu2  ;;  %v548_v33 = vpop.f32.mrf.mxu3 }
  0xe9   : > { %1045 = vst [vmem:[%s1253_s23 + $0x18] sm:$0xff] %v981_v30   ;;  %v529_v36 = vadd.f32 %v1231_v26, %v528_v32  ;;  %v549_v37 = vadd.f32 %v1231_v26, %v548_v33 }
  0xea   : > { %1049 = vst [vmem:[%s1253_s23 + $0x38] sm:$0xff] %v1001_v31  }
  0xeb   : > { %vm574_vm14 = vcmp.ge.f32.partialorder %v529_v36, 0.0  ;;  %v610_v38 = vmul.f32 %v1237_v28, %v529_v36  ;;  %vm582_vm15 = vcmp.ge.f32.partialorder %v549_v37, 0.0  ;;  %v618_v39 = vmul.f32 %v1237_v28, %v549_v37 }
  0xed   : > { %v642_v42 = vsel %vm574_vm14, %v529_v36, %v610_v38  ;;  %v650_v43 = vsel %vm582_vm15, %v549_v37, %v618_v39 }
  0xee   : > { %v1021_v44 = vpack.c.bf16 %v642_v42, %v641_v40  ;;  %v1041_v45 = vpack.c.bf16 %v650_v43, %v649_v41 }
  0xf0   : > { %1053 = vst [vmem:[%s1253_s23 + $0x58] sm:$0xff] %v1021_v44  }
  0xf1   : > { %1057 = vst [vmem:[%s1253_s23 + $0x78] sm:$0xff] %v1041_v45  }
  0xf2 PF: > { %s14_s17 = sadd.s32 1, %s1130_s17   ;;  %s1339_s15 = smov %s1126_s16 }
  0xf3   : > { %p11_p5 = scmp.ge.s32.totalorder %s14_s17, 4   ;;  %s1340_s16 = smov %s1342_s18 }
  0xf5   :  { %13 = sbr.rel (!%p11_p5) target bundleno = 2 (0x2), region = 75 }

</bundles_post_ra>
